<compile_context>
chip_gen: v7x
topology: tpu7x:2x2x1
jax: 0.10.0
libtpu: 0.0.40
codegen_flags: <defaults>
</compile_context>

<pallas_src>
import functools

import jax
import jax.numpy as jnp
from jax import lax
from jax.experimental import pallas as pl
from jax.experimental.pallas import tpu as pltpu

N_DIM = 100
DIMS = [N_DIM, 550, 250, 120, 60, 8, 3]
PAD = [128, 640, 256, 128, 128, 128, 128]  # lane-aligned padded widths
NEG_BIG = -1e30  # finite "-inf": padded rows contribute exp(...)==0, never NaN


def _round_up(x, m):
    return ((x + m - 1) // m) * m


def logits_kernel(x_ref, wa_ref, wb_ref, logits_ref, stats_ref, *, valid_rows, tb):
    """One batch tile: full MLP forward -> logits + per-tile softmax partials."""
    x = x_ref[...]                        # [TB, 128]  (cols >= 100 are zero)
    w1 = wa_ref[0:128, :]                 # [128, 640]
    b = wa_ref[128:136, :]                # [8, 640]   row i = bias of layer i+1
    w2 = wb_ref[:, 0:256]                 # [640, 256]
    wt = wb_ref[:, 256:384]               # [640, 128] = W3|W4|W5|W6 along rows

    h = jnp.maximum(jnp.dot(x, w1, preferred_element_type=jnp.float32)
                    + b[0:1, :], 0.0)                                   # [TB, 640]
    h = jnp.maximum(jnp.dot(h, w2, preferred_element_type=jnp.float32)
                    + b[1:2, 0:256], 0.0)                               # [TB, 256]
    h = jnp.maximum(jnp.dot(h, wt[0:256, :], preferred_element_type=jnp.float32)
                    + b[2:3, 0:128], 0.0)                               # [TB, 128]
    h = jnp.maximum(jnp.dot(h, wt[256:384, :], preferred_element_type=jnp.float32)
                    + b[3:4, 0:128], 0.0)                               # [TB, 128]
    h = jnp.maximum(jnp.dot(h, wt[384:512, :], preferred_element_type=jnp.float32)
                    + b[4:5, 0:128], 0.0)                               # [TB, 128]
    logits = (jnp.dot(h, wt[512:640, :], preferred_element_type=jnp.float32)
              + b[5:6, 0:128])                                          # [TB, 128]

    # Mask batch-tail rows (only the last tile can have any) to a huge negative.
    row = lax.broadcasted_iota(jnp.int32, (tb, 1), 0) + pl.program_id(0) * tb
    logits = jnp.where(row < valid_rows, logits, jnp.float32(NEG_BIG))
    logits_ref[...] = logits

    # Per-tile dim-0 (batch) softmax partials, per column.
    m = jnp.max(logits, axis=0, keepdims=True)                          # [1, 128]
    s = jnp.sum(jnp.exp(logits - m), axis=0, keepdims=True)             # [1, 128]
    stats_ref[...] = jnp.concatenate(
        [m, s, jnp.zeros((6, 128), jnp.float32)], axis=0)               # [8, 128]


def softmax_rescale_kernel(stats_ref, logits_ref, out_ref):
    """Pass 2: normalize each tile with the global per-column (max, sum)."""
    m = stats_ref[0:1, :]
    s = stats_ref[1:2, :]
    out_ref[...] = jnp.exp(logits_ref[...] - m) / s


def init_params(key):
    """Deterministic parameter init (PyTorch-Linear-style uniform bounds)."""
    params = []
    for i in range(len(DIMS) - 1):
        fan_in, fan_out = DIMS[i], DIMS[i + 1]
        key, kw, kb = jax.random.split(key, 3)
        bound = 1.0 / (fan_in ** 0.5)
        w = jax.random.uniform(kw, (fan_in, fan_out), jnp.float32, -bound, bound)
        b = jax.random.uniform(kb, (fan_out,), jnp.float32, -bound, bound)
        params.append((w, b))
    return params


def pack_params(params):
    """Zero-pad to lane-aligned shapes and pack into two contiguous slabs."""
    padded = []
    bias = jnp.zeros((8, PAD[1]), jnp.float32)
    for i, (w, b) in enumerate(params):
        wp = jnp.zeros((PAD[i], PAD[i + 1]), jnp.float32)
        wp = wp.at[: w.shape[0], : w.shape[1]].set(w)
        padded.append(wp)
        bias = bias.at[i, : b.shape[0]].set(b)
    w_tail = jnp.concatenate(padded[2:], axis=0)            # [640, 128]
    slab_a = jnp.concatenate([padded[0], bias], axis=0)     # [136, 640]
    slab_b = jnp.concatenate([padded[1], w_tail], axis=1)   # [640, 384]
    return slab_a, slab_b


@jax.jit
def analysis_forward(x, slab_a, slab_b):
    B = x.shape[0]
    # Batch tile: multiple of 256 (full MXU M on v6e/v7x), capped at 512 so the
    # working set stays well under v7x's 64 MiB physical / 32 MiB scoped VMEM.
    tb = min(512, _round_up(max(B, 1), 256))
    bp = _round_up(B, tb)
    nt = bp // tb

    # Single fusable pad: features 100->128 and batch tail B->Bp (zeros).
    xp = jnp.pad(x, ((0, bp - B), (0, PAD[0] - N_DIM)))

    flops = 2 * bp * (128 * 640 + 640 * 256 + 256 * 128 + 3 * 128 * 128)
    bytes_acc = 4 * (slab_a.size + slab_b.size + xp.size + bp * 128 + nt * 8 * 128)
    cparams = pltpu.CompilerParams(
        dimension_semantics=("parallel",),
        vmem_limit_bytes=32 * 1024 * 1024,
    )

    # Pass 1: MLP -> logits (+ per-tile softmax partials), weights resident.
    logits, stats = pl.pallas_call(
        functools.partial(logits_kernel, valid_rows=B, tb=tb),
        grid=(nt,),
        in_specs=[
            pl.BlockSpec((tb, PAD[0]), lambda i: (i, 0)),   # x: tiled on batch
            pl.BlockSpec((136, 640), lambda i: (0, 0)),     # W1|bias: resident
            pl.BlockSpec((640, 384), lambda i: (0, 0)),     # W2|Wtail: resident
        ],
        out_specs=(
            pl.BlockSpec((tb, 128), lambda i: (i, 0)),      # logits (lane-dense)
            pl.BlockSpec((8, 128), lambda i: (i, 0)),       # per-tile stats
        ),
        out_shape=(
            jax.ShapeDtypeStruct((bp, 128), jnp.float32),
            jax.ShapeDtypeStruct((nt * 8, 128), jnp.float32),
        ),
        compiler_params=cparams,
        cost_estimate=pl.CostEstimate(
            flops=flops, transcendentals=bp * 128, bytes_accessed=bytes_acc),
    )(xp, slab_a, slab_b)

    # Tiny O(nt*128) combine of per-tile (max, sum) into global dim-0 stats.
    stats = stats.reshape(nt, 8, 128)
    m_t, s_t = stats[:, 0, :], stats[:, 1, :]
    m_g = jnp.max(m_t, axis=0, keepdims=True)
    s_g = jnp.sum(s_t * jnp.exp(m_t - m_g), axis=0, keepdims=True)
    gstats = jnp.concatenate(
        [m_g, s_g, jnp.zeros((6, 128), jnp.float32)], axis=0)          # [8, 128]

    # Pass 2: rescale each batch tile with the global stats.
    out_padded = pl.pallas_call(
        softmax_rescale_kernel,
        grid=(nt,),
        in_specs=[
            pl.BlockSpec((8, 128), lambda i: (0, 0)),        # global stats: resident
            pl.BlockSpec((tb, 128), lambda i: (i, 0)),       # logits: tiled
        ],
        out_specs=pl.BlockSpec((tb, 128), lambda i: (i, 0)),
        out_shape=jax.ShapeDtypeStruct((bp, 128), jnp.float32),
        compiler_params=cparams,
        cost_estimate=pl.CostEstimate(
            flops=2 * bp * 128, transcendentals=bp * 128,
            bytes_accessed=4 * (2 * bp * 128 + 8 * 128)),
    )(gstats, logits)

    return out_padded[:B, : DIMS[-1]]


def reference_forward(x, params):
    h = x
    for (w, b) in params[:-1]:
        h = jnp.maximum(h @ w + b[None, :], 0.0)
    w, b = params[-1]
    return jax.nn.softmax(h @ w + b[None, :], axis=0)


if __name__ == "__main__":
    key = jax.random.PRNGKey(0)
    key, kx = jax.random.split(key)

    batch = 10  # not a multiple of the batch tile -> exercises tail-row masking
    x = jax.random.normal(kx, (batch, N_DIM), dtype=jnp.float32)

    params = init_params(key)
    slab_a, slab_b = pack_params(params)

    out = jax.block_until_ready(analysis_forward(x, slab_a, slab_b))
    ref = reference_forward(x, params)

    assert out.shape == (batch, 3), out.shape
    assert jnp.allclose(out, ref, atol=1e-5, rtol=1e-5), "mismatch vs reference"
    # columns of a dim=0 softmax sum to 1 over the batch axis
    assert jnp.allclose(jnp.sum(out, axis=0), jnp.ones((3,)), atol=1e-5)

    print("KERNEL_OK")
</pallas_src>

<mosaic_0001>
module attributes {stable_mosaic.version = 11 : i64} {
  func.func @logits_kernel(%arg0: i32, %arg1: memref<256x128xf32, #tpu.memory_space<vmem>>, %arg2: memref<136x640xf32, #tpu.memory_space<vmem>>, %arg3: memref<640x384xf32, #tpu.memory_space<vmem>>, %arg4: memref<256x128xf32, #tpu.memory_space<vmem>>, %arg5: memref<8x128xf32, #tpu.memory_space<vmem>>) attributes {dimension_semantics = [#tpu.dimension_semantics<parallel>], iteration_bounds = array<i64: 1>, scalar_prefetch = 0 : i64, scratch_operands = 0 : i64, tpu.core_type = #tpu.core_type<tc>, window_params = [{transform_indices = @transform_0, window_bounds = array<i64: 256, 128>}, {pipeline_mode = #tpu.pipeline_mode<synchronous>, transform_indices = @transform_1, window_bounds = array<i64: 136, 640>}, {pipeline_mode = #tpu.pipeline_mode<synchronous>, transform_indices = @transform_2, window_bounds = array<i64: 640, 384>}, {transform_indices = @transform_3, window_bounds = array<i64: 256, 128>}, {transform_indices = @transform_4, window_bounds = array<i64: 8, 128>}]} {
    %c0 = arith.constant 0 : index
    %c0_0 = arith.constant 0 : index
    %0 = vector.load %arg1[%c0, %c0_0] : memref<256x128xf32, #tpu.memory_space<vmem>>, vector<256x128xf32>
    %c0_1 = arith.constant 0 : index
    %c0_2 = arith.constant 0 : index
    %1 = vector.load %arg2[%c0_1, %c0_2] : memref<136x640xf32, #tpu.memory_space<vmem>>, vector<128x640xf32>
    %c128 = arith.constant 128 : index
    %c0_3 = arith.constant 0 : index
    %2 = vector.load %arg2[%c128, %c0_3] : memref<136x640xf32, #tpu.memory_space<vmem>>, vector<8x640xf32>
    %c0_4 = arith.constant 0 : index
    %c0_5 = arith.constant 0 : index
    %3 = vector.load %arg3[%c0_4, %c0_5] : memref<640x384xf32, #tpu.memory_space<vmem>>, vector<640x256xf32>
    %c0_6 = arith.constant 0 : index
    %c256 = arith.constant 256 : index
    %4 = vector.load %arg3[%c0_6, %c256] : memref<640x384xf32, #tpu.memory_space<vmem>>, vector<640x128xf32>
    %cst = arith.constant dense<0.000000e+00> : vector<256x640xf32>
    %5 = tpu.matmul %0, %1, %cst {dimension_numbers = #tpu.dot_dimension_numbers<[1], [0], [0], [1], [0, 0, 1, 1], [], []>} : vector<256x128xf32>, vector<128x640xf32>, vector<256x640xf32> -> vector<256x640xf32>
    %6 = vector.extract_strided_slice %2 {offsets = [0, 0], sizes = [1, 640], strides = [1, 1]} : vector<8x640xf32> to vector<1x640xf32>
    %7 = vector.broadcast %6 : vector<1x640xf32> to vector<256x640xf32>
    %8 = arith.addf %5, %7 : vector<256x640xf32>
    %cst_7 = arith.constant 0.000000e+00 : f32
    %9 = vector.broadcast %cst_7 : f32 to vector<256x640xf32>
    %10 = arith.maximumf %8, %9 : vector<256x640xf32>
    %cst_8 = arith.constant dense<0.000000e+00> : vector<256x256xf32>
    %11 = tpu.matmul %10, %3, %cst_8 {dimension_numbers = #tpu.dot_dimension_numbers<[1], [0], [0], [1], [0, 0, 1, 1], [], []>} : vector<256x640xf32>, vector<640x256xf32>, vector<256x256xf32> -> vector<256x256xf32>
    %12 = vector.extract_strided_slice %2 {offsets = [1, 0], sizes = [1, 256], strides = [1, 1]} : vector<8x640xf32> to vector<1x256xf32>
    %13 = vector.broadcast %12 : vector<1x256xf32> to vector<256x256xf32>
    %14 = arith.addf %11, %13 : vector<256x256xf32>
    %cst_9 = arith.constant 0.000000e+00 : f32
    %15 = vector.broadcast %cst_9 : f32 to vector<256x256xf32>
    %16 = arith.maximumf %14, %15 : vector<256x256xf32>
    %17 = vector.extract_strided_slice %4 {offsets = [0, 0], sizes = [256, 128], strides = [1, 1]} : vector<640x128xf32> to vector<256x128xf32>
    %cst_10 = arith.constant dense<0.000000e+00> : vector<256x128xf32>
    %18 = tpu.matmul %16, %17, %cst_10 {dimension_numbers = #tpu.dot_dimension_numbers<[1], [0], [0], [1], [0, 0, 1, 1], [], []>} : vector<256x256xf32>, vector<256x128xf32>, vector<256x128xf32> -> vector<256x128xf32>
    %19 = vector.extract_strided_slice %2 {offsets = [2, 0], sizes = [1, 128], strides = [1, 1]} : vector<8x640xf32> to vector<1x128xf32>
    %20 = vector.broadcast %19 : vector<1x128xf32> to vector<256x128xf32>
    %21 = arith.addf %18, %20 : vector<256x128xf32>
    %cst_11 = arith.constant 0.000000e+00 : f32
    %22 = vector.broadcast %cst_11 : f32 to vector<256x128xf32>
    %23 = arith.maximumf %21, %22 : vector<256x128xf32>
    %24 = vector.extract_strided_slice %4 {offsets = [256, 0], sizes = [128, 128], strides = [1, 1]} : vector<640x128xf32> to vector<128x128xf32>
    %cst_12 = arith.constant dense<0.000000e+00> : vector<256x128xf32>
    %25 = tpu.matmul %23, %24, %cst_12 {dimension_numbers = #tpu.dot_dimension_numbers<[1], [0], [0], [1], [0, 0, 1, 1], [], []>} : vector<256x128xf32>, vector<128x128xf32>, vector<256x128xf32> -> vector<256x128xf32>
    %26 = vector.extract_strided_slice %2 {offsets = [3, 0], sizes = [1, 128], strides = [1, 1]} : vector<8x640xf32> to vector<1x128xf32>
    %27 = vector.broadcast %26 : vector<1x128xf32> to vector<256x128xf32>
    %28 = arith.addf %25, %27 : vector<256x128xf32>
    %cst_13 = arith.constant 0.000000e+00 : f32
    %29 = vector.broadcast %cst_13 : f32 to vector<256x128xf32>
    %30 = arith.maximumf %28, %29 : vector<256x128xf32>
    %31 = vector.extract_strided_slice %4 {offsets = [384, 0], sizes = [128, 128], strides = [1, 1]} : vector<640x128xf32> to vector<128x128xf32>
    %cst_14 = arith.constant dense<0.000000e+00> : vector<256x128xf32>
    %32 = tpu.matmul %30, %31, %cst_14 {dimension_numbers = #tpu.dot_dimension_numbers<[1], [0], [0], [1], [0, 0, 1, 1], [], []>} : vector<256x128xf32>, vector<128x128xf32>, vector<256x128xf32> -> vector<256x128xf32>
    %33 = vector.extract_strided_slice %2 {offsets = [4, 0], sizes = [1, 128], strides = [1, 1]} : vector<8x640xf32> to vector<1x128xf32>
    %34 = vector.broadcast %33 : vector<1x128xf32> to vector<256x128xf32>
    %35 = arith.addf %32, %34 : vector<256x128xf32>
    %cst_15 = arith.constant 0.000000e+00 : f32
    %36 = vector.broadcast %cst_15 : f32 to vector<256x128xf32>
    %37 = arith.maximumf %35, %36 : vector<256x128xf32>
    %38 = vector.extract_strided_slice %4 {offsets = [512, 0], sizes = [128, 128], strides = [1, 1]} : vector<640x128xf32> to vector<128x128xf32>
    %cst_16 = arith.constant dense<0.000000e+00> : vector<256x128xf32>
    %39 = tpu.matmul %37, %38, %cst_16 {dimension_numbers = #tpu.dot_dimension_numbers<[1], [0], [0], [1], [0, 0, 1, 1], [], []>} : vector<256x128xf32>, vector<128x128xf32>, vector<256x128xf32> -> vector<256x128xf32>
    %40 = vector.extract_strided_slice %2 {offsets = [5, 0], sizes = [1, 128], strides = [1, 1]} : vector<8x640xf32> to vector<1x128xf32>
    %41 = vector.broadcast %40 : vector<1x128xf32> to vector<256x128xf32>
    %42 = arith.addf %39, %41 : vector<256x128xf32>
    %43 = tpu.iota {dimensions = array<i32: 0>} : vector<256x1xi32>
    %c256_i32 = arith.constant 256 : i32
    %44 = arith.muli %arg0, %c256_i32 : i32
    %45 = vector.broadcast %44 : i32 to vector<256x1xi32>
    %46 = arith.addi %43, %45 : vector<256x1xi32>
    %c10_i32 = arith.constant 10 : i32
    %47 = vector.broadcast %c10_i32 : i32 to vector<256x1xi32>
    %48 = arith.cmpi slt, %46, %47 : vector<256x1xi32>
    %cst_17 = arith.constant -1.000000e+30 : f32
    %49 = vector.shape_cast %48 : vector<256x1xi1> to vector<256x1xi1>
    %50 = vector.broadcast %49 : vector<256x1xi1> to vector<256x128xi1>
    %51 = vector.broadcast %cst_17 : f32 to vector<256x128xf32>
    %52 = arith.select %50, %42, %51 : vector<256x128xi1>, vector<256x128xf32>
    %c0_18 = arith.constant 0 : index
    %c0_19 = arith.constant 0 : index
    %53 = vector.load %arg4[%c0_18, %c0_19] : memref<256x128xf32, #tpu.memory_space<vmem>>, vector<256x128xf32>
    tpu.vector_store %arg4[%c0_18, %c0_19], %52 {strides = array<i32>} : memref<256x128xf32, #tpu.memory_space<vmem>>, vector<256x128xf32>,
    %cst_20 = arith.constant dense<0xFF800000> : vector<128xf32>
    %54 = vector.multi_reduction <maximumf>, %52, %cst_20 [0] : vector<256x128xf32> to vector<128xf32>
    %55 = vector.shape_cast %54 : vector<128xf32> to vector<1x128xf32>
    %56 = vector.broadcast %55 : vector<1x128xf32> to vector<256x128xf32>
    %57 = arith.subf %52, %56 : vector<256x128xf32>
    %58 = math.exp %57 : vector<256x128xf32>
    %cst_21 = arith.constant dense<0.000000e+00> : vector<128xf32>
    %59 = vector.multi_reduction <add>, %58, %cst_21 [0] : vector<256x128xf32> to vector<128xf32>
    %60 = vector.shape_cast %59 : vector<128xf32> to vector<1x128xf32>
    %cst_22 = arith.constant 0.000000e+00 : f32
    %61 = vector.broadcast %cst_22 : f32 to vector<6x128xf32>
    %62 = tpu.concatenate %55, %60, %61 in 0 : vector<1x128xf32>, vector<1x128xf32>, vector<6x128xf32> -> vector<8x128xf32>
    %c0_23 = arith.constant 0 : index
    %c0_24 = arith.constant 0 : index
    %63 = vector.load %arg5[%c0_23, %c0_24] : memref<8x128xf32, #tpu.memory_space<vmem>>, vector<8x128xf32>
    tpu.vector_store %arg5[%c0_23, %c0_24], %62 {strides = array<i32>} : memref<8x128xf32, #tpu.memory_space<vmem>>, vector<8x128xf32>,
    return
  }
  func.func @transform_0(%arg0: i32) -> (i32, i32) {
    %c0_i32 = arith.constant 0 : i32
    %c0_i32_0 = arith.constant 0 : i32
    return %arg0, %c0_i32 : i32, i32
  }
  func.func @transform_1(%arg0: i32) -> (i32, i32) {
    %c0_i32 = arith.constant 0 : i32
    %c0_i32_0 = arith.constant 0 : i32
    %c0_i32_1 = arith.constant 0 : i32
    return %c0_i32, %c0_i32_0 : i32, i32
  }
  func.func @transform_2(%arg0: i32) -> (i32, i32) {
    %c0_i32 = arith.constant 0 : i32
    %c0_i32_0 = arith.constant 0 : i32
    %c0_i32_1 = arith.constant 0 : i32
    return %c0_i32, %c0_i32_0 : i32, i32
  }
  func.func @transform_3(%arg0: i32) -> (i32, i32) {
    %c0_i32 = arith.constant 0 : i32
    %c0_i32_0 = arith.constant 0 : i32
    return %arg0, %c0_i32 : i32, i32
  }
  func.func @transform_4(%arg0: i32) -> (i32, i32) {
    %c0_i32 = arith.constant 0 : i32
    %c0_i32_0 = arith.constant 0 : i32
    return %arg0, %c0_i32 : i32, i32
  }
}

module attributes {stable_mosaic.version = 11 : i64} {
  func.func @softmax_rescale_kernel(%arg0: i32, %arg1: memref<8x128xf32, #tpu.memory_space<vmem>>, %arg2: memref<256x128xf32, #tpu.memory_space<vmem>>, %arg3: memref<256x128xf32, #tpu.memory_space<vmem>>) attributes {dimension_semantics = [#tpu.dimension_semantics<parallel>], iteration_bounds = array<i64: 1>, scalar_prefetch = 0 : i64, scratch_operands = 0 : i64, tpu.core_type = #tpu.core_type<tc>, window_params = [{pipeline_mode = #tpu.pipeline_mode<synchronous>, transform_indices = @transform_0, window_bounds = array<i64: 8, 128>}, {transform_indices = @transform_1, window_bounds = array<i64: 256, 128>}, {transform_indices = @transform_2, window_bounds = array<i64: 256, 128>}]} {
    %c0 = arith.constant 0 : index
    %c0_0 = arith.constant 0 : index
    %0 = vector.load %arg1[%c0, %c0_0] : memref<8x128xf32, #tpu.memory_space<vmem>>, vector<1x128xf32>
    %c1 = arith.constant 1 : index
    %c0_1 = arith.constant 0 : index
    %1 = vector.load %arg1[%c1, %c0_1] : memref<8x128xf32, #tpu.memory_space<vmem>>, vector<1x128xf32>
    %c0_2 = arith.constant 0 : index
    %c0_3 = arith.constant 0 : index
    %2 = vector.load %arg2[%c0_2, %c0_3] : memref<256x128xf32, #tpu.memory_space<vmem>>, vector<256x128xf32>
    %3 = vector.broadcast %0 : vector<1x128xf32> to vector<256x128xf32>
    %4 = arith.subf %2, %3 : vector<256x128xf32>
    %5 = math.exp %4 : vector<256x128xf32>
    %6 = vector.broadcast %1 : vector<1x128xf32> to vector<256x128xf32>
    %7 = arith.divf %5, %6 : vector<256x128xf32>
    %c0_4 = arith.constant 0 : index
    %c0_5 = arith.constant 0 : index
    %8 = vector.load %arg3[%c0_4, %c0_5] : memref<256x128xf32, #tpu.memory_space<vmem>>, vector<256x128xf32>
    tpu.vector_store %arg3[%c0_4, %c0_5], %7 {strides = array<i32>} : memref<256x128xf32, #tpu.memory_space<vmem>>, vector<256x128xf32>,
    return
  }
  func.func @transform_0(%arg0: i32) -> (i32, i32) {
    %c0_i32 = arith.constant 0 : i32
    %c0_i32_0 = arith.constant 0 : i32
    %c0_i32_1 = arith.constant 0 : i32
    return %c0_i32, %c0_i32_0 : i32, i32
  }
  func.func @transform_1(%arg0: i32) -> (i32, i32) {
    %c0_i32 = arith.constant 0 : i32
    %c0_i32_0 = arith.constant 0 : i32
    return %arg0, %c0_i32 : i32, i32
  }
  func.func @transform_2(%arg0: i32) -> (i32, i32) {
    %c0_i32 = arith.constant 0 : i32
    %c0_i32_0 = arith.constant 0 : i32
    return %arg0, %c0_i32 : i32, i32
  }
}

</mosaic_0001>

<bundles_post_ra>
// kernel: analysis_forward.3
= control target key start
LH: loop header
LB: loop body
LE: loop exit
PB: predicated region body
PF: predicated region fallthrough
CT: control target
= control target key end

     0   :  { %s567_s0 = inlined_call_operand.vmem [shape: f32[8,128], index: 0, kind: input, shape index: {}]   ;;  %s568_s1 = inlined_call_operand.vmem [shape: f32[256,128], index: 1, kind: input, shape index: {}]   ;;  %s569_s2 = inlined_call_operand.vmem [shape: f32[256,128], index: 2, kind: output, shape index: {}]  }
   0x1   :  { %v304_v0 = vld [vmem:[%s567_s0] ss:$0 sm:$0xff]  ;;  %v219_v1 = vld [vmem:[%s567_s0 + $0x1] ss:$0 sm:$0xff]  ;;  %v14_v4 = vld [vmem:[%s568_s1 + $0x8] sm:$0xff] }
   0x2   :  { %v13_v2 = vld [vmem:[%s568_s1] sm:$0xff]  ;;  %v15_v5 = vld [vmem:[%s568_s1 + $0x10] sm:$0xff]  ;;  %v16_v6 = vld [vmem:[%s568_s1 + $0x18] sm:$0xff]  ;;  %220 = vrcp.f32 %v219_v1  ;;  %v50_v7 = vsub.f32 %v14_v4, %v304_v0 }
   0x3   :  { %v49_v3 = vsub.f32 %v13_v2, %v304_v0  ;;  %v51_v8 = vsub.f32 %v15_v5, %v304_v0  ;;  %v52_v9 = vsub.f32 %v16_v6, %v304_v0  ;;  %v17_v10 = vld [vmem:[%s568_s1 + $0x20] sm:$0xff]  ;;  %v18_v11 = vld [vmem:[%s568_s1 + $0x28] sm:$0xff]  ;;  %v19_v12 = vld [vmem:[%s568_s1 + $0x30] sm:$0xff] }
   0x4   :  { %v53_v14 = vsub.f32 %v17_v10, %v304_v0  ;;  %v54_v15 = vsub.f32 %v18_v11, %v304_v0  ;;  %v55_v16 = vsub.f32 %v19_v12, %v304_v0  ;;  %v20_v17 = vld [vmem:[%s568_s1 + $0x38] sm:$0xff]  ;;  %v21_v18 = vld [vmem:[%s568_s1 + $0x40] sm:$0xff]  ;;  %v22_v19 = vld [vmem:[%s568_s1 + $0x48] sm:$0xff]  ;;  %v83_v20 = vmul.f32 1.442695, %v50_v7 }
   0x5   :  { %v81_v13 = vmul.f32 1.442695, %v49_v3  ;;  %v85_v21 = vmul.f32 1.442695, %v51_v8  ;;  %v87_v22 = vmul.f32 1.442695, %v52_v9  ;;  %v56_v23 = vsub.f32 %v20_v17, %v304_v0 }
   0x6   :  { %v89_v24 = vmul.f32 1.442695, %v53_v14  ;;  %v91_v25 = vmul.f32 1.442695, %v54_v15  ;;  %v57_v26 = vsub.f32 %v21_v18, %v304_v0  ;;  %v58_v27 = vsub.f32 %v22_v19, %v304_v0  ;;  %v23_v28 = vld [vmem:[%s568_s1 + $0x50] sm:$0xff]  ;;  %v24_v29 = vld [vmem:[%s568_s1 + $0x58] sm:$0xff] }
   0x7   :  { %222 = vpow2.f32 %v81_v13  ;;  %v25_v30 = vld [vmem:[%s568_s1 + $0x60] sm:$0xff]  ;;  %v93_v31 = vmul.f32 1.442695, %v55_v16  ;;  %v59_v32 = vsub.f32 %v23_v28, %v304_v0  ;;  %v26_v33 = vld [vmem:[%s568_s1 + $0x68] sm:$0xff]  ;;  %v95_v34 = vmul.f32 1.442695, %v56_v23 }
   0x8   :  { %224 = vpow2.f32 %v83_v20  ;;  %v60_v35 = vsub.f32 %v24_v29, %v304_v0  ;;  %v27_v36 = vld [vmem:[%s568_s1 + $0x70] sm:$0xff]  ;;  %v97_v37 = vmul.f32 1.442695, %v57_v26  ;;  %v61_v38 = vsub.f32 %v25_v30, %v304_v0  ;;  %v28_v39 = vld [vmem:[%s568_s1 + $0x78] sm:$0xff]  ;;  %v29_v42 = vld [vmem:[%s568_s1 + $0x80] sm:$0xff] }
   0x9   :  { %226 = vpow2.f32 %v85_v21  ;;  %v99_v40 = vmul.f32 1.442695, %v58_v27  ;;  %v62_v41 = vsub.f32 %v26_v33, %v304_v0  ;;  %v101_v43 = vmul.f32 1.442695, %v59_v32  ;;  %v30_v45 = vld [vmem:[%s568_s1 + $0x88] sm:$0xff]  ;;  %v31_v49 = vld [vmem:[%s568_s1 + $0x90] sm:$0xff] }
   0xa   :  { %228 = vpow2.f32 %v87_v22  ;;  %v63_v44 = vsub.f32 %v27_v36, %v304_v0  ;;  %v103_v47 = vmul.f32 1.442695, %v60_v35  ;;  %v64_v48 = vsub.f32 %v28_v39, %v304_v0  ;;  %v32_v52 = vld [vmem:[%s568_s1 + $0x98] sm:$0xff]  ;;  %v33_v55 = vld [vmem:[%s568_s1 + $0xa0] sm:$0xff]  ;;  %v34_v59 = vld [vmem:[%s568_s1 + $0xa8] sm:$0xff] }
   0xb   :  { %230 = vpow2.f32 %v89_v24  ;;  %v105_v50 = vmul.f32 1.442695, %v61_v38  ;;  %v65_v51 = vsub.f32 %v29_v42, %v304_v0  ;;  %v107_v53 = vmul.f32 1.442695, %v62_v41  ;;  %v35_v1 = vld [vmem:[%s568_s1 + $0xb0] sm:$0xff]  ;;  %v36_v6 = vld [vmem:[%s568_s1 + $0xb8] sm:$0xff] }
   0xc   :  { %232 = vpow2.f32 %v91_v25  ;;  %v378_v46 = vpop.eup %220  ;;  %v66_v54 = vsub.f32 %v30_v45, %v304_v0  ;;  %v109_v57 = vmul.f32 1.442695, %v63_v44  ;;  %v67_v58 = vsub.f32 %v31_v49, %v304_v0  ;;  %v37_v11 = vld [vmem:[%s568_s1 + $0xc0] sm:$0xff]  ;;  %v38_v16 = vld [vmem:[%s568_s1 + $0xc8] sm:$0xff]  ;;  %v39_v21 = vld [vmem:[%s568_s1 + $0xd0] sm:$0xff] }
   0xd   :  { %234 = vpow2.f32 %v93_v31  ;;  %v111_v62 = vmul.f32 1.442695, %v64_v48  ;;  %v68_v63 = vsub.f32 %v32_v52, %v304_v0  ;;  %v113_v4 = vmul.f32 1.442695, %v65_v51  ;;  %v40_v26 = vld [vmem:[%s568_s1 + $0xd8] sm:$0xff]  ;;  %v41_v31 = vld [vmem:[%s568_s1 + $0xe0] sm:$0xff] }
   0xe   :  { %236 = vpow2.f32 %v95_v34  ;;  %v69_v5 = vsub.f32 %v33_v55, %v304_v0  ;;  %v115_v9 = vmul.f32 1.442695, %v66_v54  ;;  %v70_v10 = vsub.f32 %v34_v59, %v304_v0  ;;  %v42_v36 = vld [vmem:[%s568_s1 + $0xe8] sm:$0xff]  ;;  %v43_v41 = vld [vmem:[%s568_s1 + $0xf0] sm:$0xff] }
   0xf   :  { %238 = vpow2.f32 %v97_v37  ;;  %v117_v14 = vmul.f32 1.442695, %v67_v58  ;;  %v71_v15 = vsub.f32 %v35_v1, %v304_v0  ;;  %v119_v19 = vmul.f32 1.442695, %v68_v63 }
  0x10   :  { %240 = vpow2.f32 %v99_v40  ;;  %v72_v20 = vsub.f32 %v36_v6, %v304_v0  ;;  %v121_v24 = vmul.f32 1.442695, %v69_v5  ;;  %v73_v25 = vsub.f32 %v37_v11, %v304_v0 }
  0x11   :  { %v223_v56 = vpop.eup %222  ;;  %242 = vpow2.f32 %v101_v43  ;;  %v123_v29 = vmul.f32 1.442695, %v70_v10  ;;  %v74_v30 = vsub.f32 %v38_v16, %v304_v0  ;;  %v125_v34 = vmul.f32 1.442695, %v71_v15 }
  0x12   :  { %v225_v60 = vpop.eup %224  ;;  %v150_v61 = vmul.f32 %v223_v56, %v378_v46  ;;  %244 = vpow2.f32 %v103_v47  ;;  %v75_v35 = vsub.f32 %v39_v21, %v304_v0  ;;  %v127_v39 = vmul.f32 1.442695, %v72_v20  ;;  %v44_v47 = vld [vmem:[%s568_s1 + $0xf8] sm:$0xff] }
  0x13   :  { %v227_v2 = vpop.eup %226  ;;  %v151_v3 = vmul.f32 %v225_v60, %v378_v46  ;;  %246 = vpow2.f32 %v105_v50  ;;  %v76_v40 = vsub.f32 %v40_v26, %v304_v0  ;;  %v129_v44 = vmul.f32 1.442695, %v73_v25 }
  0x14   :  { %v229_v7 = vpop.eup %228  ;;  %182 = vst [vmem:[%s569_s2] sm:$0xff] %v150_v61  ;;  %v152_v8 = vmul.f32 %v227_v2, %v378_v46  ;;  %248 = vpow2.f32 %v107_v53  ;;  %v77_v45 = vsub.f32 %v41_v31, %v304_v0  ;;  %v131_v50 = vmul.f32 1.442695, %v74_v30 }
  0x15   :  { %v231_v12 = vpop.eup %230  ;;  %183 = vst [vmem:[%s569_s2 + $0x8] sm:$0xff] %v151_v3  ;;  %v153_v13 = vmul.f32 %v229_v7, %v378_v46  ;;  %250 = vpow2.f32 %v109_v57  ;;  %v78_v51 = vsub.f32 %v42_v36, %v304_v0  ;;  %v133_v54 = vmul.f32 1.442695, %v75_v35 }
  0x16   :  { %v233_v17 = vpop.eup %232  ;;  %184 = vst [vmem:[%s569_s2 + $0x10] sm:$0xff] %v152_v8  ;;  %v154_v18 = vmul.f32 %v231_v12, %v378_v46  ;;  %252 = vpow2.f32 %v111_v62  ;;  %v79_v55 = vsub.f32 %v43_v41, %v304_v0  ;;  %v135_v58 = vmul.f32 1.442695, %v76_v40 }
  0x17   :  { %v235_v22 = vpop.eup %234  ;;  %185 = vst [vmem:[%s569_s2 + $0x18] sm:$0xff] %v153_v13  ;;  %v155_v23 = vmul.f32 %v233_v17, %v378_v46  ;;  %254 = vpow2.f32 %v113_v4  ;;  %v80_v59 = vsub.f32 %v44_v47, %v304_v0  ;;  %v137_v62 = vmul.f32 1.442695, %v77_v45 }
  0x18   :  { %v237_v27 = vpop.eup %236  ;;  %186 = vst [vmem:[%s569_s2 + $0x20] sm:$0xff] %v154_v18  ;;  %v156_v28 = vmul.f32 %v235_v22, %v378_v46  ;;  %256 = vpow2.f32 %v115_v9  ;;  %v139_v2 = vmul.f32 1.442695, %v78_v51  ;;  %v141_v4 = vmul.f32 1.442695, %v79_v55 }
  0x19   :  { %v239_v32 = vpop.eup %238  ;;  %187 = vst [vmem:[%s569_s2 + $0x28] sm:$0xff] %v155_v23  ;;  %v157_v33 = vmul.f32 %v237_v27, %v378_v46  ;;  %258 = vpow2.f32 %v117_v14  ;;  %v143_v7 = vmul.f32 1.442695, %v80_v59 }
  0x1a   :  { %v241_v37 = vpop.eup %240  ;;  %188 = vst [vmem:[%s569_s2 + $0x30] sm:$0xff] %v156_v28  ;;  %v158_v38 = vmul.f32 %v239_v32, %v378_v46  ;;  %260 = vpow2.f32 %v119_v19 }
  0x1b   :  { %v243_v42 = vpop.eup %242  ;;  %189 = vst [vmem:[%s569_s2 + $0x38] sm:$0xff] %v157_v33  ;;  %v159_v43 = vmul.f32 %v241_v37, %v378_v46  ;;  %262 = vpow2.f32 %v121_v24 }
  0x1c   :  { %v245_v48 = vpop.eup %244  ;;  %190 = vst [vmem:[%s569_s2 + $0x40] sm:$0xff] %v158_v38  ;;  %v160_v49 = vmul.f32 %v243_v42, %v378_v46  ;;  %264 = vpow2.f32 %v123_v29 }
  0x1d   :  { %v247_v52 = vpop.eup %246  ;;  %191 = vst [vmem:[%s569_s2 + $0x48] sm:$0xff] %v159_v43  ;;  %v161_v53 = vmul.f32 %v245_v48, %v378_v46  ;;  %266 = vpow2.f32 %v125_v34 }
  0x1e   :  { %v249_v56 = vpop.eup %248  ;;  %192 = vst [vmem:[%s569_s2 + $0x50] sm:$0xff] %v160_v49  ;;  %v162_v57 = vmul.f32 %v247_v52, %v378_v46  ;;  %268 = vpow2.f32 %v127_v39 }
  0x1f   :  { %v251_v60 = vpop.eup %250  ;;  %193 = vst [vmem:[%s569_s2 + $0x58] sm:$0xff] %v161_v53  ;;  %v163_v61 = vmul.f32 %v249_v56, %v378_v46  ;;  %270 = vpow2.f32 %v129_v44 }
  0x20   :  { %v253_v63 = vpop.eup %252  ;;  %194 = vst [vmem:[%s569_s2 + $0x60] sm:$0xff] %v162_v57  ;;  %v164_v1 = vmul.f32 %v251_v60, %v378_v46  ;;  %272 = vpow2.f32 %v131_v50 }
  0x21   :  { %v255_v3 = vpop.eup %254  ;;  %195 = vst [vmem:[%s569_s2 + $0x68] sm:$0xff] %v163_v61  ;;  %v165_v0 = vmul.f32 %v253_v63, %v378_v46  ;;  %274 = vpow2.f32 %v133_v54 }
  0x22   :  { %v257_v5 = vpop.eup %256  ;;  %196 = vst [vmem:[%s569_s2 + $0x70] sm:$0xff] %v164_v1  ;;  %v166_v6 = vmul.f32 %v255_v3, %v378_v46  ;;  %276 = vpow2.f32 %v135_v58 }
  0x23   :  { %v259_v8 = vpop.eup %258  ;;  %197 = vst [vmem:[%s569_s2 + $0x78] sm:$0xff] %v165_v0  ;;  %v167_v9 = vmul.f32 %v257_v5, %v378_v46  ;;  %278 = vpow2.f32 %v137_v62 }
  0x24   :  { %v261_v10 = vpop.eup %260  ;;  %198 = vst [vmem:[%s569_s2 + $0x80] sm:$0xff] %v166_v6  ;;  %v168_v11 = vmul.f32 %v259_v8, %v378_v46  ;;  %280 = vpow2.f32 %v139_v2 }
  0x25   :  { %v263_v12 = vpop.eup %262  ;;  %199 = vst [vmem:[%s569_s2 + $0x88] sm:$0xff] %v167_v9  ;;  %v169_v13 = vmul.f32 %v261_v10, %v378_v46  ;;  %282 = vpow2.f32 %v141_v4 }
  0x26   :  { %v265_v14 = vpop.eup %264  ;;  %200 = vst [vmem:[%s569_s2 + $0x90] sm:$0xff] %v168_v11  ;;  %v170_v15 = vmul.f32 %v263_v12, %v378_v46  ;;  %284 = vpow2.f32 %v143_v7 }
  0x27   :  { %v267_v16 = vpop.eup %266  ;;  %201 = vst [vmem:[%s569_s2 + $0x98] sm:$0xff] %v169_v13  ;;  %v171_v17 = vmul.f32 %v265_v14, %v378_v46 }
  0x28   :  { %v269_v18 = vpop.eup %268  ;;  %202 = vst [vmem:[%s569_s2 + $0xa0] sm:$0xff] %v170_v15  ;;  %v172_v19 = vmul.f32 %v267_v16, %v378_v46 }
  0x29   :  { %v271_v20 = vpop.eup %270  ;;  %203 = vst [vmem:[%s569_s2 + $0xa8] sm:$0xff] %v171_v17  ;;  %v173_v21 = vmul.f32 %v269_v18, %v378_v46 }
  0x2a   :  { %v273_v22 = vpop.eup %272  ;;  %204 = vst [vmem:[%s569_s2 + $0xb0] sm:$0xff] %v172_v19  ;;  %v174_v23 = vmul.f32 %v271_v20, %v378_v46 }
  0x2b   :  { %v275_v24 = vpop.eup %274  ;;  %205 = vst [vmem:[%s569_s2 + $0xb8] sm:$0xff] %v173_v21  ;;  %v175_v25 = vmul.f32 %v273_v22, %v378_v46 }
  0x2c   :  { %v277_v26 = vpop.eup %276  ;;  %206 = vst [vmem:[%s569_s2 + $0xc0] sm:$0xff] %v174_v23  ;;  %v176_v27 = vmul.f32 %v275_v24, %v378_v46 }
  0x2d   :  { %v279_v28 = vpop.eup %278  ;;  %207 = vst [vmem:[%s569_s2 + $0xc8] sm:$0xff] %v175_v25  ;;  %v177_v29 = vmul.f32 %v277_v26, %v378_v46 }
  0x2e   :  { %v281_v30 = vpop.eup %280  ;;  %208 = vst [vmem:[%s569_s2 + $0xd0] sm:$0xff] %v176_v27  ;;  %v178_v31 = vmul.f32 %v279_v28, %v378_v46 }
  0x2f   :  { %v283_v32 = vpop.eup %282  ;;  %209 = vst [vmem:[%s569_s2 + $0xd8] sm:$0xff] %v177_v29  ;;  %v179_v33 = vmul.f32 %v281_v30, %v378_v46 }
  0x30   :  { %v285_v34 = vpop.eup %284  ;;  %210 = vst [vmem:[%s569_s2 + $0xe0] sm:$0xff] %v178_v31  ;;  %v180_v35 = vmul.f32 %v283_v32, %v378_v46 }
  0x31   :  { %211 = vst [vmem:[%s569_s2 + $0xe8] sm:$0xff] %v179_v33  ;;  %v181_v36 = vmul.f32 %v285_v34, %v378_v46 }
  0x32   :  { %212 = vst [vmem:[%s569_s2 + $0xf0] sm:$0xff] %v180_v35 }
  0x33   :  { %213 = vst [vmem:[%s569_s2 + $0xf8] sm:$0xff] %v181_v36 }

// kernel: analysis_forward.2
= control target key start
LH: loop header
LB: loop body
LE: loop exit
PB: predicated region body
PF: predicated region fallthrough
CT: control target
= control target key end

     0   :  { %10 = vsyncpa [#allocation3], 0  ;;  %s5921_s0 = inlined_call_operand.vmem [shape: f32[256,128], index: 0, kind: input, shape index: {}]   ;;  %s5922_s1 = inlined_call_operand.hbm [shape: f32[136,640], index: 1, kind: input, shape index: {}]   ;;  %s5923_s2 = inlined_call_operand.hbm [shape: f32[640,384], index: 2, kind: input, shape index: {}]   ;;  %s5924_s3 = inlined_call_operand.vmem [shape: f32[256,128], index: 3, kind: output, shape index: {0}]   ;;  %s5925_s4 = inlined_call_operand.vmem [shape: f32[8,128], index: 4, kind: output, shape index: {1}]  }
   0x1   :  { %11 = vsyncpa [#allocation5], 0  ;;  %s4757_s15 = smov [#allocation2]   ;;  %s4709_s19 = scalar_lea.hbm %s5922_s1, 10880 }
   0x2   :  { %s19_s16 = sshll.u32 %s4757_s15, 4  ;;  %p4710_p0 = scmp.ne.s32.totalorder %s5922_s1, %s4709_s19  ;;  %s20_s16 = int_to_ptr.vmem [resolvable:$true] %s19_s16 }
   0x3   :  { %p4713_p1 = scmp.lt.u32.totalorder %s4709_s19, %s5922_s1 }
   0x5   :  { %p4715_p2 = pnand %p4713_p1, %p4710_p0 }
   0x7   :  { %4718 = shalt.err (!%p4715_p2)
}
   0x8   :  { %s4719_s24 = scalar_lea.vmem %s20_s16, 10880  ;;  %p4724_p4 = scmp.lt.s32.totalorder %s20_s16, %s20_s16 }
   0x9   :  { %p4720_p3 = scmp.ne.s32.totalorder %s20_s16, %s4719_s24  ;;  %p4725_p5 = scmp.lt.s32.totalorder %s4719_s24, %s4719_s24 }
   0xb   :  { %p4726_p6 = por %p4725_p5, %p4724_p4 }
   0xd   :  { %p4727_p7 = pnand %p4726_p6, %p4720_p3 }
   0xf   :  { %4730 = shalt.err (!%p4727_p7)
}
  0x10   :  { %s4758_s25 = smov 640   ;;  %s4759_s26 = smov 40  }
  0x11   :  { %25 = dma.hbm_to_vmem [thread:$0]  %s5922_s1, 10880, %s20_s16, [#allocation3], %s4758_s25, %s4758_s25, %s4759_s26  }
  0x12   :  { %s4760_s29 = smov [#allocation4]   ;;  %s4731_s7 = scalar_lea.hbm %s5923_s2, 30720 }
  0x13   :  { %s31_s30 = sshll.u32 %s4760_s29, 4  ;;  %p4732_p8 = scmp.ne.s32.totalorder %s5923_s2, %s4731_s7  ;;  %s32_s30 = int_to_ptr.vmem [resolvable:$true] %s31_s30 }
  0x14   :  { %p4735_p9 = scmp.lt.u32.totalorder %s4731_s7, %s5923_s2 }
  0x16   :  { %p4737_p10 = pnand %p4735_p9, %p4732_p8 }
  0x18   :  { %4740 = shalt.err (!%p4737_p10)
}
  0x19   :  { %s4741_s12 = scalar_lea.vmem %s32_s30, 30720  ;;  %p4746_p12 = scmp.lt.s32.totalorder %s32_s30, %s32_s30 }
  0x1a   :  { %p4742_p11 = scmp.ne.s32.totalorder %s32_s30, %s4741_s12  ;;  %p4747_p13 = scmp.lt.s32.totalorder %s4741_s12, %s4741_s12 }
  0x1c   :  { %p4748_p0 = por %p4747_p13, %p4746_p12 }
  0x1e   :  { %p4749_p1 = pnand %p4748_p0, %p4742_p11 }
  0x20   :  { %4752 = shalt.err (!%p4749_p1)
}
  0x21   :  { %s4761_s1 = smov 384   ;;  %s4762_s13 = smov 24  }
  0x22   :  { %37 = dma.hbm_to_vmem [thread:$0]  %s5923_s2, 30720, %s32_s30, [#allocation5], %s4761_s1, %s4761_s1, %s4762_s13  }
  0x23   :  { %4753 = dma.done.wait [#allocation3], 10880  }
  0x24   :  { %4754 = vsyncadd [#allocation3], 4294956416 }
  0x25   :  { %4755 = dma.done.wait [#allocation5], 30720  }
  0x26   :  { %4756 = vsyncadd [#allocation5], 4294936576  ;;  %v4763_v0 = vmov -1e+30   ;;  %v5926_v1 = vmov 0.0   ;;  %v77_v2 = vld [vmem:[#allocation2 + $0x8] sm:$0xff] }
  0x27   :  { %3372 = vst [vmem:[%s5924_s3 + $0x10] sm:$0xff] %v4763_v0  ;;  %3373 = vst [vmem:[%s5924_s3 + $0x18] sm:$0xff] %v4763_v0  ;;  %485 = vmatprep.mubr.f32.mxu0 %v5926_v1  ;;  %742 = vmatprep.mubr.f32.mxu1 %v5926_v1  ;;  %v82_v3 = vld [vmem:[#allocation2 + $0x30] sm:$0xff]  ;;  %v76_v4 = vld [vmem:[#allocation2] sm:$0xff]  ;;  %vm3572_vm1 = vcmask 1040384   ;;  %vm3574_vm2 = vcmask 1041408  }
  0x28   :  { %3374 = vst [vmem:[%s5924_s3 + $0x20] sm:$0xff] %v4763_v0  ;;  %3375 = vst [vmem:[%s5924_s3 + $0x28] sm:$0xff] %v4763_v0  ;;  %v4099_v5 = vpack.c.bf16 %v82_v3, %v77_v2  ;;  %v81_v6 = vld [vmem:[#allocation2 + $0x28] sm:$0xff]  ;;  %v87_v7 = vld [vmem:[#allocation2 + $0x58] sm:$0xff] }
  0x29   :  { %3376 = vst [vmem:[%s5924_s3 + $0x30] sm:$0xff] %v4763_v0  ;;  %3377 = vst [vmem:[%s5924_s3 + $0x38] sm:$0xff] %v4763_v0  ;;  %v92_v8 = vld [vmem:[#allocation2 + $0x80] sm:$0xff]  ;;  %v4101_v9 = vpack.c.bf16 %v81_v6, %v76_v4  ;;  %v86_v11 = vld [vmem:[#allocation2 + $0x50] sm:$0xff] }
  0x2a   :  { %3378 = vst [vmem:[%s5924_s3 + $0x40] sm:$0xff] %v4763_v0  ;;  %3379 = vst [vmem:[%s5924_s3 + $0x48] sm:$0xff] %v4763_v0  ;;  %v4103_v10 = vpack.c.bf16 %v92_v8, %v87_v7  ;;  %v91_v12 = vld [vmem:[#allocation2 + $0x78] sm:$0xff]  ;;  %v97_v13 = vld [vmem:[#allocation2 + $0xa8] sm:$0xff]  ;;  %4100 = vmatprep.subr.bf16.mxu0 %v4099_v5 }
  0x2b   :  { %3380 = vst [vmem:[%s5924_s3 + $0x50] sm:$0xff] %v4763_v0  ;;  %3381 = vst [vmem:[%s5924_s3 + $0x58] sm:$0xff] %v4763_v0  ;;  %v102_v14 = vld [vmem:[#allocation2 + $0xd0] sm:$0xff]  ;;  %4102 = vmatpush1.bf16.msra.mxu0 %v4101_v9  ;;  %v4105_v15 = vpack.c.bf16 %v91_v12, %v86_v11  ;;  %v96_v17 = vld [vmem:[#allocation2 + $0xa0] sm:$0xff] }
  0x2c   :  { %3382 = vst [vmem:[%s5924_s3 + $0x60] sm:$0xff] %v4763_v0  ;;  %3383 = vst [vmem:[%s5924_s3 + $0x68] sm:$0xff] %v4763_v0  ;;  %4104 = vmatprep.subr.bf16.mxu0 %v4103_v10  ;;  %v4107_v16 = vpack.c.bf16 %v102_v14, %v97_v13  ;;  %v101_v18 = vld [vmem:[#allocation2 + $0xc8] sm:$0xff]  ;;  %v107_v19 = vld [vmem:[#allocation2 + $0xf8] sm:$0xff] }
  0x2d   :  { %3384 = vst [vmem:[%s5924_s3 + $0x70] sm:$0xff] %v4763_v0  ;;  %3385 = vst [vmem:[%s5924_s3 + $0x78] sm:$0xff] %v4763_v0  ;;  %v112_v20 = vld [vmem:[#allocation2 + $0x120] sm:$0xff]  ;;  %v4109_v21 = vpack.c.bf16 %v101_v18, %v96_v17  ;;  %v106_v23 = vld [vmem:[#allocation2 + $0xf0] sm:$0xff] }
  0x2e   :  { %3386 = vst [vmem:[%s5924_s3 + $0x80] sm:$0xff] %v4763_v0  ;;  %3387 = vst [vmem:[%s5924_s3 + $0x88] sm:$0xff] %v4763_v0  ;;  %v4111_v22 = vpack.c.bf16 %v112_v20, %v107_v19  ;;  %v111_v24 = vld [vmem:[#allocation2 + $0x118] sm:$0xff]  ;;  %v117_v25 = vld [vmem:[#allocation2 + $0x148] sm:$0xff] }
  0x2f   :  { %3388 = vst [vmem:[%s5924_s3 + $0x90] sm:$0xff] %v4763_v0  ;;  %3389 = vst [vmem:[%s5924_s3 + $0x98] sm:$0xff] %v4763_v0  ;;  %4106 = vmatpush1.bf16.msra.mxu0 %v4105_v15  ;;  %v122_v26 = vld [vmem:[#allocation2 + $0x170] sm:$0xff]  ;;  %v4113_v27 = vpack.c.bf16 %v111_v24, %v106_v23  ;;  %v116_v29 = vld [vmem:[#allocation2 + $0x140] sm:$0xff] }
  0x30   :  { %3390 = vst [vmem:[%s5924_s3 + $0xa0] sm:$0xff] %v4763_v0  ;;  %3391 = vst [vmem:[%s5924_s3 + $0xa8] sm:$0xff] %v4763_v0  ;;  %4108 = vmatprep.subr.bf16.mxu0 %v4107_v16  ;;  %v4115_v28 = vpack.c.bf16 %v122_v26, %v117_v25  ;;  %v121_v30 = vld [vmem:[#allocation2 + $0x168] sm:$0xff]  ;;  %v127_v31 = vld [vmem:[#allocation2 + $0x198] sm:$0xff] }
  0x31   :  { %3392 = vst [vmem:[%s5924_s3 + $0xb0] sm:$0xff] %v4763_v0  ;;  %3393 = vst [vmem:[%s5924_s3 + $0xb8] sm:$0xff] %v4763_v0  ;;  %v132_v32 = vld [vmem:[#allocation2 + $0x1c0] sm:$0xff]  ;;  %v126_v33 = vld [vmem:[#allocation2 + $0x190] sm:$0xff]  ;;  %v4117_v36 = vpack.c.bf16 %v121_v30, %v116_v29 }
  0x32   :  { %3394 = vst [vmem:[%s5924_s3 + $0xc0] sm:$0xff] %v4763_v0  ;;  %3395 = vst [vmem:[%s5924_s3 + $0xc8] sm:$0xff] %v4763_v0  ;;  %v131_v34 = vld [vmem:[#allocation2 + $0x1b8] sm:$0xff]  ;;  %v84_v37 = vld [vmem:[#allocation2 + $0x40] sm:$0xff]  ;;  %v4119_v40 = vpack.c.bf16 %v132_v32, %v127_v31 }
  0x33   :  { %3396 = vst [vmem:[%s5924_s3 + $0xd0] sm:$0xff] %v4763_v0  ;;  %3397 = vst [vmem:[%s5924_s3 + $0xd8] sm:$0xff] %v4763_v0  ;;  %4110 = vmatpush1.bf16.msra.mxu0 %v4109_v21  ;;  %v79_v35 = vld [vmem:[#allocation2 + $0x18] sm:$0xff]  ;;  %v78_v38 = vld [vmem:[#allocation2 + $0x10] sm:$0xff]  ;;  %v4121_v52 = vpack.c.bf16 %v131_v34, %v126_v33 }
  0x34   :  { %3398 = vst [vmem:[%s5924_s3 + $0xe0] sm:$0xff] %v4763_v0  ;;  %3399 = vst [vmem:[%s5924_s3 + $0xe8] sm:$0xff] %v4763_v0  ;;  %4112 = vmatprep.subr.bf16.mxu0 %v4111_v22  ;;  %v83_v39 = vld [vmem:[#allocation2 + $0x38] sm:$0xff]  ;;  %v137_v41 = vld [vmem:[#allocation2 + $0x1e8] sm:$0xff]  ;;  %v4131_v42 = vpack.c.bf16 %v84_v37, %v79_v35 }
  0x35   :  { %3400 = vst [vmem:[%s5924_s3 + $0xf0] sm:$0xff] %v4763_v0  ;;  %3401 = vst [vmem:[%s5924_s3 + $0xf8] sm:$0xff] %v4763_v0  ;;  %v4133_v43 = vpack.c.bf16 %v83_v39, %v78_v38  ;;  %v89_v44 = vld [vmem:[#allocation2 + $0x68] sm:$0xff]  ;;  %v94_v45 = vld [vmem:[#allocation2 + $0x90] sm:$0xff] }
  0x36   :  { %v142_v46 = vld [vmem:[#allocation2 + $0x210] sm:$0xff]  ;;  %v4135_v47 = vpack.c.bf16 %v94_v45, %v89_v44  ;;  %v88_v48 = vld [vmem:[#allocation2 + $0x60] sm:$0xff]  ;;  %v93_v49 = vld [vmem:[#allocation2 + $0x88] sm:$0xff]  ;;  %4132 = vmatprep.subr.bf16.mxu1 %v4131_v42 }
  0x37   :  { %4114 = vmatpush1.bf16.msra.mxu0 %v4113_v27  ;;  %v99_v50 = vld [vmem:[#allocation2 + $0xb8] sm:$0xff]  ;;  %v104_v51 = vld [vmem:[#allocation2 + $0xe0] sm:$0xff]  ;;  %v141_v54 = vld [vmem:[#allocation2 + $0x208] sm:$0xff]  ;;  %4134 = vmatpush1.bf16.msra.mxu1 %v4133_v43  ;;  %v4137_v55 = vpack.c.bf16 %v93_v49, %v88_v48  ;;  %v4123_v56 = vpack.c.bf16 %v142_v46, %v137_v41 }
  0x38   :  { %4116 = vmatprep.subr.bf16.mxu0 %v4115_v28  ;;  %v136_v53 = vld [vmem:[#allocation2 + $0x1e0] sm:$0xff]  ;;  %v147_v57 = vld [vmem:[#allocation2 + $0x238] sm:$0xff]  ;;  %4136 = vmatprep.subr.bf16.mxu1 %v4135_v47  ;;  %v4139_v58 = vpack.c.bf16 %v104_v51, %v99_v50  ;;  %v98_v59 = vld [vmem:[#allocation2 + $0xb0] sm:$0xff] }
  0x39   :  { %v103_v60 = vld [vmem:[#allocation2 + $0xd8] sm:$0xff]  ;;  %v152_v61 = vld [vmem:[#allocation2 + $0x260] sm:$0xff]  ;;  %v109_v62 = vld [vmem:[#allocation2 + $0x108] sm:$0xff]  ;;  %v4125_v0 = vpack.c.bf16 %v141_v54, %v136_v53 }
  0x3a   :  { %v114_v63 = vld [vmem:[#allocation2 + $0x130] sm:$0xff]  ;;  %v4141_v3 = vpack.c.bf16 %v103_v60, %v98_v59  ;;  %v4127_v4 = vpack.c.bf16 %v152_v61, %v147_v57  ;;  %v151_v5 = vld [vmem:[#allocation2 + $0x258] sm:$0xff]  ;;  %v108_v7 = vld [vmem:[#allocation2 + $0x100] sm:$0xff] }
  0x3b   :  { %4118 = vmatpush1.bf16.msra.mxu0 %v4117_v36  ;;  %v146_v2 = vld [vmem:[#allocation2 + $0x230] sm:$0xff]  ;;  %4138 = vmatpush1.bf16.msra.mxu1 %v4137_v55  ;;  %v4143_v6 = vpack.c.bf16 %v114_v63, %v109_v62  ;;  %v113_v8 = vld [vmem:[#allocation2 + $0x128] sm:$0xff]  ;;  %v119_v9 = vld [vmem:[#allocation2 + $0x158] sm:$0xff] }
  0x3c   :  { %4120 = vmatprep.subr.bf16.mxu0 %v4119_v40  ;;  %4140 = vmatprep.subr.bf16.mxu1 %v4139_v58  ;;  %v124_v10 = vld [vmem:[#allocation2 + $0x180] sm:$0xff]  ;;  %v4129_v11 = vpack.c.bf16 %v151_v5, %v146_v2  ;;  %v4145_v12 = vpack.c.bf16 %v113_v8, %v108_v7  ;;  %v118_v14 = vld [vmem:[#allocation2 + $0x150] sm:$0xff]  ;;  %v123_v15 = vld [vmem:[#allocation2 + $0x178] sm:$0xff] }
  0x3d   :  { %v4147_v13 = vpack.c.bf16 %v124_v10, %v119_v9  ;;  %v129_v16 = vld [vmem:[#allocation2 + $0x1a8] sm:$0xff]  ;;  %v134_v17 = vld [vmem:[#allocation2 + $0x1d0] sm:$0xff]  ;;  %v4910_v18 = vld [vmem:[%s5921_s0] sm:$0xff]  ;;  %v4149_v19 = vpack.c.bf16 %v123_v15, %v118_v14 }
  0x3e   :  { %v4151_v20 = vpack.c.bf16 %v134_v17, %v129_v16  ;;  %v128_v21 = vld [vmem:[#allocation2 + $0x1a0] sm:$0xff]  ;;  %v133_v22 = vld [vmem:[#allocation2 + $0x1c8] sm:$0xff]  ;;  %v139_v23 = vld [vmem:[#allocation2 + $0x1f8] sm:$0xff] }
  0x3f   :  { %4122 = vmatpush1.bf16.msra.mxu0 %v4121_v52  ;;  %4142 = vmatpush1.bf16.msra.mxu1 %v4141_v3  ;;  %v144_v24 = vld [vmem:[#allocation2 + $0x220] sm:$0xff]  ;;  %v4917_v25 = vld [vmem:[%s5921_s0 + $0x8] sm:$0xff]  ;;  %v4153_v26 = vpack.c.bf16 %v133_v22, %v128_v21  ;;  %v138_v28 = vld [vmem:[#allocation2 + $0x1f0] sm:$0xff] }
  0x40   :  { %4124 = vmatprep.subr.bf16.mxu0 %v4123_v56  ;;  %4144 = vmatprep.subr.bf16.mxu1 %v4143_v6  ;;  %v4155_v27 = vpack.c.bf16 %v144_v24, %v139_v23  ;;  %v143_v29 = vld [vmem:[#allocation2 + $0x218] sm:$0xff]  ;;  %v149_v30 = vld [vmem:[#allocation2 + $0x248] sm:$0xff]  ;;  %v154_v31 = vld [vmem:[#allocation2 + $0x270] sm:$0xff] }
  0x41   :  { %v80_v32 = vld [vmem:[#allocation2 + $0x20] sm:$0xff]  ;;  %v85_v33 = vld [vmem:[#allocation2 + $0x48] sm:$0xff]  ;;  %v4924_v34 = vld [vmem:[%s5921_s0 + $0x10] sm:$0xff]  ;;  %v4157_v35 = vpack.c.bf16 %v143_v29, %v138_v28  ;;  %v4159_v37 = vpack.c.bf16 %v154_v31, %v149_v30 }
  0x42   :  { %v4163_v36 = vpack.c.bf16 %v85_v33, %v80_v32  ;;  %v148_v38 = vld [vmem:[#allocation2 + $0x240] sm:$0xff]  ;;  %v153_v39 = vld [vmem:[#allocation2 + $0x268] sm:$0xff]  ;;  %v162_v40 = vld [vmem:[#allocation4 + $0x8] sm:$0xff] }
  0x43   :  { %4126 = vmatpush1.bf16.msra.mxu0 %v4125_v0  ;;  %4146 = vmatpush1.bf16.msra.mxu1 %v4145_v12  ;;  %v164_v41 = vld [vmem:[#allocation4 + $0x20] sm:$0xff]  ;;  %v90_v42 = vld [vmem:[#allocation2 + $0x70] sm:$0xff]  ;;  %v95_v43 = vld [vmem:[#allocation2 + $0x98] sm:$0xff]  ;;  %v4161_v46 = vpack.c.bf16 %v153_v39, %v148_v38 }
  0x44   :  { %4128 = vmatprep.subr.bf16.mxu0 %v4127_v4  ;;  %4148 = vmatprep.subr.bf16.mxu1 %v4147_v13  ;;  %v4167_v44 = vpack.c.bf16 %v95_v43, %v90_v42  ;;  %v4931_v45 = vld [vmem:[%s5921_s0 + $0x18] sm:$0xff]  ;;  %v161_v47 = vld [vmem:[#allocation4] sm:$0xff]  ;;  %v4195_v48 = vpack.c.bf16 %v164_v41, %v162_v40  ;;  %v163_v49 = vld [vmem:[#allocation4 + $0x18] sm:$0xff] }
  0x45   :  { %v100_v50 = vld [vmem:[#allocation2 + $0xc0] sm:$0xff]  ;;  %v105_v51 = vld [vmem:[#allocation2 + $0xe8] sm:$0xff]  ;;  %v168_v53 = vld [vmem:[#allocation4 + $0x50] sm:$0xff]  ;;  %v4197_v56 = vpack.c.bf16 %v163_v49, %v161_v47 }
  0x46   :  { %v166_v52 = vld [vmem:[#allocation4 + $0x38] sm:$0xff]  ;;  %v4171_v54 = vpack.c.bf16 %v105_v51, %v100_v50  ;;  %v165_v58 = vld [vmem:[#allocation4 + $0x30] sm:$0xff]  ;;  %v167_v59 = vld [vmem:[#allocation4 + $0x48] sm:$0xff] }
  0x47   :  { %4130 = vmatpush1.bf16.msra.mxu0 %v4129_v11  ;;  %4150 = vmatpush1.bf16.msra.mxu1 %v4149_v19  ;;  %v4938_v55 = vld [vmem:[%s5921_s0 + $0x20] sm:$0xff]  ;;  %v4199_v57 = vpack.c.bf16 %v168_v53, %v166_v52  ;;  %v110_v60 = vld [vmem:[#allocation2 + $0x110] sm:$0xff]  ;;  %v115_v61 = vld [vmem:[#allocation2 + $0x138] sm:$0xff]  ;;  %v4201_v2 = vpack.c.bf16 %v167_v59, %v165_v58 }
  0x48   :  { %4152 = vmatprep.subr.bf16.mxu1 %v4151_v20  ;;  %4164 = vmatprep.subr.bf16.mxu0 %v4163_v36  ;;  %v170_v62 = vld [vmem:[#allocation4 + $0x68] sm:$0xff]  ;;  %v172_v63 = vld [vmem:[#allocation4 + $0x80] sm:$0xff]  ;;  %v4175_v4 = vpack.c.bf16 %v115_v61, %v110_v60  ;;  %v171_v6 = vld [vmem:[#allocation4 + $0x78] sm:$0xff] }
  0x49   :  { %v4946_v0 = vld [vmem:[%s5921_s0 + $0x28] sm:$0xff]  ;;  %v4203_v5 = vpack.c.bf16 %v172_v63, %v170_v62  ;;  %v120_v7 = vld [vmem:[#allocation2 + $0x160] sm:$0xff]  ;;  %v176_v10 = vld [vmem:[#allocation4 + $0xb0] sm:$0xff] }
  0x4a   :  { %486 = vmatmul.mubr.f32.vlgmr.msra.gmra.mrb[0].mxu0 %v4910_v18  ;;  %v169_v3 = vld [vmem:[#allocation4 + $0x60] sm:$0xff]  ;;  %v174_v9 = vld [vmem:[#allocation4 + $0x98] sm:$0xff]  ;;  %v4955_v11 = vld [vmem:[%s5921_s0 + $0x30] sm:$0xff] }
  0x4b   :  { %491 = vmatprep.mubr.f32.mxu0 %v5926_v1  ;;  %4154 = vmatpush1.bf16.msra.mxu1 %v4153_v26  ;;  %v125_v8 = vld [vmem:[#allocation2 + $0x188] sm:$0xff]  ;;  %v4205_v12 = vpack.c.bf16 %v171_v6, %v169_v3  ;;  %v173_v13 = vld [vmem:[#allocation4 + $0x90] sm:$0xff]  ;;  %v4207_v15 = vpack.c.bf16 %v176_v10, %v174_v9  ;;  %v175_v16 = vld [vmem:[#allocation4 + $0xa8] sm:$0xff] }
  0x4c   :  { %4156 = vmatprep.subr.bf16.mxu1 %v4155_v27  ;;  %4166 = vmatpush3.bf16.msra.mxu0 %v4163_v36  ;;  %v4179_v14 = vpack.c.bf16 %v125_v8, %v120_v7  ;;  %v130_v17 = vld [vmem:[#allocation2 + $0x1b0] sm:$0xff]  ;;  %v135_v19 = vld [vmem:[#allocation2 + $0x1d8] sm:$0xff]  ;;  %v180_v21 = vld [vmem:[#allocation4 + $0xe0] sm:$0xff]  ;;  %v4209_v23 = vpack.c.bf16 %v175_v16, %v173_v13 }
  0x4d   :  { %4168 = vmatprep.subr.bf16.mxu0 %v4167_v44  ;;  %v178_v20 = vld [vmem:[#allocation4 + $0xc8] sm:$0xff]  ;;  %v4964_v22 = vld [vmem:[%s5921_s0 + $0x38] sm:$0xff]  ;;  %v4183_v24 = vpack.c.bf16 %v135_v19, %v130_v17  ;;  %v177_v27 = vld [vmem:[#allocation4 + $0xc0] sm:$0xff] }
  0x4e   :  { %492 = vmatmul.mubr.f32.gmra.mrb[2].mxu0 %v4917_v25  ;;  %v4211_v26 = vpack.c.bf16 %v180_v21, %v178_v20  ;;  %v179_v28 = vld [vmem:[#allocation4 + $0xd8] sm:$0xff]  ;;  %v184_v30 = vld [vmem:[#allocation4 + $0x110] sm:$0xff]  ;;  %v183_v36 = vld [vmem:[#allocation4 + $0x108] sm:$0xff] }
  0x4f   :  { %497 = vmatprep.mubr.f32.mxu0 %v5926_v1  ;;  %4158 = vmatpush1.bf16.msra.mxu1 %v4157_v35  ;;  %v182_v29 = vld [vmem:[#allocation4 + $0xf8] sm:$0xff]  ;;  %v4213_v32 = vpack.c.bf16 %v179_v28, %v177_v27  ;;  %v181_v35 = vld [vmem:[#allocation4 + $0xf0] sm:$0xff]  ;;  %v188_v38 = vld [vmem:[#allocation4 + $0x140] sm:$0xff] }
  0x50   :  { %4160 = vmatprep.subr.bf16.mxu1 %v4159_v37  ;;  %4170 = vmatpush3.bf16.msra.mxu0 %v4167_v44  ;;  %v4973_v31 = vld [vmem:[%s5921_s0 + $0x40] sm:$0xff]  ;;  %v4215_v33 = vpack.c.bf16 %v184_v30, %v182_v29  ;;  %v186_v37 = vld [vmem:[#allocation4 + $0x128] sm:$0xff]  ;;  %v4982_v39 = vld [vmem:[%s5921_s0 + $0x48] sm:$0xff]  ;;  %v4217_v40 = vpack.c.bf16 %v183_v36, %v181_v35 }
  0x51   :  { %4172 = vmatprep.subr.bf16.mxu0 %v4171_v54  ;;  %v4219_v41 = vpack.c.bf16 %v188_v38, %v186_v37  ;;  %v185_v42 = vld [vmem:[#allocation4 + $0x120] sm:$0xff]  ;;  %v187_v43 = vld [vmem:[#allocation4 + $0x138] sm:$0xff]  ;;  %v4991_v47 = vld [vmem:[%s5921_s0 + $0x50] sm:$0xff] }
  0x52   :  { %498 = vmatmul.mubr.f32.gmra.mrb[4].mxu0 %v4924_v34  ;;  %v190_v44 = vld [vmem:[#allocation4 + $0x158] sm:$0xff]  ;;  %v189_v50 = vld [vmem:[#allocation4 + $0x150] sm:$0xff]  ;;  %v191_v51 = vld [vmem:[#allocation4 + $0x168] sm:$0xff] }
  0x53   :  { %503 = vmatprep.mubr.f32.mxu0 %v5926_v1  ;;  %4162 = vmatpush1.bf16.msra.mxu1 %v4161_v46  ;;  %v192_v46 = vld [vmem:[#allocation4 + $0x170] sm:$0xff]  ;;  %v194_v52 = vld [vmem:[#allocation4 + $0x188] sm:$0xff]  ;;  %v196_v53 = vld [vmem:[#allocation4 + $0x1a0] sm:$0xff] }
  0x54   :  { %4196 = vmatprep.subr.bf16.mxu1 %v4195_v48  ;;  %4174 = vmatpush3.bf16.msra.mxu0 %v4171_v54  ;;  %v4221_v48 = vpack.c.bf16 %v187_v43, %v185_v42  ;;  %v4223_v49 = vpack.c.bf16 %v192_v46, %v190_v44  ;;  %v5000_v54 = vld [vmem:[%s5921_s0 + $0x58] sm:$0xff]  ;;  %v193_v58 = vld [vmem:[#allocation4 + $0x180] sm:$0xff]  ;;  %v195_v59 = vld [vmem:[#allocation4 + $0x198] sm:$0xff] }
  0x55   :  { %4176 = vmatprep.subr.bf16.mxu0 %v4175_v4  ;;  %v198_v60 = vld [vmem:[#allocation4 + $0x1b8] sm:$0xff]  ;;  %v200_v61 = vld [vmem:[#allocation4 + $0x1d0] sm:$0xff]  ;;  %v4229_v63 = vpack.c.bf16 %v195_v59, %v193_v58  ;;  %v204_v6 = vld [vmem:[#allocation4 + $0x200] sm:$0xff] }
  0x56   :  { %504 = vmatmul.mubr.f32.gmra.mrb[6].mxu0 %v4931_v45  ;;  %743 = vmatmul.mubr.f32.vlgmr.msra.gmra.mrb[0].mxu1 %v4910_v18  ;;  %v5009_v62 = vld [vmem:[%s5921_s0 + $0x60] sm:$0xff]  ;;  %v197_v3 = vld [vmem:[#allocation4 + $0x1b0] sm:$0xff]  ;;  %v5018_v7 = vld [vmem:[%s5921_s0 + $0x68] sm:$0xff] }
  0x57   :  { %509 = vmatprep.mubr.f32.mxu0 %v5926_v1  ;;  %4198 = vmatpush1.bf16.msra.mxu1 %v4197_v56  ;;  %v4225_v56 = vpack.c.bf16 %v191_v51, %v189_v50  ;;  %v201_v10 = vld [vmem:[#allocation4 + $0x1e0] sm:$0xff]  ;;  %v206_v13 = vld [vmem:[#allocation4 + $0x218] sm:$0xff]  ;;  %v205_v19 = vld [vmem:[#allocation4 + $0x210] sm:$0xff] }
  0x58   :  { %748 = vmatprep.mubr.f32.mxu1 %v5926_v1  ;;  %4200 = vmatprep.subr.bf16.mxu1 %v4199_v57  ;;  %v4227_v57 = vpack.c.bf16 %v196_v53, %v194_v52  ;;  %v207_v20 = vld [vmem:[#allocation4 + $0x228] sm:$0xff]  ;;  %v209_v28 = vld [vmem:[#allocation4 + $0x240] sm:$0xff]  ;;  %v211_v29 = vld [vmem:[#allocation4 + $0x258] sm:$0xff] }
  0x59   :  { %4178 = vmatpush3.bf16.msra.mxu0 %v4175_v4  ;;  %v199_v4 = vld [vmem:[#allocation4 + $0x1c8] sm:$0xff]  ;;  %v214_v30 = vld [vmem:[#allocation4 + $0x278] sm:$0xff]  ;;  %v4245_v35 = vpack.c.bf16 %v211_v29, %v209_v28  ;;  %v213_v37 = vld [vmem:[#allocation4 + $0x270] sm:$0xff] }
  0x5a   :  { %510 = vmatmul.mubr.f32.gmra.mrb[8].mxu0 %v4938_v55  ;;  %749 = vmatmul.mubr.f32.gmra.mrb[2].mxu1 %v4917_v25  ;;  %v4233_v8 = vpack.c.bf16 %v199_v4, %v197_v3  ;;  %v210_v21 = vld [vmem:[#allocation4 + $0x248] sm:$0xff]  ;;  %v5054_v42 = vld [vmem:[%s5921_s0 + $0x88] sm:$0xff]  ;;  %v224_v50 = vld [vmem:[#allocation4 + $0x2f0] sm:$0xff] }
  0x5b   :  { %515 = vmatprep.mubr.f32.mxu0 %v5926_v1  ;;  %754 = vmatprep.mubr.f32.mxu1 %v5926_v1  ;;  %v215_v38 = vld [vmem:[#allocation4 + $0x288] sm:$0xff]  ;;  %v217_v46 = vld [vmem:[#allocation4 + $0x2a0] sm:$0xff]  ;;  %v5072_v58 = vld [vmem:[%s5921_s0 + $0x98] sm:$0xff] }
  0x5c   :  { %4202 = vmatpush1.bf16.msra.mxu1 %v4201_v2  ;;  %4180 = vmatprep.subr.bf16.mxu0 %v4179_v14  ;;  %v4231_v2 = vpack.c.bf16 %v200_v61, %v198_v60  ;;  %v4249_v43 = vpack.c.bf16 %v215_v38, %v213_v37  ;;  %v5063_v51 = vld [vmem:[%s5921_s0 + $0x90] sm:$0xff]  ;;  %v5081_v60 = vld [vmem:[%s5921_s0 + $0xa0] sm:$0xff]  ;;  %v5090_v61 = vld [vmem:[%s5921_s0 + $0xa8] sm:$0xff] }
  0x5d   :  { %4204 = vmatprep.subr.bf16.mxu1 %v4203_v5  ;;  %4182 = vmatpush3.bf16.msra.mxu0 %v4179_v14  ;;  %v202_v5 = vld [vmem:[#allocation4 + $0x1e8] sm:$0xff]  ;;  %v208_v14 = vld [vmem:[#allocation4 + $0x230] sm:$0xff]  ;;  %v228_v4 = vld [vmem:[#allocation4 + $0x320] sm:$0xff] }
  0x5e   :  { %516 = vmatmul.mubr.f32.gmra.mrb[10].mxu0 %v4946_v0  ;;  %755 = vmatmul.mubr.f32.gmra.mrb[4].mxu1 %v4924_v34  ;;  %v4235_v9 = vpack.c.bf16 %v204_v6, %v202_v5  ;;  %v4239_v17 = vpack.c.bf16 %v208_v14, %v206_v13  ;;  %v226_v3 = vld [vmem:[#allocation4 + $0x308] sm:$0xff]  ;;  %v5117_v6 = vld [vmem:[%s5921_s0 + $0xc0] sm:$0xff]  ;;  %v5144_v14 = vld [vmem:[%s5921_s0 + $0xd8] sm:$0xff] }
  0x5f   :  { %521 = vmatprep.mubr.f32.mxu0 %v5926_v1  ;;  %760 = vmatprep.mubr.f32.mxu1 %v5926_v1  ;;  %v4259_v5 = vpack.c.bf16 %v228_v4, %v226_v3  ;;  %v5135_v13 = vld [vmem:[%s5921_s0 + $0xd0] sm:$0xff]  ;;  %v237_v3 = vld [vmem:[#allocation4 + $0x390] sm:$0xff] }
  0x60   :  { %4206 = vmatpush1.bf16.msra.mxu1 %v4205_v12  ;;  %4184 = vmatprep.subr.bf16.mxu0 %v4183_v24  ;;  %v203_v12 = vld [vmem:[#allocation4 + $0x1f8] sm:$0xff]  ;;  %v234_v38 = vld [vmem:[#allocation4 + $0x368] sm:$0xff] }
  0x61   :  { %4208 = vmatprep.subr.bf16.mxu1 %v4207_v15  ;;  %4186 = vmatpush3.bf16.msra.mxu0 %v4183_v24  ;;  %v5027_v15 = vld [vmem:[%s5921_s0 + $0x70] sm:$0xff]  ;;  %v4237_v16 = vpack.c.bf16 %v203_v12, %v201_v10  ;;  %v5036_v24 = vld [vmem:[%s5921_s0 + $0x78] sm:$0xff]  ;;  %v145_v10 = vld [vmem:[#allocation2 + $0x228] sm:$0xff] }
  0x62   :  { %522 = vmatmul.mubr.f32.gmra.mrb[12].mxu0 %v4955_v11  ;;  %761 = vmatmul.mubr.f32.gmra.mrb[6].mxu1 %v4931_v45  ;;  %v239_v4 = vld [vmem:[#allocation4 + $0x3a8] sm:$0xff] }
  0x63   :  { %527 = vmatprep.mubr.f32.mxu0 %v5926_v1  ;;  %766 = vmatprep.mubr.f32.mxu1 %v5926_v1 }
  0x64   :  { %4210 = vmatpush1.bf16.msra.mxu1 %v4209_v23  ;;  %v212_v23 = vld [vmem:[#allocation4 + $0x260] sm:$0xff] }
  0x65   :  { %4212 = vmatprep.subr.bf16.mxu1 %v4211_v26  ;;  %v4241_v26 = vpack.c.bf16 %v207_v20, %v205_v19  ;;  %v4243_v27 = vpack.c.bf16 %v212_v23, %v210_v21  ;;  %v150_v19 = vld [vmem:[#allocation2 + $0x250] sm:$0xff]  ;;  %v155_v20 = vld [vmem:[#allocation2 + $0x278] sm:$0xff] }
  0x66   :  { %528 = vmatmul.mubr.f32.gmra.mrb[14].mxu0 %v4964_v22  ;;  %767 = vmatmul.mubr.f32.gmra.mrb[8].mxu1 %v4938_v55  ;;  %v4191_v21 = vpack.c.bf16 %v155_v20, %v150_v19  ;;  %v74_v23 = vld [vmem:[%s5921_s0 + $0xf0] sm:$0xff]  ;;  %v241_v20 = vld [vmem:[#allocation4 + $0x3c0] sm:$0xff] }
  0x67   :  { %533 = vmatprep.mubr.f32.mxu0 %v5926_v1  ;;  %772 = vmatprep.mubr.f32.mxu1 %v5926_v1 }
  0x68   :  { %4214 = vmatpush1.bf16.msra.mxu1 %v4213_v32  ;;  %v216_v32 = vld [vmem:[#allocation4 + $0x290] sm:$0xff] }
  0x69   :  { %4216 = vmatprep.subr.bf16.mxu1 %v4215_v33  ;;  %v5045_v33 = vld [vmem:[%s5921_s0 + $0x80] sm:$0xff]  ;;  %v4247_v36 = vpack.c.bf16 %v216_v32, %v214_v30 }
  0x6a   :  { %534 = vmatmul.mubr.f32.gmra.mrb[16].mxu0 %v4973_v31  ;;  %773 = vmatmul.mubr.f32.gmra.mrb[10].mxu1 %v4946_v0 }
  0x6b   :  { %539 = vmatprep.mubr.f32.mxu0 %v5926_v1  ;;  %778 = vmatprep.mubr.f32.mxu1 %v5926_v1 }
  0x6c   :  { %4218 = vmatpush1.bf16.msra.mxu1 %v4217_v40  ;;  %v218_v40 = vld [vmem:[#allocation4 + $0x2a8] sm:$0xff] }
  0x6d   :  { %4220 = vmatprep.subr.bf16.mxu1 %v4219_v41  ;;  %v220_v41 = vld [vmem:[#allocation4 + $0x2c0] sm:$0xff] }
  0x6e   :  { %540 = vmatmul.mubr.f32.gmra.mrb[18].mxu0 %v4982_v39  ;;  %779 = vmatmul.mubr.f32.gmra.mrb[12].mxu1 %v4955_v11  ;;  %v4251_v44 = vpack.c.bf16 %v220_v41, %v218_v40  ;;  %v236_v40 = vld [vmem:[#allocation4 + $0x380] sm:$0xff] }
  0x6f   :  { %545 = vmatprep.mubr.f32.mxu0 %v5926_v1  ;;  %784 = vmatprep.mubr.f32.mxu1 %v5926_v1 }
  0x70   :  { %4222 = vmatpush1.bf16.msra.mxu1 %v4221_v48  ;;  %v219_v48 = vld [vmem:[#allocation4 + $0x2b8] sm:$0xff] }
  0x71   :  { %4224 = vmatprep.subr.bf16.mxu1 %v4223_v49  ;;  %v222_v49 = vld [vmem:[#allocation4 + $0x2d8] sm:$0xff]  ;;  %v4253_v52 = vpack.c.bf16 %v219_v48, %v217_v46 }
  0x72   :  { %546 = vmatmul.mubr.f32.gmra.mrb[20].mxu0 %v4991_v47  ;;  %785 = vmatmul.mubr.f32.gmra.mrb[14].mxu1 %v4964_v22  ;;  %v4255_v53 = vpack.c.bf16 %v224_v50, %v222_v49  ;;  %v4267_v49 = vpack.c.bf16 %v236_v40, %v234_v38  ;;  %v233_v50 = vld [vmem:[#allocation4 + $0x360] sm:$0xff] }
  0x73   :  { %551 = vmatprep.mubr.f32.mxu0 %v5926_v1  ;;  %790 = vmatprep.mubr.f32.mxu1 %v5926_v1 }
  0x74   :  { %4226 = vmatpush1.bf16.msra.mxu1 %v4225_v56  ;;  %v221_v56 = vld [vmem:[#allocation4 + $0x2d0] sm:$0xff] }
  0x75   :  { %4228 = vmatprep.subr.bf16.mxu1 %v4227_v57  ;;  %v223_v57 = vld [vmem:[#allocation4 + $0x2e8] sm:$0xff] }
  0x76   :  { %552 = vmatmul.mubr.f32.gmra.mrb[22].mxu0 %v5000_v54  ;;  %791 = vmatmul.mubr.f32.gmra.mrb[16].mxu1 %v4973_v31  ;;  %v4257_v59 = vpack.c.bf16 %v223_v57, %v221_v56  ;;  %v240_v56 = vld [vmem:[#allocation4 + $0x3b0] sm:$0xff] }
  0x77   :  { %557 = vmatprep.mubr.f32.mxu0 %v5926_v1  ;;  %796 = vmatprep.mubr.f32.mxu1 %v5926_v1 }
  0x78   :  { %4230 = vmatpush1.bf16.msra.mxu1 %v4229_v63  ;;  %v5099_v63 = vld [vmem:[%s5921_s0 + $0xb0] sm:$0xff] }
  0x79   :  { %4232 = vmatprep.subr.bf16.mxu1 %v4231_v2  ;;  %v5108_v2 = vld [vmem:[%s5921_s0 + $0xb8] sm:$0xff] }
  0x7a   :  { %558 = vmatmul.mubr.f32.gmra.mrb[24].mxu0 %v5009_v62  ;;  %797 = vmatmul.mubr.f32.gmra.mrb[18].mxu1 %v4982_v39 }
  0x7b   :  { %563 = vmatprep.mubr.f32.mxu0 %v5926_v1  ;;  %802 = vmatprep.mubr.f32.mxu1 %v5926_v1 }
  0x7c   :  { %4234 = vmatpush1.bf16.msra.mxu1 %v4233_v8  ;;  %v5126_v8 = vld [vmem:[%s5921_s0 + $0xc8] sm:$0xff] }
  0x7d   :  { %4236 = vmatprep.subr.bf16.mxu1 %v4235_v9  ;;  %v140_v9 = vld [vmem:[#allocation2 + $0x200] sm:$0xff] }
  0x7e   :  { %564 = vmatmul.mubr.f32.gmra.mrb[26].mxu0 %v5018_v7  ;;  %803 = vmatmul.mubr.f32.gmra.mrb[20].mxu1 %v4991_v47  ;;  %v4187_v12 = vpack.c.bf16 %v145_v10, %v140_v9 }
  0x7f   :  { %569 = vmatprep.mubr.f32.mxu0 %v5926_v1  ;;  %808 = vmatprep.mubr.f32.mxu1 %v5926_v1 }
  0x80   :  { %4238 = vmatpush1.bf16.msra.mxu1 %v4237_v16  ;;  %4188 = vmatprep.subr.bf16.mxu0 %v4187_v12  ;;  %v72_v16 = vld [vmem:[%s5921_s0 + $0xe0] sm:$0xff] }
  0x81   :  { %4240 = vmatprep.subr.bf16.mxu1 %v4239_v17  ;;  %4190 = vmatpush3.bf16.msra.mxu0 %v4187_v12  ;;  %v73_v17 = vld [vmem:[%s5921_s0 + $0xe8] sm:$0xff]  ;;  %v4273_v12 = vpack.c.bf16 %v239_v4, %v237_v3  ;;  %v258_v3 = vld [vmem:[#allocation4 + $0x488] sm:$0xff] }
  0x82   :  { %570 = vmatmul.mubr.f32.gmra.mrb[28].mxu0 %v5027_v15  ;;  %809 = vmatmul.mubr.f32.gmra.mrb[22].mxu1 %v5000_v54  ;;  %v260_v4 = vld [vmem:[#allocation4 + $0x4a0] sm:$0xff] }
  0x83   :  { %575 = vmatprep.mubr.f32.mxu0 %v5926_v1  ;;  %814 = vmatprep.mubr.f32.mxu1 %v5926_v1 }
  0x84   :  { %4242 = vmatpush1.bf16.msra.mxu1 %v4241_v26  ;;  %4192 = vmatprep.subr.bf16.mxu0 %v4191_v21  ;;  %v75_v26 = vld [vmem:[%s5921_s0 + $0xf8] sm:$0xff] }
  0x85   :  { %4244 = vmatprep.subr.bf16.mxu1 %v4243_v27  ;;  %4194 = vmatpush3.bf16.msra.mxu0 %v4191_v21  ;;  %v243_v21 = vld [vmem:[#allocation4 + $0x3d8] sm:$0xff] }
  0x86   :  { %576 = vmatmul.mubr.f32.gmra.mrb[30].mxu0 %v5036_v24  ;;  %815 = vmatmul.mubr.f32.gmra.mrb[24].mxu1 %v5009_v62 }
  0x87   :  { %581 = vmatprep.mubr.f32.mxu0 %v5926_v1  ;;  %820 = vmatprep.mubr.f32.mxu1 %v5926_v1 }
  0x88   :  { %4246 = vmatpush1.bf16.msra.mxu1 %v4245_v35  ;;  %v229_v35 = vld [vmem:[#allocation4 + $0x330] sm:$0xff] }
  0x89   :  { %4248 = vmatprep.subr.bf16.mxu1 %v4247_v36  ;;  %v231_v36 = vld [vmem:[#allocation4 + $0x348] sm:$0xff] }
  0x8a   :  { %582 = vmatmul.mubr.f32.gmra.mrb[32].mxu0 %v5045_v33  ;;  %821 = vmatmul.mubr.f32.gmra.mrb[26].mxu1 %v5018_v7 }
  0x8b   :  { %587 = vmatprep.mubr.f32.mxu0 %v5926_v1  ;;  %826 = vmatprep.mubr.f32.mxu1 %v5926_v1 }
  0x8c   :  { %4250 = vmatpush1.bf16.msra.mxu1 %v4249_v43  ;;  %v4265_v43 = vpack.c.bf16 %v231_v36, %v229_v35 }
  0x8d   :  { %4252 = vmatprep.subr.bf16.mxu1 %v4251_v44 }
  0x8e   :  { %588 = vmatmul.mubr.f32.gmra.mrb[34].mxu0 %v5054_v42  ;;  %827 = vmatmul.mubr.f32.gmra.mrb[28].mxu1 %v5027_v15 }
  0x8f   :  { %593 = vmatprep.mubr.f32.mxu0 %v5926_v1  ;;  %832 = vmatprep.mubr.f32.mxu1 %v5926_v1 }
  0x90   :  { %4254 = vmatpush1.bf16.msra.mxu1 %v4253_v52 }
  0x91   :  { %4256 = vmatprep.subr.bf16.mxu1 %v4255_v53  ;;  %v238_v53 = vld [vmem:[#allocation4 + $0x398] sm:$0xff] }
  0x92   :  { %594 = vmatmul.mubr.f32.gmra.mrb[36].mxu0 %v5063_v51  ;;  %833 = vmatmul.mubr.f32.gmra.mrb[30].mxu1 %v5036_v24 }
  0x93   :  { %599 = vmatprep.mubr.f32.mxu0 %v5926_v1  ;;  %838 = vmatprep.mubr.f32.mxu1 %v5926_v1 }
  0x94   :  { %4258 = vmatpush1.bf16.msra.mxu1 %v4257_v59 }
  0x95   :  { %4260 = vmatprep.subr.bf16.mxu1 %v4259_v5 }
  0x96   :  { %600 = vmatmul.mubr.f32.gmra.mrb[38].mxu0 %v5072_v58  ;;  %839 = vmatmul.mubr.f32.gmra.mrb[32].mxu1 %v5045_v33 }
  0x97   :  { %605 = vmatprep.mubr.f32.mxu0 %v5926_v1  ;;  %844 = vmatprep.mubr.f32.mxu1 %v5926_v1 }
  0x9a   :  { %606 = vmatmul.mubr.f32.gmra.mrb[40].mxu0 %v5081_v60  ;;  %845 = vmatmul.mubr.f32.gmra.mrb[34].mxu1 %v5054_v42 }
  0x9b   :  { %611 = vmatprep.mubr.f32.mxu0 %v5926_v1  ;;  %850 = vmatprep.mubr.f32.mxu1 %v5926_v1 }
  0x9e   :  { %612 = vmatmul.mubr.f32.gmra.mrb[42].mxu0 %v5090_v61  ;;  %851 = vmatmul.mubr.f32.gmra.mrb[36].mxu1 %v5063_v51 }
  0x9f   :  { %617 = vmatprep.mubr.f32.mxu0 %v5926_v1  ;;  %856 = vmatprep.mubr.f32.mxu1 %v5926_v1 }
  0xa2   :  { %618 = vmatmul.mubr.f32.gmra.mrb[44].mxu0 %v5099_v63  ;;  %857 = vmatmul.mubr.f32.gmra.mrb[38].mxu1 %v5072_v58 }
  0xa3   :  { %623 = vmatprep.mubr.f32.mxu0 %v5926_v1  ;;  %862 = vmatprep.mubr.f32.mxu1 %v5926_v1 }
  0xa6   :  { %624 = vmatmul.mubr.f32.gmra.mrb[46].mxu0 %v5108_v2  ;;  %863 = vmatmul.mubr.f32.gmra.mrb[40].mxu1 %v5081_v60 }
  0xa7   :  { %629 = vmatprep.mubr.f32.mxu0 %v5926_v1  ;;  %868 = vmatprep.mubr.f32.mxu1 %v5926_v1 }
  0xaa   :  { %630 = vmatmul.mubr.f32.gmra.mrb[48].mxu0 %v5117_v6  ;;  %869 = vmatmul.mubr.f32.gmra.mrb[42].mxu1 %v5090_v61 }
  0xab   :  { %635 = vmatprep.mubr.f32.mxu0 %v5926_v1  ;;  %874 = vmatprep.mubr.f32.mxu1 %v5926_v1 }
  0xae   :  { %636 = vmatmul.mubr.f32.gmra.mrb[50].mxu0 %v5126_v8  ;;  %875 = vmatmul.mubr.f32.gmra.mrb[44].mxu1 %v5099_v63 }
  0xaf   :  { %641 = vmatprep.mubr.f32.mxu0 %v5926_v1  ;;  %880 = vmatprep.mubr.f32.mxu1 %v5926_v1 }
  0xb2   :  { %642 = vmatmul.mubr.f32.gmra.mrb[52].mxu0 %v5135_v13  ;;  %881 = vmatmul.mubr.f32.gmra.mrb[46].mxu1 %v5108_v2 }
  0xb3   :  { %647 = vmatprep.mubr.f32.mxu0 %v5926_v1  ;;  %886 = vmatprep.mubr.f32.mxu1 %v5926_v1 }
  0xb6   :  { %648 = vmatmul.mubr.f32.gmra.mrb[54].mxu0 %v5144_v14  ;;  %887 = vmatmul.mubr.f32.gmra.mrb[48].mxu1 %v5117_v6 }
  0xb7   :  { %653 = vmatprep.mubr.f32.mxu0 %v5926_v1  ;;  %892 = vmatprep.mubr.f32.mxu1 %v5926_v1 }
  0xba   :  { %654 = vmatmul.mubr.f32.gmra.mrb[56].mxu0 %v72_v16  ;;  %893 = vmatmul.mubr.f32.gmra.mrb[50].mxu1 %v5126_v8 }
  0xbb   :  { %659 = vmatprep.mubr.f32.mxu0 %v5926_v1  ;;  %898 = vmatprep.mubr.f32.mxu1 %v5926_v1 }
  0xbe   :  { %660 = vmatmul.mubr.f32.gmra.mrb[58].mxu0 %v73_v17  ;;  %899 = vmatmul.mubr.f32.gmra.mrb[52].mxu1 %v5135_v13 }
  0xbf   :  { %665 = vmatprep.mubr.f32.mxu0 %v5926_v1  ;;  %904 = vmatprep.mubr.f32.mxu1 %v5926_v1 }
  0xc2   :  { %666 = vmatmul.mubr.f32.gmra.mrb[60].mxu0 %v74_v23  ;;  %905 = vmatmul.mubr.f32.gmra.mrb[54].mxu1 %v5144_v14 }
  0xc3   :  { %671 = vmatprep.mubr.f32.mxu0 %v5926_v1  ;;  %910 = vmatprep.mubr.f32.mxu1 %v5926_v1 }
  0xc6   :  { %672 = vmatmul.mubr.f32.gmra.mrb[62].mxu0 %v75_v26  ;;  %911 = vmatmul.mubr.f32.gmra.mrb[56].mxu1 %v72_v16 }
  0xc7   :  { %3811 = vmatprep.mubr.f32.mxu0 %v4910_v18  ;;  %916 = vmatprep.mubr.f32.mxu1 %v5926_v1  ;;  %v401_v18 = vlaneseq }
  0xca   :  { %3812 = vmatmul.mubr.f32.vlgmr.msra.gmra.mrb[64].mxu0 %v4917_v25  ;;  %917 = vmatmul.mubr.f32.gmra.mrb[58].mxu1 %v73_v17  ;;  %v5205_v25 = vshrl.u32 %v401_v18, 7  ;;  %v246_v18 = vld [vmem:[#allocation4 + $0x3f8] sm:$0xff] }
  0xcb   :  { %3814 = vmatprep.mubr.f32.mxu0 %v4924_v34  ;;  %922 = vmatprep.mubr.f32.mxu1 %v5926_v1 }
  0xcc   :  { %5931 = vst [vmem:[#allocation8_spill] sm:$0xff] %v5205_v25  ;;  %v5208_v34 = vsub.s32 0, %v5205_v25 }
  0xce   :  { %3815 = vmatmul.mubr.f32.gmra.mrb[66].mxu0 %v4931_v45  ;;  %923 = vmatmul.mubr.f32.gmra.mrb[60].mxu1 %v74_v23  ;;  %5932 = vst [vmem:[#allocation9_spill] sm:$0xff] %v5208_v34  ;;  %v156_v45 = vld [vmem:[#allocation2 + $0x280] sm:$0xff] }
  0xcf   :  { %3817 = vmatprep.mubr.f32.mxu0 %v4938_v55  ;;  %928 = vmatprep.mubr.f32.mxu1 %v5926_v1  ;;  %v157_v55 = vld [vmem:[#allocation2 + $0x288] sm:$0xff] }
  0xd2   :  { %3818 = vmatmul.mubr.f32.gmra.mrb[68].mxu0 %v4946_v0  ;;  %929 = vmatmul.mubr.f32.gmra.mrb[62].mxu1 %v75_v26  ;;  %v5211_v0 = vrot.slane %v156_v45, %v5208_v34  ;;  %v248_v45 = vld [vmem:[#allocation4 + $0x410] sm:$0xff] }
  0xd3   :  { %3820 = vmatprep.mubr.f32.mxu0 %v4955_v11  ;;  %v5214_v11 = vrot.slane %v157_v55, %v5208_v34 }
  0xd6   :  { %3821 = vmatmul.mubr.f32.gmra.mrb[70].mxu0 %v4964_v22 }
  0xd7   :  { %3823 = vmatprep.mubr.f32.mxu0 %v4973_v31 }
  0xda   :  { %3824 = vmatmul.mubr.f32.gmra.mrb[72].mxu0 %v4982_v39 }
  0xdb   :  { %3826 = vmatprep.mubr.f32.mxu0 %v4991_v47  ;;  %v225_v47 = vld [vmem:[#allocation4 + $0x300] sm:$0xff] }
  0xde   :  { %3827 = vmatmul.mubr.f32.gmra.mrb[74].mxu0 %v5000_v54  ;;  %v227_v54 = vld [vmem:[#allocation4 + $0x318] sm:$0xff] }
  0xdf   :  { %3829 = vmatprep.mubr.f32.mxu0 %v5009_v62  ;;  %v4261_v28 = vpack.c.bf16 %v227_v54, %v225_v47 }
  0xe2   :  { %3830 = vmatmul.mubr.f32.gmra.mrb[76].mxu0 %v5018_v7  ;;  %v230_v7 = vld [vmem:[#allocation4 + $0x338] sm:$0xff] }
  0xe3   :  { %3832 = vmatprep.mubr.f32.mxu0 %v5027_v15  ;;  %v232_v15 = vld [vmem:[#allocation4 + $0x350] sm:$0xff] }
  0xe6   :  { %3833 = vmatmul.mubr.f32.gmra.mrb[78].mxu0 %v5036_v24 }
  0xe7   :  { %3835 = vmatprep.mubr.f32.mxu0 %v5045_v33  ;;  %v4263_v33 = vpack.c.bf16 %v232_v15, %v230_v7  ;;  %v4279_v7 = vpack.c.bf16 %v248_v45, %v246_v18  ;;  %v245_v15 = vld [vmem:[#allocation4 + $0x3f0] sm:$0xff] }
  0xe8   :  { %v264_v18 = vld [vmem:[#allocation4 + $0x4d0] sm:$0xff] }
  0xea   :  { %3836 = vmatmul.mubr.f32.gmra.mrb[80].mxu0 %v5054_v42 }
  0xeb   :  { %3838 = vmatprep.mubr.f32.mxu0 %v5063_v51  ;;  %v235_v51 = vld [vmem:[#allocation4 + $0x378] sm:$0xff] }
  0xec   :  { %v4269_v59 = vpack.c.bf16 %v235_v51, %v233_v50 }
  0xee   :  { %3839 = vmatmul.mubr.f32.gmra.mrb[82].mxu0 %v5072_v58 }
  0xef   :  { %3841 = vmatprep.mubr.f32.mxu0 %v5081_v60 }
  0xf2   :  { %3842 = vmatmul.mubr.f32.gmra.mrb[84].mxu0 %v5090_v61 }
  0xf3   :  { %3844 = vmatprep.mubr.f32.mxu0 %v5099_v63 }
  0xf6   :  { %3845 = vmatmul.mubr.f32.gmra.mrb[86].mxu0 %v5108_v2  ;;  %v4271_v2 = vpack.c.bf16 %v240_v56, %v238_v53 }
  0xf7   :  { %3847 = vmatprep.mubr.f32.mxu0 %v5117_v6  ;;  %v242_v6 = vld [vmem:[#allocation4 + $0x3c8] sm:$0xff] }
  0xfa   :  { %3848 = vmatmul.mubr.f32.gmra.mrb[88].mxu0 %v5126_v8  ;;  %v244_v8 = vld [vmem:[#allocation4 + $0x3e0] sm:$0xff] }
  0xfb   :  { %3850 = vmatprep.mubr.f32.mxu0 %v5135_v13  ;;  %v4275_v19 = vpack.c.bf16 %v244_v8, %v242_v6 }
  0xfe   :  { %3851 = vmatmul.mubr.f32.gmra.mrb[90].mxu0 %v5144_v14 }
  0xff   :  { %3853 = vmatprep.mubr.f32.mxu0 %v72_v16 }
 0x102   :  { %3854 = vmatmul.mubr.f32.gmra.mrb[92].mxu0 %v73_v17 }
 0x103   :  { %3856 = vmatprep.mubr.f32.mxu0 %v74_v23 }
 0x106   :  { %3857 = vmatmul.mubr.f32.gmra.mrb[94].mxu0 %v75_v26 }
 0x11d   :  { %v487_v22 = vpop.f32.mrb[0].mxu0 }
 0x11e   :  { %v488_v31 = vadd.f32 %v487_v22, %v5211_v0  ;;  %v489_v39 = vpop.f32.mrb[1].mxu0 }
 0x11f   :  { %v490_v62 = vadd.f32 %v489_v39, %v5214_v11 }
 0x120   :  { %v1160_v29 = vmax.f32 %v488_v31, 0.0  ;;  %v4277_v31 = vpack.c.bf16 %v243_v21, %v241_v20 }
 0x121   :  { %v1161_v24 = vmax.f32 %v490_v62, 0.0  ;;  %v493_v27 = vpop.f32.mrb[2].mxu0 }
 0x122   :  { %v494_v30 = vadd.f32 %v493_v27, %v5211_v0  ;;  %v495_v32 = vpop.f32.mrb[3].mxu0 }
 0x123   :  { %v496_v37 = vadd.f32 %v495_v32, %v5214_v11  ;;  %1392 = vmatprep.mubr.f32.mxu1 %v1161_v24  ;;  %v247_v24 = vld [vmem:[#allocation4 + $0x408] sm:$0xff] }
 0x124   :  { %1393 = vmatmul.mubr.f32.vlgmr.msra.gmra.mrb[64].mxu1 %v1160_v29  ;;  %v1165_v44 = vmax.f32 %v494_v30, 0.0  ;;  %v250_v29 = vld [vmem:[#allocation4 + $0x428] sm:$0xff]  ;;  %v252_v30 = vld [vmem:[#allocation4 + $0x440] sm:$0xff]  ;;  %v4281_v35 = vpack.c.bf16 %v247_v24, %v245_v15  ;;  %v261_v15 = vld [vmem:[#allocation4 + $0x4b0] sm:$0xff] }
 0x125   :  { %v1166_v41 = vmax.f32 %v496_v37, 0.0  ;;  %4262 = vmatpush1.bf16.msra.mxu1 %v4261_v28  ;;  %v499_v42 = vpop.f32.mrb[4].mxu0  ;;  %v263_v24 = vld [vmem:[#allocation4 + $0x4c8] sm:$0xff] }
 0x126   :  { %v500_v46 = vadd.f32 %v499_v42, %v5211_v0  ;;  %v501_v48 = vpop.f32.mrb[5].mxu0  ;;  %4264 = vmatprep.subr.bf16.mxu1 %v4263_v33  ;;  %v249_v42 = vld [vmem:[#allocation4 + $0x420] sm:$0xff] }
 0x127   :  { %v502_v52 = vadd.f32 %v501_v48, %v5214_v11  ;;  %1398 = vmatprep.mubr.f32.mxu1 %v1166_v41  ;;  %v4283_v41 = vpack.c.bf16 %v252_v30, %v250_v29  ;;  %v254_v48 = vld [vmem:[#allocation4 + $0x458] sm:$0xff]  ;;  %v266_v30 = vld [vmem:[#allocation4 + $0x4e8] sm:$0xff] }
 0x128   :  { %1399 = vmatmul.mubr.f32.gmra.mrb[66].mxu1 %v1165_v44  ;;  %v1170_v60 = vmax.f32 %v500_v46, 0.0 }
 0x129   :  { %v1171_v57 = vmax.f32 %v502_v52, 0.0  ;;  %v505_v58 = vpop.f32.mrb[6].mxu0  ;;  %4266 = vmatpush1.bf16.msra.mxu1 %v4265_v43  ;;  %v5224_v13 = vpop.f32.mrb[0].mxu1  ;;  %v251_v43 = vld [vmem:[#allocation4 + $0x438] sm:$0xff] }
 0x12a   :  { %v506_v61 = vadd.f32 %v505_v58, %v5211_v0  ;;  %v507_v63 = vpop.f32.mrb[7].mxu0  ;;  %4268 = vmatprep.subr.bf16.mxu1 %v4267_v49  ;;  %v5227_v23 = vpop.f32.mrb[1].mxu1  ;;  %v256_v49 = vld [vmem:[#allocation4 + $0x470] sm:$0xff]  ;;  %v4285_v52 = vpack.c.bf16 %v251_v43, %v249_v42 }
 0x12b   :  { %v508_v5 = vadd.f32 %v507_v63, %v5214_v11  ;;  %1404 = vmatprep.mubr.f32.mxu1 %v1171_v57 }
 0x12c   :  { %1405 = vmatmul.mubr.f32.gmra.mrb[68].mxu1 %v1170_v60  ;;  %v1175_v14 = vmax.f32 %v506_v61, 0.0  ;;  %v253_v60 = vld [vmem:[#allocation4 + $0x450] sm:$0xff]  ;;  %v255_v61 = vld [vmem:[#allocation4 + $0x468] sm:$0xff] }
 0x12d   :  { %v1176_v9 = vmax.f32 %v508_v5, 0.0  ;;  %v511_v10 = vpop.f32.mrb[8].mxu0  ;;  %4270 = vmatpush1.bf16.msra.mxu1 %v4269_v59  ;;  %v5230_v39 = vpop.f32.mrb[2].mxu1  ;;  %v4287_v59 = vpack.c.bf16 %v256_v49, %v254_v48  ;;  %v4289_v8 = vpack.c.bf16 %v255_v61, %v253_v60  ;;  %v267_v48 = vld [vmem:[#allocation4 + $0x4f8] sm:$0xff] }
 0x12e   :  { %v512_v16 = vadd.f32 %v511_v10, %v5211_v0  ;;  %v513_v17 = vpop.f32.mrb[9].mxu0  ;;  %4272 = vmatprep.subr.bf16.mxu1 %v4271_v2  ;;  %v5233_v27 = vpop.f32.mrb[3].mxu1 }
 0x12f   :  { %v514_v26 = vadd.f32 %v513_v17, %v5214_v11  ;;  %1410 = vmatprep.mubr.f32.mxu1 %v1176_v9  ;;  %v257_v17 = vld [vmem:[#allocation4 + $0x480] sm:$0xff] }
 0x130   :  { %1411 = vmatmul.mubr.f32.gmra.mrb[70].mxu1 %v1175_v14  ;;  %v1180_v47 = vmax.f32 %v512_v16, 0.0  ;;  %v4291_v16 = vpack.c.bf16 %v260_v4, %v258_v3  ;;  %v269_v4 = vld [vmem:[#allocation4 + $0x510] sm:$0xff] }
 0x131   :  { %v1181_v55 = vmax.f32 %v514_v26, 0.0  ;;  %v517_v22 = vpop.f32.mrb[10].mxu0  ;;  %4274 = vmatpush1.bf16.msra.mxu1 %v4273_v12  ;;  %v5236_v36 = vpop.f32.mrb[4].mxu1  ;;  %v262_v26 = vld [vmem:[#allocation4 + $0x4b8] sm:$0xff] }
 0x132   :  { %v518_v54 = vadd.f32 %v517_v22, %v5211_v0  ;;  %v519_v62 = vpop.f32.mrb[11].mxu0  ;;  %4276 = vmatprep.subr.bf16.mxu1 %v4275_v19  ;;  %v5239_v44 = vpop.f32.mrb[5].mxu1  ;;  %v259_v19 = vld [vmem:[#allocation4 + $0x498] sm:$0xff] }
 0x133   :  { %v520_v28 = vadd.f32 %v519_v62, %v5214_v11  ;;  %1416 = vmatprep.mubr.f32.mxu1 %v1181_v55  ;;  %v4293_v22 = vpack.c.bf16 %v259_v19, %v257_v17 }
 0x134   :  { %1417 = vmatmul.mubr.f32.gmra.mrb[72].mxu1 %v1180_v47  ;;  %v1185_v37 = vmax.f32 %v518_v54, 0.0 }
 0x135   :  { %v1186_v32 = vmax.f32 %v520_v28, 0.0  ;;  %v523_v33 = vpop.f32.mrb[12].mxu0  ;;  %4278 = vmatpush1.bf16.msra.mxu1 %v4277_v31  ;;  %v5242_v53 = vpop.f32.mrb[6].mxu1 }
 0x136   :  { %v524_v38 = vadd.f32 %v523_v33, %v5211_v0  ;;  %v525_v40 = vpop.f32.mrb[13].mxu0  ;;  %4280 = vmatprep.subr.bf16.mxu1 %v4279_v7  ;;  %v5245_v63 = vpop.f32.mrb[7].mxu1  ;;  %v4295_v7 = vpack.c.bf16 %v264_v18, %v262_v26 }
 0x137   :  { %v526_v46 = vadd.f32 %v525_v40, %v5214_v11  ;;  %1422 = vmatprep.mubr.f32.mxu1 %v1186_v32  ;;  %v268_v32 = vld [vmem:[#allocation4 + $0x500] sm:$0xff] }
 0x138   :  { %1423 = vmatmul.mubr.f32.gmra.mrb[74].mxu1 %v1185_v37  ;;  %v1190_v56 = vmax.f32 %v524_v38, 0.0  ;;  %v4297_v37 = vpack.c.bf16 %v263_v24, %v261_v15  ;;  %v4299_v43 = vpack.c.bf16 %v268_v32, %v266_v30 }
 0x139   :  { %v1191_v50 = vmax.f32 %v526_v46, 0.0  ;;  %v529_v51 = vpop.f32.mrb[14].mxu0  ;;  %4282 = vmatpush1.bf16.msra.mxu1 %v4281_v35  ;;  %v5248_v9 = vpop.f32.mrb[8].mxu1  ;;  %v265_v46 = vld [vmem:[#allocation4 + $0x4e0] sm:$0xff] }
 0x13a   :  { %v530_v57 = vadd.f32 %v529_v51, %v5211_v0  ;;  %v531_v58 = vpop.f32.mrb[15].mxu0  ;;  %4284 = vmatprep.subr.bf16.mxu1 %v4283_v41  ;;  %v5251_v20 = vpop.f32.mrb[9].mxu1  ;;  %v270_v51 = vld [vmem:[#allocation4 + $0x518] sm:$0xff] }
 0x13b   :  { %v532_v2 = vadd.f32 %v531_v58, %v5214_v11  ;;  %1428 = vmatprep.mubr.f32.mxu1 %v1191_v50  ;;  %v4301_v58 = vpack.c.bf16 %v267_v48, %v265_v46  ;;  %v282_v46 = vld [vmem:[#allocation4 + $0x5a8] sm:$0xff]  ;;  %v284_v48 = vld [vmem:[#allocation4 + $0x5c0] sm:$0xff] }
 0x13c   :  { %1429 = vmatmul.mubr.f32.gmra.mrb[76].mxu1 %v1190_v56  ;;  %v1195_v10 = vmax.f32 %v530_v57, 0.0 }
 0x13d   :  { %v1196_v5 = vmax.f32 %v532_v2, 0.0  ;;  %v535_v6 = vpop.f32.mrb[16].mxu0  ;;  %4286 = vmatpush1.bf16.msra.mxu1 %v4285_v52  ;;  %v5254_v31 = vpop.f32.mrb[10].mxu1  ;;  %v272_v52 = vld [vmem:[#allocation4 + $0x530] sm:$0xff] }
 0x13e   :  { %v536_v12 = vadd.f32 %v535_v6, %v5211_v0  ;;  %v537_v14 = vpop.f32.mrb[17].mxu0  ;;  %4288 = vmatprep.subr.bf16.mxu1 %v4287_v59  ;;  %v5257_v28 = vpop.f32.mrb[11].mxu1  ;;  %v4303_v3 = vpack.c.bf16 %v272_v52, %v270_v51 }
 0x13f   :  { %v538_v21 = vadd.f32 %v537_v14, %v5214_v11  ;;  %1434 = vmatprep.mubr.f32.mxu1 %v1196_v5  ;;  %v271_v5 = vld [vmem:[#allocation4 + $0x528] sm:$0xff] }
 0x140   :  { %1435 = vmatmul.mubr.f32.gmra.mrb[78].mxu1 %v1195_v10  ;;  %v1200_v47 = vmax.f32 %v536_v12, 0.0  ;;  %v274_v10 = vld [vmem:[#allocation4 + $0x548] sm:$0xff]  ;;  %v276_v12 = vld [vmem:[#allocation4 + $0x560] sm:$0xff]  ;;  %v4305_v17 = vpack.c.bf16 %v271_v5, %v269_v4 }
 0x141   :  { %v1201_v45 = vmax.f32 %v538_v21, 0.0  ;;  %v541_v55 = vpop.f32.mrb[18].mxu0  ;;  %4290 = vmatpush1.bf16.msra.mxu1 %v4289_v8  ;;  %v5260_v38 = vpop.f32.mrb[12].mxu1 }
 0x142   :  { %v542_v54 = vadd.f32 %v541_v55, %v5211_v0  ;;  %v543_v62 = vpop.f32.mrb[19].mxu0  ;;  %4292 = vmatprep.subr.bf16.mxu1 %v4291_v16  ;;  %v5263_v49 = vpop.f32.mrb[13].mxu1  ;;  %v273_v55 = vld [vmem:[#allocation4 + $0x540] sm:$0xff] }
 0x143   :  { %v544_v29 = vadd.f32 %v543_v62, %v5214_v11  ;;  %1440 = vmatprep.mubr.f32.mxu1 %v1201_v45  ;;  %v4307_v45 = vpack.c.bf16 %v276_v12, %v274_v10  ;;  %v278_v62 = vld [vmem:[#allocation4 + $0x578] sm:$0xff]  ;;  %v288_v10 = vld [vmem:[#allocation4 + $0x5f0] sm:$0xff] }
 0x144   :  { %1441 = vmatmul.mubr.f32.gmra.mrb[80].mxu1 %v1200_v47  ;;  %v1205_v40 = vmax.f32 %v542_v54, 0.0 }
 0x145   :  { %v1206_v33 = vmax.f32 %v544_v29, 0.0  ;;  %v547_v35 = vpop.f32.mrb[20].mxu0  ;;  %4294 = vmatpush1.bf16.msra.mxu1 %v4293_v22  ;;  %v5266_v59 = vpop.f32.mrb[14].mxu1  ;;  %v275_v22 = vld [vmem:[#allocation4 + $0x558] sm:$0xff] }
 0x146   :  { %v548_v41 = vadd.f32 %v547_v35, %v5211_v0  ;;  %v549_v42 = vpop.f32.mrb[21].mxu0  ;;  %4296 = vmatprep.subr.bf16.mxu1 %v4295_v7  ;;  %v5269_v6 = vpop.f32.mrb[15].mxu1  ;;  %v280_v7 = vld [vmem:[#allocation4 + $0x590] sm:$0xff]  ;;  %v4309_v29 = vpack.c.bf16 %v275_v22, %v273_v55  ;;  %v287_v22 = vld [vmem:[#allocation4 + $0x5e8] sm:$0xff] }
 0x147   :  { %v550_v50 = vadd.f32 %v549_v42, %v5214_v11  ;;  %1446 = vmatprep.mubr.f32.mxu1 %v1206_v33  ;;  %v285_v55 = vld [vmem:[#allocation4 + $0x5d0] sm:$0xff] }
 0x148   :  { %1447 = vmatmul.mubr.f32.gmra.mrb[82].mxu1 %v1205_v40  ;;  %v1210_v60 = vmax.f32 %v548_v41, 0.0  ;;  %v277_v40 = vld [vmem:[#allocation4 + $0x570] sm:$0xff]  ;;  %v279_v41 = vld [vmem:[#allocation4 + $0x588] sm:$0xff] }
 0x149   :  { %v1211_v56 = vmax.f32 %v550_v50, 0.0  ;;  %v553_v57 = vpop.f32.mrb[22].mxu0  ;;  %4298 = vmatpush1.bf16.msra.mxu1 %v4297_v37  ;;  %v5272_v19 = vpop.f32.mrb[16].mxu1  ;;  %v4311_v37 = vpack.c.bf16 %v280_v7, %v278_v62  ;;  %v4313_v52 = vpack.c.bf16 %v279_v41, %v277_v40  ;;  %v290_v7 = vld [vmem:[#allocation4 + $0x608] sm:$0xff] }
 0x14a   :  { %v554_v61 = vadd.f32 %v553_v57, %v5211_v0  ;;  %v555_v2 = vpop.f32.mrb[23].mxu0  ;;  %4300 = vmatprep.subr.bf16.mxu1 %v4299_v43  ;;  %v5275_v47 = vpop.f32.mrb[17].mxu1 }
 0x14b   :  { %v556_v8 = vadd.f32 %v555_v2, %v5214_v11  ;;  %1452 = vmatprep.mubr.f32.mxu1 %v1211_v56  ;;  %v281_v2 = vld [vmem:[#allocation4 + $0x5a0] sm:$0xff] }
 0x14c   :  { %1453 = vmatmul.mubr.f32.gmra.mrb[84].mxu1 %v1210_v60  ;;  %v1215_v21 = vmax.f32 %v554_v61, 0.0  ;;  %v4315_v61 = vpack.c.bf16 %v284_v48, %v282_v46 }
 0x14d   :  { %v1216_v14 = vmax.f32 %v556_v8, 0.0  ;;  %v559_v16 = vpop.f32.mrb[24].mxu0  ;;  %4302 = vmatpush1.bf16.msra.mxu1 %v4301_v58  ;;  %v5278_v30 = vpop.f32.mrb[18].mxu1  ;;  %v286_v8 = vld [vmem:[#allocation4 + $0x5d8] sm:$0xff] }
 0x14e   :  { %v560_v26 = vadd.f32 %v559_v16, %v5211_v0  ;;  %v561_v18 = vpop.f32.mrb[25].mxu0  ;;  %4304 = vmatprep.subr.bf16.mxu1 %v4303_v3  ;;  %v5281_v42 = vpop.f32.mrb[19].mxu1  ;;  %v283_v3 = vld [vmem:[#allocation4 + $0x5b8] sm:$0xff] }
 0x14f   :  { %v562_v54 = vadd.f32 %v561_v18, %v5214_v11  ;;  %1458 = vmatprep.mubr.f32.mxu1 %v1216_v14  ;;  %v4317_v16 = vpack.c.bf16 %v283_v3, %v281_v2 }
 0x150   :  { %1459 = vmatmul.mubr.f32.gmra.mrb[86].mxu1 %v1215_v21  ;;  %v1220_v32 = vmax.f32 %v560_v26, 0.0 }
 0x151   :  { %v1221_v15 = vmax.f32 %v562_v54, 0.0  ;;  %v565_v24 = vpop.f32.mrb[26].mxu0  ;;  %4306 = vmatpush1.bf16.msra.mxu1 %v4305_v17  ;;  %v5284_v56 = vpop.f32.mrb[20].mxu1 }
 0x152   :  { %v566_v33 = vadd.f32 %v565_v24, %v5211_v0  ;;  %v567_v35 = vpop.f32.mrb[27].mxu0  ;;  %4308 = vmatprep.subr.bf16.mxu1 %v4307_v45  ;;  %v5287_v4 = vpop.f32.mrb[21].mxu1  ;;  %v4319_v45 = vpack.c.bf16 %v288_v10, %v286_v8 }
 0x153   :  { %v568_v43 = vadd.f32 %v567_v35, %v5214_v11  ;;  %1464 = vmatprep.mubr.f32.mxu1 %v1221_v15  ;;  %v292_v15 = vld [vmem:[#allocation4 + $0x620] sm:$0xff] }
 0x154   :  { %1465 = vmatmul.mubr.f32.gmra.mrb[88].mxu1 %v1220_v32  ;;  %v1225_v57 = vmax.f32 %v566_v33, 0.0  ;;  %v4321_v32 = vpack.c.bf16 %v287_v22, %v285_v55  ;;  %v4323_v41 = vpack.c.bf16 %v292_v15, %v290_v7 }
 0x155   :  { %v1226_v50 = vmax.f32 %v568_v43, 0.0  ;;  %v571_v51 = vpop.f32.mrb[28].mxu0  ;;  %4310 = vmatpush1.bf16.msra.mxu1 %v4309_v29  ;;  %v5290_v17 = vpop.f32.mrb[22].mxu1 }
 0x156   :  { %v572_v58 = vadd.f32 %v571_v51, %v5211_v0  ;;  %v573_v60 = vpop.f32.mrb[29].mxu0  ;;  %4312 = vmatprep.subr.bf16.mxu1 %v4311_v37  ;;  %v5293_v54 = vpop.f32.mrb[23].mxu1 }
 0x157   :  { %v574_v5 = vadd.f32 %v573_v60, %v5214_v11  ;;  %1470 = vmatprep.mubr.f32.mxu1 %v1226_v50 }
 0x158   :  { %1471 = vmatmul.mubr.f32.gmra.mrb[90].mxu1 %v1225_v57  ;;  %v1230_v21 = vmax.f32 %v572_v58, 0.0 }
 0x159   :  { %v1231_v12 = vmax.f32 %v574_v5, 0.0  ;;  %v577_v14 = vpop.f32.mrb[30].mxu0  ;;  %4314 = vmatpush1.bf16.msra.mxu1 %v4313_v52  ;;  %v5296_v33 = vpop.f32.mrb[24].mxu1 }
 0x15a   :  { %v578_v26 = vadd.f32 %v577_v14, %v5211_v0  ;;  %v579_v18 = vpop.f32.mrb[31].mxu0  ;;  %4316 = vmatprep.subr.bf16.mxu1 %v4315_v61  ;;  %v5299_v43 = vpop.f32.mrb[25].mxu1 }
 0x15b   :  { %v580_v62 = vadd.f32 %v579_v18, %v5214_v11  ;;  %1476 = vmatprep.mubr.f32.mxu1 %v1231_v12 }
 0x15c   :  { %1477 = vmatmul.mubr.f32.gmra.mrb[92].mxu1 %v1230_v21  ;;  %v1235_v35 = vmax.f32 %v578_v26, 0.0 }
 0x15d   :  { %v1236_v24 = vmax.f32 %v580_v62, 0.0  ;;  %v583_v29 = vpop.f32.mrb[32].mxu0  ;;  %4318 = vmatpush1.bf16.msra.mxu1 %v4317_v16  ;;  %v5302_v51 = vpop.f32.mrb[26].mxu1 }
 0x15e   :  { %v584_v37 = vadd.f32 %v583_v29, %v5211_v0  ;;  %v585_v40 = vpop.f32.mrb[33].mxu0  ;;  %4320 = vmatprep.subr.bf16.mxu1 %v4319_v45  ;;  %v5305_v60 = vpop.f32.mrb[27].mxu1 }
 0x15f   :  { %v586_v46 = vadd.f32 %v585_v40, %v5214_v11  ;;  %1482 = vmatprep.mubr.f32.mxu1 %v1236_v24 }
 0x160   :  { %1483 = vmatmul.mubr.f32.gmra.mrb[94].mxu1 %v1235_v35  ;;  %v1240_v52 = vmax.f32 %v584_v37, 0.0 }
 0x161   :  { %v1241_v48 = vmax.f32 %v586_v46, 0.0  ;;  %v589_v50 = vpop.f32.mrb[34].mxu0  ;;  %4322 = vmatpush1.bf16.msra.mxu1 %v4321_v32  ;;  %v5308_v5 = vpop.f32.mrb[28].mxu1 }
 0x162   :  { %v590_v57 = vadd.f32 %v589_v50, %v5211_v0  ;;  %v591_v58 = vpop.f32.mrb[35].mxu0  ;;  %4324 = vmatprep.subr.bf16.mxu1 %v4323_v41  ;;  %v5311_v14 = vpop.f32.mrb[29].mxu1 }
 0x163   :  { %v592_v61 = vadd.f32 %v591_v58, %v5214_v11  ;;  %1488 = vmatprep.mubr.f32.mxu1 %v1241_v48 }
 0x164   :  { %1489 = vmatmul.mubr.f32.gmra.mrb[96].mxu1 %v1240_v52  ;;  %v1245_v8 = vmax.f32 %v590_v57, 0.0 }
 0x165   :  { %v1246_v2 = vmax.f32 %v592_v61, 0.0  ;;  %v595_v3 = vpop.f32.mrb[36].mxu0  ;;  %v5314_v18 = vpop.f32.mrb[30].mxu1 }
 0x166   :  { %v596_v10 = vadd.f32 %v595_v3, %v5211_v0  ;;  %v597_v12 = vpop.f32.mrb[37].mxu0  ;;  %v5317_v62 = vpop.f32.mrb[31].mxu1 }
 0x167   :  { %v598_v16 = vadd.f32 %v597_v12, %v5214_v11  ;;  %1494 = vmatprep.mubr.f32.mxu1 %v1246_v2 }
 0x168   :  { %1495 = vmatmul.mubr.f32.gmra.mrb[98].mxu1 %v1245_v8  ;;  %v1250_v45 = vmax.f32 %v596_v10, 0.0 }
 0x169   :  { %v1251_v21 = vmax.f32 %v598_v16, 0.0  ;;  %v601_v26 = vpop.f32.mrb[38].mxu0  ;;  %v5320_v29 = vpop.f32.mrb[32].mxu1 }
 0x16a   :  { %v602_v55 = vadd.f32 %v601_v26, %v5211_v0  ;;  %v603_v22 = vpop.f32.mrb[39].mxu0  ;;  %v5323_v40 = vpop.f32.mrb[33].mxu1 }
 0x16b   :  { %v604_v7 = vadd.f32 %v603_v22, %v5214_v11  ;;  %1500 = vmatprep.mubr.f32.mxu1 %v1251_v21 }
 0x16c   :  { %1501 = vmatmul.mubr.f32.gmra.mrb[100].mxu1 %v1250_v45  ;;  %v1255_v32 = vmax.f32 %v602_v55, 0.0 }
 0x16d   :  { %v1256_v15 = vmax.f32 %v604_v7, 0.0  ;;  %v607_v24 = vpop.f32.mrb[40].mxu0  ;;  %v5326_v50 = vpop.f32.mrb[34].mxu1 }
 0x16e   :  { %v608_v35 = vadd.f32 %v607_v24, %v5211_v0  ;;  %v609_v37 = vpop.f32.mrb[41].mxu0  ;;  %v5329_v61 = vpop.f32.mrb[35].mxu1 }
 0x16f   :  { %v610_v41 = vadd.f32 %v609_v37, %v5214_v11  ;;  %1506 = vmatprep.mubr.f32.mxu1 %v1256_v15 }
 0x170   :  { %1507 = vmatmul.mubr.f32.gmra.mrb[102].mxu1 %v1255_v32  ;;  %v1260_v52 = vmax.f32 %v608_v35, 0.0 }
 0x171   :  { %v1261_v46 = vmax.f32 %v610_v41, 0.0  ;;  %v613_v48 = vpop.f32.mrb[42].mxu0  ;;  %v5332_v10 = vpop.f32.mrb[36].mxu1 }
 0x172   :  { %v614_v57 = vadd.f32 %v613_v48, %v5211_v0  ;;  %v615_v58 = vpop.f32.mrb[43].mxu0  ;;  %v5335_v26 = vpop.f32.mrb[37].mxu1 }
 0x173   :  { %v616_v2 = vadd.f32 %v615_v58, %v5214_v11  ;;  %1512 = vmatprep.mubr.f32.mxu1 %v1261_v46 }
 0x174   :  { %1513 = vmatmul.mubr.f32.gmra.mrb[104].mxu1 %v1260_v52  ;;  %v1265_v12 = vmax.f32 %v614_v57, 0.0 }
 0x175   :  { %v1266_v3 = vmax.f32 %v616_v2, 0.0  ;;  %v619_v8 = vpop.f32.mrb[44].mxu0  ;;  %v5338_v7 = vpop.f32.mrb[38].mxu1 }
 0x176   :  { %v620_v16 = vadd.f32 %v619_v8, %v5211_v0  ;;  %v621_v21 = vpop.f32.mrb[45].mxu0  ;;  %v5341_v35 = vpop.f32.mrb[39].mxu1 }
 0x177   :  { %v622_v45 = vadd.f32 %v621_v21, %v5214_v11  ;;  %1518 = vmatprep.mubr.f32.mxu1 %v1266_v3 }
 0x178   :  { %1519 = vmatmul.mubr.f32.gmra.mrb[106].mxu1 %v1265_v12  ;;  %v1270_v15 = vmax.f32 %v620_v16, 0.0 }
 0x179   :  { %v1271_v55 = vmax.f32 %v622_v45, 0.0  ;;  %v625_v22 = vpop.f32.mrb[46].mxu0  ;;  %v5344_v48 = vpop.f32.mrb[40].mxu1 }
 0x17a   :  { %v626_v24 = vadd.f32 %v625_v22, %v5211_v0  ;;  %v627_v32 = vpop.f32.mrb[47].mxu0  ;;  %v5347_v2 = vpop.f32.mrb[41].mxu1 }
 0x17b   :  { %v628_v37 = vadd.f32 %v627_v32, %v5214_v11  ;;  %1524 = vmatprep.mubr.f32.mxu1 %v1271_v55 }
 0x17c   :  { %1525 = vmatmul.mubr.f32.gmra.mrb[108].mxu1 %v1270_v15  ;;  %v1275_v52 = vmax.f32 %v626_v24, 0.0 }
 0x17d   :  { %v1276_v41 = vmax.f32 %v628_v37, 0.0  ;;  %v631_v46 = vpop.f32.mrb[48].mxu0  ;;  %v5350_v16 = vpop.f32.mrb[42].mxu1 }
 0x17e   :  { %v632_v57 = vadd.f32 %v631_v46, %v5211_v0  ;;  %v633_v58 = vpop.f32.mrb[49].mxu0  ;;  %v5353_v22 = vpop.f32.mrb[43].mxu1 }
 0x17f   :  { %v634_v3 = vadd.f32 %v633_v58, %v5214_v11  ;;  %1530 = vmatprep.mubr.f32.mxu1 %v1276_v41 }
 0x180   :  { %1531 = vmatmul.mubr.f32.gmra.mrb[110].mxu1 %v1275_v52  ;;  %v1280_v21 = vmax.f32 %v632_v57, 0.0 }
 0x181   :  { %v1281_v8 = vmax.f32 %v634_v3, 0.0  ;;  %v637_v12 = vpop.f32.mrb[50].mxu0  ;;  %v5356_v37 = vpop.f32.mrb[44].mxu1 }
 0x182   :  { %v638_v45 = vadd.f32 %v637_v12, %v5211_v0  ;;  %v639_v55 = vpop.f32.mrb[51].mxu0  ;;  %5933 = vst [vmem:[#allocation10_spill] sm:$0xff] %v5356_v37  ;;  %v5359_v58 = vpop.f32.mrb[45].mxu1 }
 0x183   :  { %v640_v15 = vadd.f32 %v639_v55, %v5214_v11  ;;  %1536 = vmatprep.mubr.f32.mxu1 %v1281_v8 }
 0x184   :  { %1537 = vmatmul.mubr.f32.gmra.mrb[112].mxu1 %v1280_v21  ;;  %v1285_v41 = vmax.f32 %v638_v45, 0.0 }
 0x185   :  { %v1286_v24 = vmax.f32 %v640_v15, 0.0  ;;  %v643_v32 = vpop.f32.mrb[52].mxu0  ;;  %v5362_v1 = vpop.f32.mrb[46].mxu1 }
 0x186   :  { %v644_v46 = vadd.f32 %v643_v32, %v5211_v0  ;;  %v645_v52 = vpop.f32.mrb[53].mxu0  ;;  %5934 = vst [vmem:[#allocation11_spill] sm:$0xff] %v5362_v1  ;;  %v5365_v15 = vpop.f32.mrb[47].mxu1 }
 0x187   :  { %v646_v57 = vadd.f32 %v645_v52, %v5214_v11  ;;  %1542 = vmatprep.mubr.f32.mxu1 %v1286_v24  ;;  %5935 = vst [vmem:[#allocation12_spill] sm:$0xff] %v5365_v15 }
 0x188   :  { %1543 = vmatmul.mubr.f32.gmra.mrb[114].mxu1 %v1285_v41  ;;  %v1290_v8 = vmax.f32 %v644_v46, 0.0 }
 0x189   :  { %v1291_v3 = vmax.f32 %v646_v57, 0.0  ;;  %v649_v12 = vpop.f32.mrb[54].mxu0  ;;  %v5368_v37 = vpop.f32.mrb[48].mxu1 }
 0x18a   :  { %v650_v21 = vadd.f32 %v649_v12, %v5211_v0  ;;  %v651_v55 = vpop.f32.mrb[55].mxu0  ;;  %5936 = vst [vmem:[#allocation13_spill] sm:$0xff] %v5368_v37  ;;  %v5371_v57 = vpop.f32.mrb[49].mxu1 }
 0x18b   :  { %v652_v45 = vadd.f32 %v651_v55, %v5214_v11  ;;  %1548 = vmatprep.mubr.f32.mxu1 %v1291_v3  ;;  %5937 = vst [vmem:[#allocation14_spill] sm:$0xff] %v5371_v57 }
 0x18c   :  { %1549 = vmatmul.mubr.f32.gmra.mrb[116].mxu1 %v1290_v8  ;;  %v1295_v24 = vmax.f32 %v650_v21, 0.0 }
 0x18d   :  { %v1296_v32 = vmax.f32 %v652_v45, 0.0  ;;  %v655_v25 = vpop.f32.mrb[56].mxu0  ;;  %v5374_v15 = vpop.f32.mrb[50].mxu1 }
 0x18e   :  { %v656_v41 = vadd.f32 %v655_v25, %v5211_v0  ;;  %v657_v52 = vpop.f32.mrb[57].mxu0  ;;  %5938 = vst [vmem:[#allocation15_spill] sm:$0xff] %v5374_v15  ;;  %v5377_v45 = vpop.f32.mrb[51].mxu1  ;;  %v159_v25 = vld [vmem:[#allocation2 + $0x298] sm:$0xff] }
 0x18f   :  { %v658_v46 = vadd.f32 %v657_v52, %v5214_v11  ;;  %1554 = vmatprep.mubr.f32.mxu1 %v1296_v32  ;;  %5939 = vst [vmem:[#allocation16_spill] sm:$0xff] %v5377_v45 }
 0x190   :  { %1555 = vmatmul.mubr.f32.gmra.mrb[118].mxu1 %v1295_v24  ;;  %v1300_v3 = vmax.f32 %v656_v41, 0.0  ;;  %v158_v41 = vld [vmem:[#allocation2 + $0x290] sm:$0xff] }
 0x191   :  { %v1301_v12 = vmax.f32 %v658_v46, 0.0  ;;  %v661_v1 = vpop.f32.mrb[58].mxu0  ;;  %v5380_v52 = vpop.f32.mrb[52].mxu1 }
 0x192   :  { %v662_v8 = vadd.f32 %v661_v1, %v5211_v0  ;;  %v663_v55 = vpop.f32.mrb[59].mxu0  ;;  %5940 = vst [vmem:[#allocation17_spill] sm:$0xff] %v5380_v52  ;;  %v5383_v15 = vpop.f32.mrb[53].mxu1  ;;  %v5386_v1 = vrot.slane %v159_v25, %v5208_v34 }
 0x193   :  { %v664_v21 = vadd.f32 %v663_v55, %v5214_v11  ;;  %1560 = vmatprep.mubr.f32.mxu1 %v1301_v12  ;;  %5941 = vst [vmem:[#allocation18_spill] sm:$0xff] %v5383_v15 }
 0x194   :  { %1561 = vmatmul.mubr.f32.gmra.mrb[120].mxu1 %v1300_v3  ;;  %v1305_v32 = vmax.f32 %v662_v8, 0.0  ;;  %v747_v25 = vadd.f32 %v5227_v23, %v5386_v1 }
 0x195   :  { %v1306_v37 = vmax.f32 %v664_v21, 0.0  ;;  %v667_v57 = vpop.f32.mrb[60].mxu0  ;;  %v5389_v55 = vpop.f32.mrb[54].mxu1  ;;  %v5392_v21 = vrot.slane %v158_v41, %v5208_v34 }
 0x196   :  { %v668_v24 = vadd.f32 %v667_v57, %v5211_v0  ;;  %v669_v46 = vpop.f32.mrb[61].mxu0  ;;  %5942 = vst [vmem:[#allocation19_spill] sm:$0xff] %v5389_v55  ;;  %v5395_v15 = vpop.f32.mrb[55].mxu1  ;;  %v1163_v23 = vmax.f32 %v747_v25, 0.0 }
 0x197   :  { %v670_v45 = vadd.f32 %v669_v46, %v5214_v11  ;;  %1566 = vmatprep.mubr.f32.mxu1 %v1306_v37  ;;  %5943 = vst [vmem:[#allocation20_spill] sm:$0xff] %v5395_v15  ;;  %v300_v15 = vld [vmem:[#allocation4 + $0x680] sm:$0xff] }
 0x198   :  { %1567 = vmatmul.mubr.f32.gmra.mrb[122].mxu1 %v1305_v32  ;;  %v1310_v8 = vmax.f32 %v668_v24, 0.0  ;;  %v745_v24 = vadd.f32 %v5224_v13, %v5392_v21 }
 0x199   :  { %v1311_v12 = vmax.f32 %v670_v45, 0.0  ;;  %v673_v3 = vpop.f32.mrb[62].mxu0  ;;  %v5400_v45 = vpop.f32.mrb[56].mxu1 }
 0x19a   :  { %v674_v57 = vadd.f32 %v673_v3, %v5211_v0  ;;  %v675_v52 = vpop.f32.mrb[63].mxu0  ;;  %5944 = vst [vmem:[#allocation21_spill] sm:$0xff] %v5400_v45  ;;  %v289_v0 = vld [vmem:[#allocation4 + $0x600] sm:$0xff]  ;;  %v291_v3 = vld [vmem:[#allocation4 + $0x618] sm:$0xff]  ;;  %v5406_v34 = vpop.f32.mrb[57].mxu1  ;;  %v1162_v13 = vmax.f32 %v745_v24, 0.0 }
 0x19b   :  { %v676_v46 = vadd.f32 %v675_v52, %v5214_v11  ;;  %1572 = vmatprep.mubr.f32.mxu1 %v1311_v12  ;;  %5946 = vst [vmem:[#allocation23_spill] sm:$0xff] %v5406_v34  ;;  %v753_v11 = vadd.f32 %v5233_v27, %v5386_v1  ;;  %v294_v52 = vld [vmem:[#allocation4 + $0x638] sm:$0xff]  ;;  %v296_v12 = vld [vmem:[#allocation4 + $0x650] sm:$0xff]  ;;  %v295_v34 = vld [vmem:[#allocation4 + $0x648] sm:$0xff]  ;;  %v759_v27 = vadd.f32 %v5239_v44, %v5386_v1 }
 0x19c   :  { %1573 = vmatmul.mubr.f32.gmra.mrb[124].mxu1 %v1310_v8  ;;  %v1315_v41 = vmax.f32 %v674_v57, 0.0  ;;  %v4325_v8 = vpack.c.bf16 %v291_v3, %v289_v0  ;;  %v751_v57 = vadd.f32 %v5230_v39, %v5392_v21  ;;  %v293_v45 = vld [vmem:[#allocation4 + $0x630] sm:$0xff]  ;;  %v299_v44 = vld [vmem:[#allocation4 + $0x678] sm:$0xff] }
 0x19d   :  { %v1316_v37 = vmax.f32 %v676_v46, 0.0  ;;  %v5402_v32 = vpop.f32.mrb[64].mxu0  ;;  %v5412_v46 = vpop.f32.mrb[58].mxu1  ;;  %v1168_v25 = vmax.f32 %v753_v11, 0.0  ;;  %v4329_v24 = vpack.c.bf16 %v295_v34, %v293_v45  ;;  %v304_v34 = vld [vmem:[#allocation4 + $0x6b0] sm:$0xff] }
 0x19e   :  { %5945 = vst [vmem:[#allocation22_spill] sm:$0xff] %v5402_v32  ;;  %v5408_v55 = vpop.f32.mrb[65].mxu0  ;;  %v4327_v32 = vpack.c.bf16 %v296_v12, %v294_v52  ;;  %v1167_v3 = vmax.f32 %v751_v57, 0.0  ;;  %v297_v52 = vld [vmem:[#allocation4 + $0x660] sm:$0xff] }
 0x19f   :  { %5947 = vst [vmem:[#allocation24_spill] sm:$0xff] %v5408_v55  ;;  %1578 = vmatprep.mubr.f32.mxu1 %v1316_v37  ;;  %v5416_v55 = vpop.f32.mrb[59].mxu1  ;;  %v298_v37 = vld [vmem:[#allocation4 + $0x668] sm:$0xff]  ;;  %v4333_v45 = vpack.c.bf16 %v299_v44, %v297_v52 }
 0x1a0   :  { %1579 = vmatmul.mubr.f32.gmra.mrb[126].mxu1 %v1315_v41  ;;  %v4331_v11 = vpack.c.bf16 %v300_v15, %v298_v37  ;;  %v303_v37 = vld [vmem:[#allocation4 + $0x6a8] sm:$0xff] }
 0x1a1   :  { %1649 = vmatprep.mubr.f32.mxu1 %v1163_v23  ;;  %v5420_v41 = vpop.f32.mrb[66].mxu0  ;;  %v5422_v0 = vpop.f32.mrb[60].mxu1  ;;  %v757_v23 = vadd.f32 %v5236_v36, %v5392_v21  ;;  %v763_v36 = vadd.f32 %v5242_v53, %v5392_v21 }
 0x1a2   :  { %5948 = vst [vmem:[#allocation25_spill] sm:$0xff] %v5420_v41  ;;  %v5424_v39 = vpop.f32.mrb[67].mxu0  ;;  %v5428_v12 = vpop.f32.mrb[61].mxu1 }
 0x1a3   :  { %5949 = vst [vmem:[#allocation26_spill] sm:$0xff] %v5424_v39  ;;  %v1172_v41 = vmax.f32 %v757_v23, 0.0  ;;  %v1177_v53 = vmax.f32 %v763_v36, 0.0  ;;  %v775_v36 = vadd.f32 %v5254_v31, %v5392_v21  ;;  %v781_v31 = vadd.f32 %v5260_v38, %v5392_v21 }
 0x1a4   :  { %1650 = vmatmul.mubr.f32.vlgmr.msra.gmra.mrb[64].mxu1 %v1162_v13  ;;  %v1173_v13 = vmax.f32 %v759_v27, 0.0 }
 0x1a5   :  { %4326 = vmatpush1.bf16.msra.mxu1 %v4325_v8  ;;  %1655 = vmatprep.mubr.f32.mxu1 %v1168_v25  ;;  %v765_v8 = vadd.f32 %v5245_v63, %v5386_v1  ;;  %v302_v25 = vld [vmem:[#allocation4 + $0x698] sm:$0xff]  ;;  %v5432_v57 = vpop.f32.mrb[62].mxu1  ;;  %v771_v63 = vadd.f32 %v5251_v20, %v5386_v1  ;;  %v777_v20 = vadd.f32 %v5257_v28, %v5386_v1  ;;  %v316_v28 = vld [vmem:[#allocation4 + $0x740] sm:$0xff] }
 0x1a6   :  { %4328 = vmatprep.subr.bf16.mxu1 %v4327_v32  ;;  %5950 = vst [vmem:[#allocation27_spill] sm:$0xff] %v5432_v57  ;;  %v4335_v15 = vpack.c.bf16 %v304_v34, %v302_v25  ;;  %v301_v32 = vld [vmem:[#allocation4 + $0x690] sm:$0xff]  ;;  %v5436_v27 = vpop.f32.mrb[63].mxu1  ;;  %v307_v25 = vld [vmem:[#allocation4 + $0x6d8] sm:$0xff] }
 0x1a7   :  { %v1178_v39 = vmax.f32 %v765_v8, 0.0  ;;  %v4337_v23 = vpack.c.bf16 %v303_v37, %v301_v32  ;;  %v305_v8 = vld [vmem:[#allocation4 + $0x6c0] sm:$0xff]  ;;  %v1183_v34 = vmax.f32 %v771_v63, 0.0  ;;  %v312_v57 = vld [vmem:[#allocation4 + $0x710] sm:$0xff]  ;;  %v311_v32 = vld [vmem:[#allocation4 + $0x708] sm:$0xff]  ;;  %v1188_v37 = vmax.f32 %v777_v20, 0.0 }
 0x1a8   :  { %1656 = vmatmul.mubr.f32.gmra.mrb[66].mxu1 %v1167_v3  ;;  %v306_v3 = vld [vmem:[#allocation4 + $0x6c8] sm:$0xff]  ;;  %v783_v63 = vadd.f32 %v5263_v49, %v5386_v1  ;;  %v789_v49 = vadd.f32 %v5269_v6, %v5386_v1  ;;  %v320_v20 = vld [vmem:[#allocation4 + $0x770] sm:$0xff] }
 0x1a9   :  { %1661 = vmatprep.mubr.f32.mxu1 %v1173_v13  ;;  %4330 = vmatpush1.bf16.msra.mxu1 %v4329_v24  ;;  %v308_v13 = vld [vmem:[#allocation4 + $0x6e0] sm:$0xff]  ;;  %v5440_v24 = vpop.f32.mrb[68].mxu0 }
 0x1aa   :  { %4332 = vmatprep.subr.bf16.mxu1 %v4331_v11  ;;  %v5442_v52 = vpop.f32.mrb[69].mxu0  ;;  %v769_v11 = vadd.f32 %v5248_v9, %v5392_v21  ;;  %v4339_v44 = vpack.c.bf16 %v308_v13, %v306_v3  ;;  %v314_v3 = vld [vmem:[#allocation4 + $0x728] sm:$0xff] }
 0x1ab   :  { %v5452_v13 = vpop.f32.mrb[70].mxu0 }
 0x1ac   :  { %1662 = vmatmul.mubr.f32.gmra.mrb[68].mxu1 %v1172_v41  ;;  %v310_v41 = vld [vmem:[#allocation4 + $0x6f8] sm:$0xff] }
 0x1ad   :  { %1667 = vmatprep.mubr.f32.mxu1 %v1178_v39  ;;  %4334 = vmatpush1.bf16.msra.mxu1 %v4333_v45  ;;  %v4341_v39 = vpack.c.bf16 %v307_v25, %v305_v8  ;;  %v1182_v45 = vmax.f32 %v769_v11, 0.0  ;;  %v4343_v9 = vpack.c.bf16 %v312_v57, %v310_v41  ;;  %v1187_v11 = vmax.f32 %v775_v36, 0.0  ;;  %v315_v8 = vld [vmem:[#allocation4 + $0x738] sm:$0xff]  ;;  %v317_v36 = vld [vmem:[#allocation4 + $0x750] sm:$0xff] }
 0x1ae   :  { %4336 = vmatprep.subr.bf16.mxu1 %v4335_v15  ;;  %v309_v15 = vld [vmem:[#allocation4 + $0x6f0] sm:$0xff]  ;;  %v4347_v57 = vpack.c.bf16 %v316_v28, %v314_v3  ;;  %v1193_v25 = vmax.f32 %v783_v63, 0.0 }
 0x1b0   :  { %1668 = vmatmul.mubr.f32.gmra.mrb[70].mxu1 %v1177_v53  ;;  %v5454_v53 = vpop.f32.mrb[71].mxu0 }
 0x1b1   :  { %1673 = vmatprep.mubr.f32.mxu1 %v1183_v34  ;;  %4338 = vmatpush1.bf16.msra.mxu1 %v4337_v23  ;;  %v4345_v23 = vpack.c.bf16 %v311_v32, %v309_v15  ;;  %v318_v34 = vld [vmem:[#allocation4 + $0x758] sm:$0xff]  ;;  %v1198_v15 = vmax.f32 %v789_v49, 0.0  ;;  %v795_v32 = vadd.f32 %v5275_v47, %v5386_v1  ;;  %v5464_v6 = vpop.f32.mrb[72].mxu0  ;;  %v813_v49 = vadd.f32 %v5293_v54, %v5386_v1 }
 0x1b2   :  { %4340 = vmatprep.subr.bf16.mxu1 %v4339_v44  ;;  %v313_v44 = vld [vmem:[#allocation4 + $0x720] sm:$0xff]  ;;  %v4351_v38 = vpack.c.bf16 %v320_v20, %v318_v34  ;;  %v5466_v63 = vpop.f32.mrb[73].mxu0  ;;  %v819_v20 = vadd.f32 %v5299_v43, %v5386_v1  ;;  %v817_v54 = vadd.f32 %v5296_v33, %v5392_v21  ;;  %v823_v43 = vadd.f32 %v5302_v51, %v5392_v21 }
 0x1b3   :  { %v4349_v41 = vpack.c.bf16 %v315_v8, %v313_v44  ;;  %v1203_v28 = vmax.f32 %v795_v32, 0.0  ;;  %v5476_v44 = vpop.f32.mrb[74].mxu0  ;;  %v1218_v34 = vmax.f32 %v813_v49, 0.0 }
 0x1b4   :  { %1674 = vmatmul.mubr.f32.gmra.mrb[72].mxu1 %v1182_v45  ;;  %v787_v45 = vadd.f32 %v5266_v59, %v5392_v21  ;;  %v793_v59 = vadd.f32 %v5272_v19, %v5392_v21  ;;  %v5478_v19 = vpop.f32.mrb[75].mxu0  ;;  %v1227_v33 = vmax.f32 %v823_v43, 0.0 }
 0x1b5   :  { %1679 = vmatprep.mubr.f32.mxu1 %v1188_v37  ;;  %4342 = vmatpush1.bf16.msra.mxu1 %v4341_v39  ;;  %v1192_v39 = vmax.f32 %v781_v31, 0.0 }
 0x1b6   :  { %4344 = vmatprep.subr.bf16.mxu1 %v4343_v9  ;;  %v319_v9 = vld [vmem:[#allocation4 + $0x768] sm:$0xff]  ;;  %v1197_v3 = vmax.f32 %v787_v45, 0.0  ;;  %v1202_v47 = vmax.f32 %v793_v59, 0.0  ;;  %v1223_v45 = vmax.f32 %v819_v20, 0.0 }
 0x1b7   :  { %v4353_v37 = vpack.c.bf16 %v319_v9, %v317_v36  ;;  %v831_v9 = vadd.f32 %v5311_v14, %v5386_v1  ;;  %v835_v14 = vadd.f32 %v5314_v18, %v5392_v21 }
 0x1b8   :  { %1680 = vmatmul.mubr.f32.gmra.mrb[74].mxu1 %v1187_v11  ;;  %v799_v11 = vadd.f32 %v5278_v30, %v5392_v21 }
 0x1b9   :  { %1685 = vmatprep.mubr.f32.mxu1 %v1193_v25  ;;  %4346 = vmatpush1.bf16.msra.mxu1 %v4345_v23  ;;  %v801_v23 = vadd.f32 %v5281_v42, %v5386_v1  ;;  %v805_v42 = vadd.f32 %v5284_v56, %v5392_v21 }
 0x1ba   :  { %4348 = vmatprep.subr.bf16.mxu1 %v4347_v57  ;;  %v807_v57 = vadd.f32 %v5287_v4, %v5386_v1  ;;  %v1207_v8 = vmax.f32 %v799_v11, 0.0  ;;  %v811_v4 = vadd.f32 %v5290_v17, %v5392_v21  ;;  %v1222_v17 = vmax.f32 %v817_v54, 0.0 }
 0x1bb   :  { %v1208_v31 = vmax.f32 %v801_v23, 0.0  ;;  %v1212_v30 = vmax.f32 %v805_v42, 0.0 }
 0x1bc   :  { %1686 = vmatmul.mubr.f32.gmra.mrb[76].mxu1 %v1192_v39  ;;  %v1213_v25 = vmax.f32 %v807_v57, 0.0  ;;  %v1217_v56 = vmax.f32 %v811_v4, 0.0 }
 0x1bd   :  { %1691 = vmatprep.mubr.f32.mxu1 %v1198_v15  ;;  %4350 = vmatpush1.bf16.msra.mxu1 %v4349_v41  ;;  %v5488_v41 = vpop.f32.mrb[76].mxu0 }
 0x1be   :  { %4352 = vmatprep.subr.bf16.mxu1 %v4351_v38  ;;  %v5490_v39 = vpop.f32.mrb[77].mxu0  ;;  %v825_v38 = vadd.f32 %v5305_v60, %v5386_v1  ;;  %v829_v60 = vadd.f32 %v5308_v5, %v5392_v21  ;;  %v1237_v5 = vmax.f32 %v835_v14, 0.0  ;;  %v5954_v14 = vld [vmem:[#allocation14_spill] sm:$0xff] }
 0x1bf   :  { %v5500_v15 = vpop.f32.mrb[78].mxu0 }
 0x1c0   :  { %1692 = vmatmul.mubr.f32.gmra.mrb[78].mxu1 %v1197_v3  ;;  %v1228_v36 = vmax.f32 %v825_v38, 0.0  ;;  %v5502_v32 = vpop.f32.mrb[79].mxu0  ;;  %v837_v3 = vadd.f32 %v5317_v62, %v5386_v1  ;;  %v1232_v51 = vmax.f32 %v829_v60, 0.0  ;;  %v841_v62 = vadd.f32 %v5320_v29, %v5392_v21  ;;  %v5952_v60 = vld [vmem:[#allocation12_spill] sm:$0xff] }
 0x1c1   :  { %1697 = vmatprep.mubr.f32.mxu1 %v1203_v28  ;;  %4354 = vmatpush1.bf16.msra.mxu1 %v4353_v37  ;;  %v1233_v37 = vmax.f32 %v831_v9, 0.0  ;;  %v843_v28 = vadd.f32 %v5323_v40, %v5386_v1  ;;  %v5512_v23 = vpop.f32.mrb[80].mxu0  ;;  %v847_v40 = vadd.f32 %v5326_v50, %v5392_v21  ;;  %v5951_v9 = vld [vmem:[#allocation10_spill] sm:$0xff] }
 0x1c2   :  { %v1238_v59 = vmax.f32 %v837_v3, 0.0  ;;  %v1242_v18 = vmax.f32 %v841_v62, 0.0  ;;  %v5953_v3 = vld [vmem:[#allocation11_spill] sm:$0xff] }
 0x1c3   :  { %v1243_v11 = vmax.f32 %v843_v28, 0.0  ;;  %v1247_v29 = vmax.f32 %v847_v40, 0.0  ;;  %v5956_v40 = vld [vmem:[#allocation16_spill] sm:$0xff] }
 0x1c4   :  { %1698 = vmatmul.mubr.f32.gmra.mrb[80].mxu1 %v1202_v47  ;;  %v5514_v47 = vpop.f32.mrb[81].mxu0 }
 0x1c5   :  { %1703 = vmatprep.mubr.f32.mxu1 %v1208_v31  ;;  %v849_v31 = vadd.f32 %v5329_v61, %v5386_v1  ;;  %v5524_v42 = vpop.f32.mrb[82].mxu0  ;;  %v853_v61 = vadd.f32 %v5332_v10, %v5392_v21 }
 0x1c7   :  { %v1248_v57 = vmax.f32 %v849_v31, 0.0  ;;  %v1252_v50 = vmax.f32 %v853_v61, 0.0 }
 0x1c8   :  { %1704 = vmatmul.mubr.f32.gmra.mrb[82].mxu1 %v1207_v8  ;;  %v855_v8 = vadd.f32 %v5335_v26, %v5386_v1  ;;  %v859_v26 = vadd.f32 %v5338_v7, %v5392_v21 }
 0x1c9   :  { %1709 = vmatprep.mubr.f32.mxu1 %v1213_v25  ;;  %v5526_v25 = vpop.f32.mrb[83].mxu0 }
 0x1ca   :  { %v1253_v49 = vmax.f32 %v855_v8, 0.0  ;;  %v5536_v20 = vpop.f32.mrb[84].mxu0  ;;  %v1257_v10 = vmax.f32 %v859_v26, 0.0 }
 0x1cc   :  { %1710 = vmatmul.mubr.f32.gmra.mrb[84].mxu1 %v1212_v30  ;;  %v861_v30 = vadd.f32 %v5341_v35, %v5386_v1  ;;  %v865_v35 = vadd.f32 %v5344_v48, %v5392_v21 }
 0x1cd   :  { %1715 = vmatprep.mubr.f32.mxu1 %v1218_v34  ;;  %v867_v34 = vadd.f32 %v5347_v2, %v5386_v1  ;;  %v871_v2 = vadd.f32 %v5350_v16, %v5392_v21 }
 0x1ce   :  { %v1258_v4 = vmax.f32 %v861_v30, 0.0  ;;  %v1262_v7 = vmax.f32 %v865_v35, 0.0  ;;  %v5958_v30 = vld [vmem:[#allocation18_spill] sm:$0xff] }
 0x1cf   :  { %v1263_v54 = vmax.f32 %v867_v34, 0.0  ;;  %v1267_v48 = vmax.f32 %v871_v2, 0.0 }
 0x1d0   :  { %1716 = vmatmul.mubr.f32.gmra.mrb[86].mxu1 %v1217_v56  ;;  %v5538_v56 = vpop.f32.mrb[85].mxu0 }
 0x1d1   :  { %1721 = vmatprep.mubr.f32.mxu1 %v1223_v45  ;;  %v873_v45 = vadd.f32 %v5353_v22, %v5386_v1  ;;  %v5548_v43 = vpop.f32.mrb[86].mxu0  ;;  %v877_v22 = vadd.f32 %v5951_v9, %v5392_v21  ;;  %v5962_v9 = vld [vmem:[#allocation23_spill] sm:$0xff] }
 0x1d3   :  { %v1268_v38 = vmax.f32 %v873_v45, 0.0  ;;  %v1272_v16 = vmax.f32 %v877_v22, 0.0  ;;  %v5960_v45 = vld [vmem:[#allocation20_spill] sm:$0xff]  ;;  %v915_v22 = vadd.f32 %v5962_v9, %v5386_v1  ;;  %v5969_v9 = vld [vmem:[#allocation26_spill] sm:$0xff] }
 0x1d4   :  { %1722 = vmatmul.mubr.f32.gmra.mrb[88].mxu1 %v1222_v17  ;;  %v879_v17 = vadd.f32 %v5359_v58, %v5386_v1  ;;  %v883_v58 = vadd.f32 %v5953_v3, %v5392_v21 }
 0x1d5   :  { %1727 = vmatprep.mubr.f32.mxu1 %v1228_v36  ;;  %v5550_v36 = vpop.f32.mrb[87].mxu0 }
 0x1d6   :  { %v5560_v28 = vpop.f32.mrb[88].mxu0  ;;  %v1277_v62 = vmax.f32 %v883_v58, 0.0  ;;  %v1303_v58 = vmax.f32 %v915_v22, 0.0 }
 0x1d8   :  { %1728 = vmatmul.mubr.f32.gmra.mrb[90].mxu1 %v1227_v33  ;;  %v1273_v33 = vmax.f32 %v879_v17, 0.0 }
 0x1d9   :  { %1733 = vmatprep.mubr.f32.mxu1 %v1233_v37  ;;  %v885_v37 = vadd.f32 %v5952_v60, %v5386_v1 }
 0x1dc   :  { %1734 = vmatmul.mubr.f32.gmra.mrb[92].mxu1 %v1232_v51  ;;  %v1278_v51 = vmax.f32 %v885_v37, 0.0 }
 0x1dd   :  { %1739 = vmatprep.mubr.f32.mxu1 %v1238_v59  ;;  %v891_v59 = vadd.f32 %v5954_v14, %v5386_v1 }
 0x1e0   :  { %1740 = vmatmul.mubr.f32.gmra.mrb[94].mxu1 %v1237_v5  ;;  %v5562_v5 = vpop.f32.mrb[89].mxu0 }
 0x1e1   :  { %1745 = vmatprep.mubr.f32.mxu1 %v1243_v11  ;;  %v5955_v11 = vld [vmem:[#allocation13_spill] sm:$0xff]  ;;  %v5572_v26 = vpop.f32.mrb[90].mxu0 }
 0x1e2   :  { %v889_v31 = vadd.f32 %v5955_v11, %v5392_v21  ;;  %v927_v11 = vadd.f32 %v5428_v12, %v5386_v1 }
 0x1e4   :  { %1746 = vmatmul.mubr.f32.gmra.mrb[96].mxu1 %v1242_v18  ;;  %v1283_v18 = vmax.f32 %v891_v59, 0.0  ;;  %v1282_v8 = vmax.f32 %v889_v31, 0.0  ;;  %v919_v59 = vadd.f32 %v5412_v46, %v5392_v21  ;;  %v5964_v46 = vld [vmem:[#allocation9_spill] sm:$0xff] }
 0x1e5   :  { %1751 = vmatprep.mubr.f32.mxu1 %v1248_v57  ;;  %v897_v57 = vadd.f32 %v5956_v40, %v5386_v1 }
 0x1e8   :  { %1752 = vmatmul.mubr.f32.gmra.mrb[98].mxu1 %v1247_v29  ;;  %v5957_v29 = vld [vmem:[#allocation15_spill] sm:$0xff] }
 0x1e9   :  { %1757 = vmatprep.mubr.f32.mxu1 %v1253_v49  ;;  %v895_v61 = vadd.f32 %v5957_v29, %v5392_v21  ;;  %v1288_v49 = vmax.f32 %v897_v57, 0.0  ;;  %v1307_v57 = vmax.f32 %v919_v59, 0.0  ;;  %v933_v29 = vadd.f32 %v5436_v27, %v5386_v1  ;;  %v323_v27 = vld [vmem:[#allocation4 + $0x40] sm:$0xff] }
 0x1eb   :  { %v1287_v34 = vmax.f32 %v895_v61, 0.0 }
 0x1ec   :  { %1758 = vmatmul.mubr.f32.gmra.mrb[100].mxu1 %v1252_v50  ;;  %v903_v50 = vadd.f32 %v5958_v30, %v5386_v1 }
 0x1ed   :  { %1763 = vmatprep.mubr.f32.mxu1 %v1258_v4  ;;  %v5574_v4 = vpop.f32.mrb[91].mxu0 }
 0x1f0   :  { %1764 = vmatmul.mubr.f32.gmra.mrb[102].mxu1 %v1257_v10  ;;  %v5959_v10 = vld [vmem:[#allocation17_spill] sm:$0xff] }
 0x1f1   :  { %1769 = vmatprep.mubr.f32.mxu1 %v1263_v54  ;;  %v901_v35 = vadd.f32 %v5959_v10, %v5392_v21  ;;  %v1293_v54 = vmax.f32 %v903_v50, 0.0  ;;  %v1318_v50 = vmax.f32 %v933_v29, 0.0  ;;  %v330_v29 = vld [vmem:[#allocation4 + $0xe8] sm:$0xff] }
 0x1f3   :  { %v1292_v2 = vmax.f32 %v901_v35, 0.0 }
 0x1f4   :  { %1770 = vmatmul.mubr.f32.gmra.mrb[104].mxu1 %v1262_v7  ;;  %v909_v7 = vadd.f32 %v5960_v45, %v5386_v1  ;;  %v5967_v45 = vmov 0.0  }
 0x1f5   :  { %1775 = vmatprep.mubr.f32.mxu1 %v1268_v38  ;;  %v5961_v38 = vld [vmem:[#allocation19_spill] sm:$0xff] }
 0x1f6   :  { %v907_v17 = vadd.f32 %v5961_v38, %v5392_v21  ;;  %v324_v38 = vld [vmem:[#allocation4 + $0x58] sm:$0xff] }
 0x1f8   :  { %1776 = vmatmul.mubr.f32.gmra.mrb[106].mxu1 %v1267_v48  ;;  %v1298_v48 = vmax.f32 %v909_v7, 0.0  ;;  %v1297_v37 = vmax.f32 %v907_v17, 0.0  ;;  %v4765_v7 = vmov 0.0|0.0  }
 0x1f9   :  { %1781 = vmatprep.mubr.f32.mxu1 %v1273_v33  ;;  %v5584_v33 = vpop.f32.mrb[92].mxu0  ;;  %4355 = vmatprep.subr.bf16.mxu0 %v4765_v7 }
 0x1fa   :  { %v5586_v60 = vpop.f32.mrb[93].mxu0 }
 0x1fb   :  { %v5596_v31 = vpop.f32.mrb[94].mxu0 }
 0x1fc   :  { %1782 = vmatmul.mubr.f32.gmra.mrb[108].mxu1 %v1272_v16  ;;  %v5963_v16 = vld [vmem:[#allocation21_spill] sm:$0xff]  ;;  %v5598_v40 = vpop.f32.mrb[95].mxu0 }
 0x1fd   :  { %1787 = vmatprep.mubr.f32.mxu1 %v1278_v51  ;;  %v913_v3 = vadd.f32 %v5963_v16, %v5392_v21  ;;  %v921_v51 = vadd.f32 %v5416_v55, %v5386_v1  ;;  %v925_v55 = vadd.f32 %v5422_v0, %v5392_v21  ;;  %v322_v1 = vld [vmem:[#allocation4 + $0x28] sm:$0xff] }
 0x1fe   :  { %v326_v16 = vld [vmem:[#allocation4 + $0x88] sm:$0xff] }
 0x1ff   :  { %v1302_v14 = vmax.f32 %v913_v3, 0.0  ;;  %v1312_v12 = vmax.f32 %v925_v55, 0.0 }
 0x200   :  { %1788 = vmatmul.mubr.f32.gmra.mrb[110].mxu1 %v1277_v62  ;;  %v1308_v62 = vmax.f32 %v921_v51, 0.0  ;;  %v5970_v51 = vld [vmem:[#allocation25_spill] sm:$0xff] }
 0x201   :  { %1793 = vmatprep.mubr.f32.mxu1 %v1283_v18  ;;  %v160_v18 = vld [vmem:[#allocation2 + $0x2a0] sm:$0xff] }
 0x202   :  { %v5605_v61 = vrot.slane %v160_v18, %v5964_v46 }
 0x204   :  { %1794 = vmatmul.mubr.f32.gmra.mrb[112].mxu1 %v1282_v8  ;;  %v1313_v8 = vmax.f32 %v927_v11, 0.0  ;;  %v1012_v22 = vadd.f32 %v5969_v9, %v5605_v61  ;;  %v328_v11 = vld [vmem:[#allocation4 + $0xb8] sm:$0xff]  ;;  %v1022_v55 = vadd.f32 %v5442_v52, %v5605_v61  ;;  %v1047_v9 = vadd.f32 %v5464_v6, %v5605_v61 }
 0x205   :  { %1799 = vmatprep.mubr.f32.mxu1 %v1288_v49  ;;  %v5965_v49 = vld [vmem:[#allocation27_spill] sm:$0xff] }
 0x206   :  { %v931_v30 = vadd.f32 %v5965_v49, %v5392_v21  ;;  %v5968_v21 = vld [vmem:[#allocation22_spill] sm:$0xff]  ;;  %v1174_v59 = vmax.f32 %v1012_v22, 0.0  ;;  %v1184_v49 = vmax.f32 %v1022_v55, 0.0  ;;  %v1062_v55 = vadd.f32 %v5490_v39, %v5605_v61 }
 0x207   :  { %v1007_v17 = vadd.f32 %v5968_v21, %v5605_v61  ;;  %v1042_v21 = vadd.f32 %v5466_v63, %v5605_v61 }
 0x208   :  { %1800 = vmatmul.mubr.f32.gmra.mrb[114].mxu1 %v1287_v34  ;;  %v5966_v34 = vld [vmem:[#allocation24_spill] sm:$0xff]  ;;  %v1317_v0 = vmax.f32 %v931_v30, 0.0 }
 0x209   :  { %1805 = vmatprep.mubr.f32.mxu1 %v1293_v54  ;;  %v1002_v10 = vadd.f32 %v5966_v34, %v5605_v61  ;;  %v321_v54 = vld [vmem:[#allocation4 + $0x10] sm:$0xff]  ;;  %v1169_v3 = vmax.f32 %v1007_v17, 0.0  ;;  %v331_v30 = vld [vmem:[#allocation4 + $0x100] sm:$0xff]  ;;  %v1204_v22 = vmax.f32 %v1042_v21, 0.0  ;;  %v1117_v21 = vadd.f32 %v5548_v43, %v5605_v61 }
 0x20a   :  { %v337_v17 = vld [vmem:[#allocation4 + $0x190] sm:$0xff] }
 0x20b   :  { %v1164_v35 = vmax.f32 %v1002_v10, 0.0  ;;  %v1032_v10 = vadd.f32 %v5454_v53, %v5605_v61 }
 0x20c   :  { %1806 = vmatmul.mubr.f32.gmra.mrb[116].mxu1 %v1292_v2  ;;  %v4356_v2 = vpack.c.bf16 %v322_v1, %v321_v54  ;;  %v1037_v54 = vadd.f32 %v5452_v13, %v5605_v61 }
 0x20d   :  { %1811 = vmatprep.mubr.f32.mxu1 %v1298_v48  ;;  %v4359_v48 = vpack.c.bf16 %v324_v38, %v323_v27  ;;  %v1194_v1 = vmax.f32 %v1032_v10, 0.0  ;;  %v335_v27 = vld [vmem:[#allocation4 + $0x160] sm:$0xff]  ;;  %v350_v10 = vld [vmem:[#allocation4 + $0x2c8] sm:$0xff] }
 0x20e   :  { %4357 = vmatpush1.bf16.msra.mxu0 %v4356_v2  ;;  %v336_v2 = vld [vmem:[#allocation4 + $0x178] sm:$0xff]  ;;  %v1199_v38 = vmax.f32 %v1037_v54, 0.0  ;;  %v1087_v54 = vadd.f32 %v5512_v23, %v5605_v61  ;;  %v1102_v23 = vadd.f32 %v5538_v56, %v5605_v61 }
 0x20f   :  { %4358 = vmatprep.subr.bf16.mxu0 %v4765_v7  ;;  %v4377_v53 = vpack.c.bf16 %v336_v2, %v335_v27  ;;  %v1092_v27 = vadd.f32 %v5526_v25, %v5605_v61 }
 0x210   :  { %1812 = vmatmul.mubr.f32.gmra.mrb[118].mxu1 %v1297_v37  ;;  %v325_v37 = vld [vmem:[#allocation4 + $0x70] sm:$0xff]  ;;  %v1264_v25 = vmax.f32 %v1102_v23, 0.0 }
 0x211   :  { %1817 = vmatprep.mubr.f32.mxu1 %v1303_v58  ;;  %v4362_v58 = vpack.c.bf16 %v326_v16, %v325_v37  ;;  %v339_v37 = vld [vmem:[#allocation4 + $0x1c0] sm:$0xff]  ;;  %v340_v16 = vld [vmem:[#allocation4 + $0x1d8] sm:$0xff] }
 0x212   :  { %4360 = vmatpush1.bf16.msra.mxu0 %v4359_v48  ;;  %v338_v48 = vld [vmem:[#allocation4 + $0x1a8] sm:$0xff]  ;;  %v4383_v63 = vpack.c.bf16 %v340_v16, %v339_v37  ;;  %v1132_v37 = vadd.f32 %v5574_v4, %v5605_v61  ;;  %v1137_v16 = vadd.f32 %v5572_v26, %v5605_v61  ;;  %v1152_v26 = vadd.f32 %v5598_v40, %v5605_v61 }
 0x213   :  { %4361 = vmatprep.subr.bf16.mxu0 %v4765_v7  ;;  %v4380_v13 = vpack.c.bf16 %v338_v48, %v337_v17  ;;  %v351_v17 = vld [vmem:[#allocation4 + $0x2e0] sm:$0xff]  ;;  %v352_v48 = vld [vmem:[#allocation4 + $0x2f8] sm:$0xff] }
 0x214   :  { %1818 = vmatmul.mubr.f32.gmra.mrb[120].mxu1 %v1302_v14  ;;  %v1017_v14 = vadd.f32 %v5970_v51, %v5605_v61  ;;  %v341_v51 = vld [vmem:[#allocation4 + $0x1f0] sm:$0xff] }
 0x215   :  { %1823 = vmatprep.mubr.f32.mxu1 %v1308_v62  ;;  %v327_v62 = vld [vmem:[#allocation4 + $0xa0] sm:$0xff] }
 0x216   :  { %4363 = vmatpush1.bf16.msra.mxu0 %v4362_v58  ;;  %v4365_v18 = vpack.c.bf16 %v328_v11, %v327_v62  ;;  %v1052_v58 = vadd.f32 %v5478_v19, %v5605_v61  ;;  %v343_v11 = vld [vmem:[#allocation4 + $0x220] sm:$0xff] }
 0x217   :  { %4364 = vmatprep.subr.bf16.mxu0 %v4765_v7 }
 0x218   :  { %1824 = vmatmul.mubr.f32.gmra.mrb[122].mxu1 %v1307_v57  ;;  %v1179_v57 = vmax.f32 %v1017_v14, 0.0  ;;  %v342_v14 = vld [vmem:[#allocation4 + $0x208] sm:$0xff]  ;;  %v1214_v62 = vmax.f32 %v1052_v58, 0.0 }
 0x219   :  { %1829 = vmatprep.mubr.f32.mxu1 %v1313_v8  ;;  %v329_v8 = vld [vmem:[#allocation4 + $0xd0] sm:$0xff]  ;;  %v4386_v6 = vpack.c.bf16 %v342_v14, %v341_v51  ;;  %v1157_v51 = vadd.f32 %v5596_v31, %v5605_v61  ;;  %v4707_v31 = vld [vmem:[#allocation2 + $0x288] sm:$0xff] }
 0x21a   :  { %4366 = vmatpush1.bf16.msra.mxu0 %v4365_v18  ;;  %v4368_v46 = vpack.c.bf16 %v330_v29, %v329_v8  ;;  %v344_v18 = vld [vmem:[#allocation4 + $0x238] sm:$0xff]  ;;  %v345_v8 = vld [vmem:[#allocation4 + $0x250] sm:$0xff]  ;;  %v346_v29 = vld [vmem:[#allocation4 + $0x268] sm:$0xff] }
 0x21b   :  { %4367 = vmatprep.subr.bf16.mxu0 %v4765_v7  ;;  %v4389_v19 = vpack.c.bf16 %v344_v18, %v343_v11  ;;  %v1319_v14 = vmax.f32 %v1157_v51, 0.0  ;;  %v5722_v11 = vld [vmem:[#allocation2 + $0x280] sm:$0xff] }
 0x21c   :  { %1830 = vmatmul.mubr.f32.gmra.mrb[124].mxu1 %v1312_v12  ;;  %v1027_v12 = vadd.f32 %v5440_v24, %v5605_v61 }
 0x21d   :  { %1835 = vmatprep.mubr.f32.mxu1 %v1318_v50  ;;  %v332_v50 = vld [vmem:[#allocation4 + $0x118] sm:$0xff] }
 0x21e   :  { %4369 = vmatpush1.bf16.msra.mxu0 %v4368_v46  ;;  %v4371_v52 = vpack.c.bf16 %v332_v50, %v331_v30  ;;  %v1189_v34 = vmax.f32 %v1027_v12, 0.0  ;;  %v1067_v46 = vadd.f32 %v5488_v41, %v5605_v61  ;;  %v1224_v12 = vmax.f32 %v1062_v55, 0.0  ;;  %v348_v30 = vld [vmem:[#allocation4 + $0x298] sm:$0xff] }
 0x21f   :  { %4370 = vmatprep.subr.bf16.mxu0 %v4765_v7 }
 0x220   :  { %1836 = vmatmul.mubr.f32.gmra.mrb[126].mxu1 %v1317_v0  ;;  %v333_v0 = vld [vmem:[#allocation4 + $0x130] sm:$0xff]  ;;  %v1229_v50 = vmax.f32 %v1067_v46, 0.0 }
 0x221   :  { %1906 = vmatprep.mubr.f32.mxu1 %v5967_v45 }
 0x222   :  { %4372 = vmatpush1.bf16.msra.mxu0 %v4371_v52  ;;  %v1072_v52 = vadd.f32 %v5502_v32, %v5605_v61  ;;  %v1082_v32 = vadd.f32 %v5514_v47, %v5605_v61  ;;  %v1097_v47 = vadd.f32 %v5524_v42, %v5605_v61  ;;  %v1112_v42 = vadd.f32 %v5550_v36, %v5605_v61 }
 0x223   :  { %4373 = vmatprep.subr.bf16.mxu0 %v4765_v7  ;;  %v1127_v36 = vadd.f32 %v5560_v28, %v5605_v61  ;;  %v1142_v28 = vadd.f32 %v5586_v60, %v5605_v61  ;;  %v1314_v60 = vmax.f32 %v1152_v26, 0.0 }
 0x224   :  { %1907 = vmatmul.mubr.f32.vlgmr.msra.gmra.mrb[64].mxu1 %v1164_v35  ;;  %v334_v35 = vld [vmem:[#allocation4 + $0x148] sm:$0xff]  ;;  %v1259_v2 = vmax.f32 %v1097_v47, 0.0  ;;  %v1274_v56 = vmax.f32 %v1112_v42, 0.0 }
 0x225   :  { %1912 = vmatprep.mubr.f32.mxu1 %v5967_v45  ;;  %v4374_v24 = vpack.c.bf16 %v334_v35, %v333_v0  ;;  %v1077_v0 = vadd.f32 %v5500_v15, %v5605_v61  ;;  %v1234_v35 = vmax.f32 %v1072_v52, 0.0  ;;  %v1244_v15 = vmax.f32 %v1082_v32, 0.0  ;;  %v357_v52 = vld [vmem:[#allocation4 + $0x370] sm:$0xff]  ;;  %v362_v42 = vld [vmem:[#allocation4 + $0x3e8] sm:$0xff] }
 0x226   :  { %v1289_v43 = vmax.f32 %v1127_v36, 0.0  ;;  %v1304_v4 = vmax.f32 %v1142_v28, 0.0  ;;  %v363_v36 = vld [vmem:[#allocation4 + $0x400] sm:$0xff] }
 0x227   :  { %4375 = vmatpush1.bf16.msra.mxu0 %v4374_v24  ;;  %v1239_v24 = vmax.f32 %v1077_v0, 0.0 }
 0x228   :  { %1913 = vmatmul.mubr.f32.gmra.mrb[66].mxu1 %v1169_v3  ;;  %4376 = vmatprep.subr.bf16.mxu0 %v4765_v7  ;;  %v1209_v3 = vmax.f32 %v1047_v9, 0.0  ;;  %v1122_v9 = vadd.f32 %v5562_v5, %v5605_v61  ;;  %v1294_v5 = vmax.f32 %v1132_v37, 0.0 }
 0x229   :  { %1918 = vmatprep.mubr.f32.mxu1 %v5967_v45 }
 0x22b   :  { %4378 = vmatpush1.bf16.msra.mxu0 %v4377_v53  ;;  %v1107_v53 = vadd.f32 %v5536_v20, %v5605_v61  ;;  %v4401_v20 = vpack.c.bf16 %v352_v48, %v351_v17 }
 0x22c   :  { %1919 = vmatmul.mubr.f32.gmra.mrb[68].mxu1 %v1174_v59  ;;  %4379 = vmatprep.subr.bf16.mxu0 %v4765_v7  ;;  %v1057_v59 = vadd.f32 %v5476_v44, %v5605_v61  ;;  %v4392_v44 = vpack.c.bf16 %v346_v29, %v345_v8  ;;  %v355_v8 = vld [vmem:[#allocation4 + $0x340] sm:$0xff]  ;;  %v356_v29 = vld [vmem:[#allocation4 + $0x358] sm:$0xff] }
 0x22d   :  { %1924 = vmatprep.mubr.f32.mxu1 %v5967_v45 }
 0x22f   :  { %4381 = vmatpush1.bf16.msra.mxu0 %v4380_v13  ;;  %v1279_v13 = vmax.f32 %v1117_v21, 0.0 }
 0x230   :  { %1925 = vmatmul.mubr.f32.gmra.mrb[70].mxu1 %v1179_v57  ;;  %4382 = vmatprep.subr.bf16.mxu0 %v4765_v7  ;;  %v1219_v57 = vmax.f32 %v1057_v59, 0.0 }
 0x231   :  { %1930 = vmatprep.mubr.f32.mxu1 %v5967_v45 }
 0x233   :  { %4384 = vmatpush1.bf16.msra.mxu0 %v4383_v63  ;;  %v1299_v63 = vmax.f32 %v1137_v16, 0.0 }
 0x234   :  { %1931 = vmatmul.mubr.f32.gmra.mrb[72].mxu1 %v1184_v49  ;;  %4385 = vmatprep.subr.bf16.mxu0 %v4765_v7  ;;  %v347_v49 = vld [vmem:[#allocation4 + $0x280] sm:$0xff] }
 0x235   :  { %1936 = vmatprep.mubr.f32.mxu1 %v5967_v45  ;;  %v4395_v39 = vpack.c.bf16 %v348_v30, %v347_v49 }
 0x237   :  { %4387 = vmatpush1.bf16.msra.mxu0 %v4386_v6  ;;  %v354_v6 = vld [vmem:[#allocation4 + $0x328] sm:$0xff] }
 0x238   :  { %1937 = vmatmul.mubr.f32.gmra.mrb[74].mxu1 %v1189_v34  ;;  %4388 = vmatprep.subr.bf16.mxu0 %v4765_v7  ;;  %v349_v34 = vld [vmem:[#allocation4 + $0x2b0] sm:$0xff] }
 0x239   :  { %1942 = vmatprep.mubr.f32.mxu1 %v5967_v45  ;;  %v4398_v41 = vpack.c.bf16 %v350_v10, %v349_v34  ;;  %v358_v34 = vld [vmem:[#allocation4 + $0x388] sm:$0xff] }
 0x23a   :  { %v4411_v32 = vpack.c.bf16 %v358_v34, %v357_v52 }
 0x23b   :  { %4390 = vmatpush1.bf16.msra.mxu0 %v4389_v19 }
 0x23c   :  { %1943 = vmatmul.mubr.f32.gmra.mrb[76].mxu1 %v1194_v1  ;;  %4391 = vmatprep.subr.bf16.mxu0 %v4765_v7  ;;  %v1249_v1 = vmax.f32 %v1087_v54, 0.0 }
 0x23d   :  { %1948 = vmatprep.mubr.f32.mxu1 %v5967_v45 }
 0x23f   :  { %4393 = vmatpush1.bf16.msra.mxu0 %v4392_v44 }
 0x240   :  { %1949 = vmatmul.mubr.f32.gmra.mrb[78].mxu1 %v1199_v38  ;;  %4394 = vmatprep.subr.bf16.mxu0 %v4765_v7  ;;  %v1269_v38 = vmax.f32 %v1107_v53, 0.0 }
 0x241   :  { %1954 = vmatprep.mubr.f32.mxu1 %v5967_v45 }
 0x243   :  { %4396 = vmatpush1.bf16.msra.mxu0 %v4395_v39  ;;  %v4407_v39 = vpack.c.bf16 %v356_v29, %v355_v8 }
 0x244   :  { %1955 = vmatmul.mubr.f32.gmra.mrb[80].mxu1 %v1204_v22  ;;  %4397 = vmatprep.subr.bf16.mxu0 %v4765_v7  ;;  %v1284_v22 = vmax.f32 %v1122_v9, 0.0 }
 0x245   :  { %1960 = vmatprep.mubr.f32.mxu1 %v5967_v45 }
 0x247   :  { %4399 = vmatpush1.bf16.msra.mxu0 %v4398_v41 }
 0x248   :  { %1961 = vmatmul.mubr.f32.gmra.mrb[82].mxu1 %v1209_v3  ;;  %4400 = vmatprep.subr.bf16.mxu0 %v4765_v7  ;;  %v1254_v7 = vmax.f32 %v1092_v27, 0.0  ;;  %v1147_v3 = vadd.f32 %v5584_v33, %v5605_v61  ;;  %v353_v33 = vld [vmem:[#allocation4 + $0x310] sm:$0xff] }
 0x249   :  { %1966 = vmatprep.mubr.f32.mxu1 %v5967_v45  ;;  %v4403_v59 = vpack.c.bf16 %v354_v6, %v353_v33 }
 0x24a   :  { %v1309_v58 = vmax.f32 %v1147_v3, 0.0 }
 0x24b   :  { %4402 = vmatpush1.bf16.msra.mxu0 %v4401_v20 }
 0x24c   :  { %1967 = vmatmul.mubr.f32.gmra.mrb[84].mxu1 %v1214_v62  ;;  %4404 = vmatprep.subr.bf16.mxu0 %v4403_v59  ;;  %v5971_v62 = vld [vmem:[#allocation8_spill] sm:$0xff] }
 0x24d   :  { %1972 = vmatprep.mubr.f32.mxu1 %v5967_v45  ;;  %v1322_v40 = vsub.s32 1, %v5971_v62 }
 0x24f   :  { %v5725_v18 = vrot.slane %v5722_v11, %v1322_v40  ;;  %v5727_v61 = vrot.slane %v4707_v31, %v1322_v40  ;;  %v367_v40 = vld [vmem:[#allocation4 + $0x460] sm:$0xff]  ;;  %v368_v31 = vld [vmem:[#allocation4 + $0x478] sm:$0xff] }
 0x250   :  { %1973 = vmatmul.mubr.f32.gmra.mrb[86].mxu1 %v1219_v57  ;;  %v4431_v29 = vpack.c.bf16 %v368_v31, %v367_v40 }
 0x251   :  { %1978 = vmatprep.mubr.f32.mxu1 %v5967_v45 }
 0x254   :  { %1979 = vmatmul.mubr.f32.gmra.mrb[88].mxu1 %v1224_v12 }
 0x255   :  { %1984 = vmatprep.mubr.f32.mxu1 %v5967_v45 }
 0x258   :  { %1985 = vmatmul.mubr.f32.gmra.mrb[90].mxu1 %v1229_v50 }
 0x259   :  { %1990 = vmatprep.mubr.f32.mxu1 %v5967_v45 }
 0x25c   :  { %1991 = vmatmul.mubr.f32.gmra.mrb[92].mxu1 %v1234_v35 }
 0x25d   :  { %1996 = vmatprep.mubr.f32.mxu1 %v5967_v45 }
 0x260   :  { %1997 = vmatmul.mubr.f32.gmra.mrb[94].mxu1 %v1239_v24 }
 0x261   :  { %2002 = vmatprep.mubr.f32.mxu1 %v5967_v45 }
 0x264   :  { %2003 = vmatmul.mubr.f32.gmra.mrb[96].mxu1 %v1244_v15  ;;  %v359_v15 = vld [vmem:[#allocation4 + $0x3a0] sm:$0xff] }
 0x265   :  { %2008 = vmatprep.mubr.f32.mxu1 %v5967_v45 }
 0x268   :  { %2009 = vmatmul.mubr.f32.gmra.mrb[98].mxu1 %v1249_v1  ;;  %v360_v1 = vld [vmem:[#allocation4 + $0x3b8] sm:$0xff] }
 0x269   :  { %2014 = vmatprep.mubr.f32.mxu1 %v5967_v45  ;;  %v4415_v53 = vpack.c.bf16 %v360_v1, %v359_v15 }
 0x26c   :  { %2015 = vmatmul.mubr.f32.gmra.mrb[100].mxu1 %v1254_v7 }
 0x26d   :  { %2020 = vmatprep.mubr.f32.mxu1 %v5967_v45 }
 0x270   :  { %2021 = vmatmul.mubr.f32.gmra.mrb[102].mxu1 %v1259_v2 }
 0x271   :  { %2026 = vmatprep.mubr.f32.mxu1 %v5967_v45 }
 0x274   :  { %2027 = vmatmul.mubr.f32.gmra.mrb[104].mxu1 %v1264_v25 }
 0x275   :  { %2032 = vmatprep.mubr.f32.mxu1 %v5967_v45 }
 0x278   :  { %2033 = vmatmul.mubr.f32.gmra.mrb[106].mxu1 %v1269_v38  ;;  %v361_v38 = vld [vmem:[#allocation4 + $0x3d0] sm:$0xff] }
 0x279   :  { %2038 = vmatprep.mubr.f32.mxu1 %v5967_v45 }
 0x27c   :  { %2039 = vmatmul.mubr.f32.gmra.mrb[108].mxu1 %v1274_v56 }
 0x27d   :  { %2044 = vmatprep.mubr.f32.mxu1 %v5967_v45 }
 0x280   :  { %2045 = vmatmul.mubr.f32.gmra.mrb[110].mxu1 %v1279_v13  ;;  %v4419_v13 = vpack.c.bf16 %v362_v42, %v361_v38 }
 0x281   :  { %2050 = vmatprep.mubr.f32.mxu1 %v5967_v45 }
 0x284   :  { %2051 = vmatmul.mubr.f32.gmra.mrb[112].mxu1 %v1284_v22  ;;  %v364_v22 = vld [vmem:[#allocation4 + $0x418] sm:$0xff] }
 0x285   :  { %2056 = vmatprep.mubr.f32.mxu1 %v5967_v45  ;;  %v4423_v28 = vpack.c.bf16 %v364_v22, %v363_v36 }
 0x288   :  { %2057 = vmatmul.mubr.f32.gmra.mrb[114].mxu1 %v1289_v43 }
 0x289   :  { %2062 = vmatprep.mubr.f32.mxu1 %v5967_v45 }
 0x28c   :  { %2063 = vmatmul.mubr.f32.gmra.mrb[116].mxu1 %v1294_v5 }
 0x28d   :  { %2068 = vmatprep.mubr.f32.mxu1 %v5967_v45 }
 0x290   :  { %2069 = vmatmul.mubr.f32.gmra.mrb[118].mxu1 %v1299_v63 }
 0x291   :  { %2074 = vmatprep.mubr.f32.mxu1 %v5967_v45 }
 0x294   :  { %2075 = vmatmul.mubr.f32.gmra.mrb[120].mxu1 %v1304_v4  ;;  %v365_v4 = vld [vmem:[#allocation4 + $0x430] sm:$0xff] }
 0x295   :  { %2080 = vmatprep.mubr.f32.mxu1 %v5967_v45 }
 0x298   :  { %2081 = vmatmul.mubr.f32.gmra.mrb[122].mxu1 %v1309_v58  ;;  %v366_v58 = vld [vmem:[#allocation4 + $0x448] sm:$0xff] }
 0x299   :  { %2086 = vmatprep.mubr.f32.mxu1 %v5967_v45  ;;  %v4427_v6 = vpack.c.bf16 %v366_v58, %v365_v4 }
 0x29c   :  { %2087 = vmatmul.mubr.f32.gmra.mrb[124].mxu1 %v1314_v60 }
 0x29d   :  { %2092 = vmatprep.mubr.f32.mxu1 %v5967_v45 }
 0x2a0   :  { %2093 = vmatmul.mubr.f32.gmra.mrb[126].mxu1 %v1319_v14 }
 0x2f7   :  { %v1908_v19 = vpop.f32.mrb[64].mxu1 }
 0x2f8   :  { %v4499_v57 = vadd.f32 %v1908_v19, %v5725_v18  ;;  %v1910_v55 = vpop.f32.mrb[65].mxu1 }
 0x2f9   :  { %v4500_v45 = vadd.f32 %v1910_v55, %v5727_v61 }
 0x2fa   :  { %v2099_v12 = vmax.f32 %v4499_v57, 0.0 }
 0x2fb   :  { %v2100_v44 = vmax.f32 %v4500_v45, 0.0  ;;  %v1914_v46 = vpop.f32.mrb[66].mxu1 }
 0x2fc   :  { %v4501_v49 = vadd.f32 %v1914_v46, %v5725_v18  ;;  %v1916_v30 = vpop.f32.mrb[67].mxu1 }
 0x2fd   :  { %v4502_v50 = vadd.f32 %v1916_v30, %v5727_v61  ;;  %2231 = vmatprep.mubr.f32.mxu0 %v2100_v44 }
 0x2fe   :  { %2232 = vmatmul.mubr.f32.vlgmr.msra.gmra.mrb[96].mxu0 %v2099_v12  ;;  %v2101_v0 = vmax.f32 %v4501_v49, 0.0 }
 0x2ff   :  { %v2102_v10 = vmax.f32 %v4502_v50, 0.0  ;;  %v1920_v41 = vpop.f32.mrb[68].mxu1  ;;  %4406 = vmatpush3.bf16.msra.mxu0 %v4403_v59 }
 0x300   :  { %v4503_v35 = vadd.f32 %v1920_v41, %v5725_v18  ;;  %v1922_v24 = vpop.f32.mrb[69].mxu1  ;;  %4408 = vmatprep.subr.bf16.mxu0 %v4407_v39 }
 0x301   :  { %v4504_v54 = vadd.f32 %v1922_v24, %v5727_v61  ;;  %2236 = vmatprep.mubr.f32.mxu0 %v2102_v10 }
 0x302   :  { %2237 = vmatmul.mubr.f32.gmra.mrb[98].mxu0 %v2101_v0  ;;  %v2103_v7 = vmax.f32 %v4503_v35, 0.0 }
 0x303   :  { %v2104_v27 = vmax.f32 %v4504_v54, 0.0  ;;  %v1926_v47 = vpop.f32.mrb[70].mxu1  ;;  %4410 = vmatpush3.bf16.msra.mxu0 %v4407_v39 }
 0x304   :  { %v4505_v2 = vadd.f32 %v1926_v47, %v5725_v18  ;;  %v1928_v23 = vpop.f32.mrb[71].mxu1  ;;  %4412 = vmatprep.subr.bf16.mxu0 %v4411_v32 }
 0x305   :  { %v4506_v25 = vadd.f32 %v1928_v23, %v5727_v61  ;;  %2241 = vmatprep.mubr.f32.mxu0 %v2104_v27 }
 0x306   :  { %2242 = vmatmul.mubr.f32.gmra.mrb[100].mxu0 %v2103_v7  ;;  %v2105_v17 = vmax.f32 %v4505_v2, 0.0 }
 0x307   :  { %v2106_v21 = vmax.f32 %v4506_v25, 0.0  ;;  %v1932_v56 = vpop.f32.mrb[72].mxu1  ;;  %4414 = vmatpush3.bf16.msra.mxu0 %v4411_v32 }
 0x308   :  { %v4507_v48 = vadd.f32 %v1932_v56, %v5725_v18  ;;  %v1934_v20 = vpop.f32.mrb[73].mxu1  ;;  %4416 = vmatprep.subr.bf16.mxu0 %v4415_v53 }
 0x309   :  { %v4508_v9 = vadd.f32 %v1934_v20, %v5727_v61  ;;  %2246 = vmatprep.mubr.f32.mxu0 %v2106_v21 }
 0x30a   :  { %2247 = vmatmul.mubr.f32.gmra.mrb[102].mxu0 %v2105_v17  ;;  %v2107_v16 = vmax.f32 %v4507_v48, 0.0 }
 0x30b   :  { %v2108_v43 = vmax.f32 %v4508_v9, 0.0  ;;  %v1938_v37 = vpop.f32.mrb[74].mxu1  ;;  %4418 = vmatpush3.bf16.msra.mxu0 %v4415_v53 }
 0x30c   :  { %v4509_v5 = vadd.f32 %v1938_v37, %v5725_v18  ;;  %v1940_v63 = vpop.f32.mrb[75].mxu1  ;;  %4420 = vmatprep.subr.bf16.mxu0 %v4419_v13 }
 0x30d   :  { %v4510_v3 = vadd.f32 %v1940_v63, %v5727_v61  ;;  %2251 = vmatprep.mubr.f32.mxu0 %v2108_v43 }
 0x30e   :  { %2252 = vmatmul.mubr.f32.gmra.mrb[104].mxu0 %v2107_v16  ;;  %v2109_v60 = vmax.f32 %v4509_v5, 0.0 }
 0x30f   :  { %v2110_v26 = vmax.f32 %v4510_v3, 0.0  ;;  %v1944_v51 = vpop.f32.mrb[76].mxu1  ;;  %4422 = vmatpush3.bf16.msra.mxu0 %v4419_v13 }
 0x310   :  { %v4511_v14 = vadd.f32 %v1944_v51, %v5725_v18  ;;  %v1946_v33 = vpop.f32.mrb[77].mxu1  ;;  %4424 = vmatprep.subr.bf16.mxu0 %v4423_v28 }
 0x311   :  { %v4512_v59 = vadd.f32 %v1946_v33, %v5727_v61  ;;  %2256 = vmatprep.mubr.f32.mxu0 %v2110_v26 }
 0x312   :  { %2257 = vmatmul.mubr.f32.gmra.mrb[106].mxu0 %v2109_v60  ;;  %v2111_v55 = vmax.f32 %v4511_v14, 0.0 }
 0x313   :  { %v2112_v19 = vmax.f32 %v4512_v59, 0.0  ;;  %v1950_v57 = vpop.f32.mrb[78].mxu1  ;;  %4426 = vmatpush3.bf16.msra.mxu0 %v4423_v28 }
 0x314   :  { %v4513_v45 = vadd.f32 %v1950_v57, %v5725_v18  ;;  %v1952_v8 = vpop.f32.mrb[79].mxu1  ;;  %4428 = vmatprep.subr.bf16.mxu0 %v4427_v6 }
 0x315   :  { %v4514_v44 = vadd.f32 %v1952_v8, %v5727_v61  ;;  %2261 = vmatprep.mubr.f32.mxu0 %v2112_v19 }
 0x316   :  { %2262 = vmatmul.mubr.f32.gmra.mrb[108].mxu0 %v2111_v55  ;;  %v2113_v49 = vmax.f32 %v4513_v45, 0.0 }
 0x317   :  { %v2114_v46 = vmax.f32 %v4514_v44, 0.0  ;;  %v1956_v12 = vpop.f32.mrb[80].mxu1  ;;  %4430 = vmatpush3.bf16.msra.mxu0 %v4427_v6 }
 0x318   :  { %v4515_v30 = vadd.f32 %v1956_v12, %v5725_v18  ;;  %v1958_v39 = vpop.f32.mrb[81].mxu1  ;;  %4432 = vmatprep.subr.bf16.mxu0 %v4431_v29 }
 0x319   :  { %v4516_v50 = vadd.f32 %v1958_v39, %v5727_v61  ;;  %2266 = vmatprep.mubr.f32.mxu0 %v2114_v46 }
 0x31a   :  { %2267 = vmatmul.mubr.f32.gmra.mrb[110].mxu0 %v2113_v49  ;;  %v2115_v10 = vmax.f32 %v4515_v30, 0.0 }
 0x31b   :  { %v2116_v52 = vmax.f32 %v4516_v50, 0.0  ;;  %v1962_v34 = vpop.f32.mrb[82].mxu1  ;;  %4434 = vmatpush3.bf16.msra.mxu0 %v4431_v29 }
 0x31c   :  { %v4517_v41 = vadd.f32 %v1962_v34, %v5725_v18  ;;  %v1964_v0 = vpop.f32.mrb[83].mxu1 }
 0x31d   :  { %v4518_v35 = vadd.f32 %v1964_v0, %v5727_v61  ;;  %2271 = vmatprep.mubr.f32.mxu0 %v2116_v52 }
 0x31e   :  { %2272 = vmatmul.mubr.f32.gmra.mrb[112].mxu0 %v2115_v10  ;;  %v2117_v54 = vmax.f32 %v4517_v41, 0.0 }
 0x31f   :  { %v2118_v24 = vmax.f32 %v4518_v35, 0.0  ;;  %v1968_v32 = vpop.f32.mrb[84].mxu1 }
 0x320   :  { %v4519_v15 = vadd.f32 %v1968_v32, %v5725_v18  ;;  %v1970_v1 = vpop.f32.mrb[85].mxu1 }
 0x321   :  { %v4520_v27 = vadd.f32 %v1970_v1, %v5727_v61  ;;  %2276 = vmatprep.mubr.f32.mxu0 %v2118_v24 }
 0x322   :  { %2277 = vmatmul.mubr.f32.gmra.mrb[114].mxu0 %v2117_v54  ;;  %v2119_v2 = vmax.f32 %v4519_v15, 0.0 }
 0x323   :  { %v2120_v47 = vmax.f32 %v4520_v27, 0.0  ;;  %v1974_v7 = vpop.f32.mrb[86].mxu1 }
 0x324   :  { %v4521_v23 = vadd.f32 %v1974_v7, %v5725_v18  ;;  %v1976_v53 = vpop.f32.mrb[87].mxu1 }
 0x325   :  { %v4522_v25 = vadd.f32 %v1976_v53, %v5727_v61  ;;  %2281 = vmatprep.mubr.f32.mxu0 %v2120_v47 }
 0x326   :  { %2282 = vmatmul.mubr.f32.gmra.mrb[116].mxu0 %v2119_v2  ;;  %v2121_v21 = vmax.f32 %v4521_v23, 0.0 }
 0x327   :  { %v2122_v38 = vmax.f32 %v4522_v25, 0.0  ;;  %v1980_v42 = vpop.f32.mrb[88].mxu1 }
 0x328   :  { %v4523_v56 = vadd.f32 %v1980_v42, %v5725_v18  ;;  %v1982_v17 = vpop.f32.mrb[89].mxu1 }
 0x329   :  { %v4524_v48 = vadd.f32 %v1982_v17, %v5727_v61  ;;  %2286 = vmatprep.mubr.f32.mxu0 %v2122_v38 }
 0x32a   :  { %2287 = vmatmul.mubr.f32.gmra.mrb[118].mxu0 %v2121_v21  ;;  %v2123_v9 = vmax.f32 %v4523_v56, 0.0 }
 0x32b   :  { %v2124_v20 = vmax.f32 %v4524_v48, 0.0  ;;  %v1986_v13 = vpop.f32.mrb[90].mxu1 }
 0x32c   :  { %v4525_v36 = vadd.f32 %v1986_v13, %v5725_v18  ;;  %v1988_v22 = vpop.f32.mrb[91].mxu1 }
 0x32d   :  { %v4526_v43 = vadd.f32 %v1988_v22, %v5727_v61  ;;  %2291 = vmatprep.mubr.f32.mxu0 %v2124_v20 }
 0x32e   :  { %2292 = vmatmul.mubr.f32.gmra.mrb[120].mxu0 %v2123_v9  ;;  %v2125_v5 = vmax.f32 %v4525_v36, 0.0 }
 0x32f   :  { %v2126_v37 = vmax.f32 %v4526_v43, 0.0  ;;  %v1992_v16 = vpop.f32.mrb[92].mxu1 }
 0x330   :  { %v4527_v63 = vadd.f32 %v1992_v16, %v5725_v18  ;;  %v1994_v28 = vpop.f32.mrb[93].mxu1 }
 0x331   :  { %v4528_v3 = vadd.f32 %v1994_v28, %v5727_v61  ;;  %2296 = vmatprep.mubr.f32.mxu0 %v2126_v37 }
 0x332   :  { %2297 = vmatmul.mubr.f32.gmra.mrb[122].mxu0 %v2125_v5  ;;  %v2127_v26 = vmax.f32 %v4527_v63, 0.0 }
 0x333   :  { %v2128_v4 = vmax.f32 %v4528_v3, 0.0  ;;  %v1998_v58 = vpop.f32.mrb[94].mxu1 }
 0x334   :  { %v4529_v51 = vadd.f32 %v1998_v58, %v5725_v18  ;;  %v2000_v60 = vpop.f32.mrb[95].mxu1 }
 0x335   :  { %v4530_v14 = vadd.f32 %v2000_v60, %v5727_v61  ;;  %2301 = vmatprep.mubr.f32.mxu0 %v2128_v4 }
 0x336   :  { %2302 = vmatmul.mubr.f32.gmra.mrb[124].mxu0 %v2127_v26  ;;  %v2129_v59 = vmax.f32 %v4529_v51, 0.0 }
 0x337   :  { %v2130_v33 = vmax.f32 %v4530_v14, 0.0  ;;  %v2004_v6 = vpop.f32.mrb[96].mxu1 }
 0x338   :  { %v4531_v40 = vadd.f32 %v2004_v6, %v5725_v18  ;;  %v2006_v31 = vpop.f32.mrb[97].mxu1 }
 0x339   :  { %v4532_v19 = vadd.f32 %v2006_v31, %v5727_v61  ;;  %2306 = vmatprep.mubr.f32.mxu0 %v2130_v33 }
 0x33a   :  { %2307 = vmatmul.mubr.f32.gmra.mrb[126].mxu0 %v2129_v59  ;;  %v2131_v45 = vmax.f32 %v4531_v40, 0.0 }
 0x33b   :  { %v2132_v57 = vmax.f32 %v4532_v19, 0.0  ;;  %v2010_v55 = vpop.f32.mrb[98].mxu1 }
 0x33c   :  { %v4533_v8 = vadd.f32 %v2010_v55, %v5725_v18  ;;  %v2012_v29 = vpop.f32.mrb[99].mxu1 }
 0x33d   :  { %v4534_v44 = vadd.f32 %v2012_v29, %v5727_v61  ;;  %2311 = vmatprep.mubr.f32.mxu0 %v2132_v57 }
 0x33e   :  { %2312 = vmatmul.mubr.f32.gmra.mrb[128].mxu0 %v2131_v45  ;;  %v2133_v49 = vmax.f32 %v4533_v8, 0.0 }
 0x33f   :  { %v2134_v46 = vmax.f32 %v4534_v44, 0.0  ;;  %v2016_v12 = vpop.f32.mrb[100].mxu1 }
 0x340   :  { %v4535_v30 = vadd.f32 %v2016_v12, %v5725_v18  ;;  %v2018_v39 = vpop.f32.mrb[101].mxu1 }
 0x341   :  { %v4536_v50 = vadd.f32 %v2018_v39, %v5727_v61  ;;  %2316 = vmatprep.mubr.f32.mxu0 %v2134_v46 }
 0x342   :  { %2317 = vmatmul.mubr.f32.gmra.mrb[130].mxu0 %v2133_v49  ;;  %v2135_v10 = vmax.f32 %v4535_v30, 0.0 }
 0x343   :  { %v2136_v52 = vmax.f32 %v4536_v50, 0.0  ;;  %v2022_v34 = vpop.f32.mrb[102].mxu1 }
 0x344   :  { %v4537_v41 = vadd.f32 %v2022_v34, %v5725_v18  ;;  %v2024_v0 = vpop.f32.mrb[103].mxu1 }
 0x345   :  { %v4538_v35 = vadd.f32 %v2024_v0, %v5727_v61  ;;  %2321 = vmatprep.mubr.f32.mxu0 %v2136_v52 }
 0x346   :  { %2322 = vmatmul.mubr.f32.gmra.mrb[132].mxu0 %v2135_v10  ;;  %v2137_v54 = vmax.f32 %v4537_v41, 0.0 }
 0x347   :  { %v2138_v24 = vmax.f32 %v4538_v35, 0.0  ;;  %v2028_v32 = vpop.f32.mrb[104].mxu1 }
 0x348   :  { %v4539_v15 = vadd.f32 %v2028_v32, %v5725_v18  ;;  %v2030_v1 = vpop.f32.mrb[105].mxu1 }
 0x349   :  { %v4540_v27 = vadd.f32 %v2030_v1, %v5727_v61  ;;  %2326 = vmatprep.mubr.f32.mxu0 %v2138_v24 }
 0x34a   :  { %2327 = vmatmul.mubr.f32.gmra.mrb[134].mxu0 %v2137_v54  ;;  %v2139_v2 = vmax.f32 %v4539_v15, 0.0 }
 0x34b   :  { %v2140_v47 = vmax.f32 %v4540_v27, 0.0  ;;  %v2034_v7 = vpop.f32.mrb[106].mxu1 }
 0x34c   :  { %v4541_v23 = vadd.f32 %v2034_v7, %v5725_v18  ;;  %v2036_v53 = vpop.f32.mrb[107].mxu1 }
 0x34d   :  { %v4542_v25 = vadd.f32 %v2036_v53, %v5727_v61  ;;  %2331 = vmatprep.mubr.f32.mxu0 %v2140_v47 }
 0x34e   :  { %2332 = vmatmul.mubr.f32.gmra.mrb[136].mxu0 %v2139_v2  ;;  %v2141_v21 = vmax.f32 %v4541_v23, 0.0 }
 0x34f   :  { %v2142_v38 = vmax.f32 %v4542_v25, 0.0  ;;  %v2040_v42 = vpop.f32.mrb[108].mxu1 }
 0x350   :  { %v4543_v56 = vadd.f32 %v2040_v42, %v5725_v18  ;;  %v2042_v17 = vpop.f32.mrb[109].mxu1 }
 0x351   :  { %v4544_v48 = vadd.f32 %v2042_v17, %v5727_v61  ;;  %2336 = vmatprep.mubr.f32.mxu0 %v2142_v38 }
 0x352   :  { %2337 = vmatmul.mubr.f32.gmra.mrb[138].mxu0 %v2141_v21  ;;  %v2143_v9 = vmax.f32 %v4543_v56, 0.0  ;;  %v2165_v21 = vsub.s32 2, %v5971_v62 }
 0x353   :  { %v2144_v20 = vmax.f32 %v4544_v48, 0.0  ;;  %v2046_v13 = vpop.f32.mrb[110].mxu1 }
 0x354   :  { %v4545_v36 = vadd.f32 %v2046_v13, %v5725_v18  ;;  %v2048_v22 = vpop.f32.mrb[111].mxu1  ;;  %v5795_v56 = vrot.slane %v5722_v11, %v2165_v21  ;;  %v369_v13 = vld [vmem:[#allocation4 + $0x490] sm:$0xff] }
 0x355   :  { %v4546_v43 = vadd.f32 %v2048_v22, %v5727_v61  ;;  %2341 = vmatprep.mubr.f32.mxu0 %v2144_v20  ;;  %v371_v22 = vld [vmem:[#allocation4 + $0x4c0] sm:$0xff] }
 0x356   :  { %2342 = vmatmul.mubr.f32.gmra.mrb[140].mxu0 %v2143_v9  ;;  %v2145_v5 = vmax.f32 %v4545_v36, 0.0 }
 0x357   :  { %v2146_v37 = vmax.f32 %v4546_v43, 0.0  ;;  %v2052_v16 = vpop.f32.mrb[112].mxu1  ;;  %v372_v43 = vld [vmem:[#allocation4 + $0x4d8] sm:$0xff] }
 0x358   :  { %v4547_v63 = vadd.f32 %v2052_v16, %v5725_v18  ;;  %v2054_v28 = vpop.f32.mrb[113].mxu1 }
 0x359   :  { %v4548_v3 = vadd.f32 %v2054_v28, %v5727_v61  ;;  %2346 = vmatprep.mubr.f32.mxu0 %v2146_v37 }
 0x35a   :  { %2347 = vmatmul.mubr.f32.gmra.mrb[142].mxu0 %v2145_v5  ;;  %v2147_v26 = vmax.f32 %v4547_v63, 0.0  ;;  %v4439_v63 = vpack.c.bf16 %v372_v43, %v371_v22 }
 0x35b   :  { %v2148_v4 = vmax.f32 %v4548_v3, 0.0  ;;  %v2058_v58 = vpop.f32.mrb[114].mxu1  ;;  %v373_v3 = vld [vmem:[#allocation4 + $0x4f0] sm:$0xff] }
 0x35c   :  { %v4549_v51 = vadd.f32 %v2058_v58, %v5725_v18  ;;  %v2060_v60 = vpop.f32.mrb[115].mxu1 }
 0x35d   :  { %v4550_v14 = vadd.f32 %v2060_v60, %v5727_v61  ;;  %2351 = vmatprep.mubr.f32.mxu0 %v2148_v4  ;;  %v374_v4 = vld [vmem:[#allocation4 + $0x508] sm:$0xff] }
 0x35e   :  { %2352 = vmatmul.mubr.f32.gmra.mrb[144].mxu0 %v2147_v26  ;;  %v2149_v59 = vmax.f32 %v4549_v51, 0.0  ;;  %v4443_v60 = vpack.c.bf16 %v374_v4, %v373_v3 }
 0x35f   :  { %v2150_v33 = vmax.f32 %v4550_v14, 0.0  ;;  %v2064_v6 = vpop.f32.mrb[116].mxu1 }
 0x360   :  { %v4551_v40 = vadd.f32 %v2064_v6, %v5725_v18  ;;  %v2066_v31 = vpop.f32.mrb[117].mxu1  ;;  %v376_v6 = vld [vmem:[#allocation4 + $0x538] sm:$0xff] }
 0x361   :  { %v4552_v19 = vadd.f32 %v2066_v31, %v5727_v61  ;;  %2356 = vmatprep.mubr.f32.mxu0 %v2150_v33  ;;  %v375_v33 = vld [vmem:[#allocation4 + $0x520] sm:$0xff] }
 0x362   :  { %2357 = vmatmul.mubr.f32.gmra.mrb[146].mxu0 %v2149_v59  ;;  %v2151_v45 = vmax.f32 %v4551_v40, 0.0 }
 0x363   :  { %v2152_v57 = vmax.f32 %v4552_v19, 0.0  ;;  %v2070_v55 = vpop.f32.mrb[118].mxu1  ;;  %v4447_v19 = vpack.c.bf16 %v376_v6, %v375_v33 }
 0x364   :  { %v4553_v8 = vadd.f32 %v2070_v55, %v5725_v18  ;;  %v2072_v29 = vpop.f32.mrb[119].mxu1  ;;  %v377_v55 = vld [vmem:[#allocation4 + $0x550] sm:$0xff] }
 0x365   :  { %v4554_v44 = vadd.f32 %v2072_v29, %v5727_v61  ;;  %2361 = vmatprep.mubr.f32.mxu0 %v2152_v57 }
 0x366   :  { %2362 = vmatmul.mubr.f32.gmra.mrb[148].mxu0 %v2151_v45  ;;  %v2153_v49 = vmax.f32 %v4553_v8, 0.0  ;;  %v378_v45 = vld [vmem:[#allocation4 + $0x568] sm:$0xff] }
 0x367   :  { %v2154_v46 = vmax.f32 %v4554_v44, 0.0  ;;  %v2076_v12 = vpop.f32.mrb[120].mxu1 }
 0x368   :  { %v4555_v30 = vadd.f32 %v2076_v12, %v5725_v18  ;;  %v2078_v39 = vpop.f32.mrb[121].mxu1 }
 0x369   :  { %v4556_v50 = vadd.f32 %v2078_v39, %v5727_v61  ;;  %2366 = vmatprep.mubr.f32.mxu0 %v2154_v46  ;;  %v4451_v46 = vpack.c.bf16 %v378_v45, %v377_v55 }
 0x36a   :  { %2367 = vmatmul.mubr.f32.gmra.mrb[150].mxu0 %v2153_v49  ;;  %v2155_v10 = vmax.f32 %v4555_v30, 0.0  ;;  %v379_v49 = vld [vmem:[#allocation4 + $0x580] sm:$0xff]  ;;  %v380_v30 = vld [vmem:[#allocation4 + $0x598] sm:$0xff] }
 0x36b   :  { %v2156_v52 = vmax.f32 %v4556_v50, 0.0  ;;  %v2082_v34 = vpop.f32.mrb[122].mxu1 }
 0x36c   :  { %v4557_v41 = vadd.f32 %v2082_v34, %v5725_v18  ;;  %v2084_v0 = vpop.f32.mrb[123].mxu1  ;;  %v4455_v34 = vpack.c.bf16 %v380_v30, %v379_v49 }
 0x36d   :  { %v4558_v35 = vadd.f32 %v2084_v0, %v5727_v61  ;;  %2371 = vmatprep.mubr.f32.mxu0 %v2156_v52  ;;  %v382_v0 = vld [vmem:[#allocation4 + $0x5c8] sm:$0xff] }
 0x36e   :  { %2372 = vmatmul.mubr.f32.gmra.mrb[152].mxu0 %v2155_v10  ;;  %v2157_v54 = vmax.f32 %v4557_v41, 0.0  ;;  %v381_v41 = vld [vmem:[#allocation4 + $0x5b0] sm:$0xff] }
 0x36f   :  { %v2158_v24 = vmax.f32 %v4558_v35, 0.0  ;;  %v2088_v32 = vpop.f32.mrb[124].mxu1 }
 0x370   :  { %v4559_v15 = vadd.f32 %v2088_v32, %v5725_v18  ;;  %v2090_v1 = vpop.f32.mrb[125].mxu1 }
 0x371   :  { %v4560_v27 = vadd.f32 %v2090_v1, %v5727_v61  ;;  %2376 = vmatprep.mubr.f32.mxu0 %v2158_v24  ;;  %v383_v1 = vld [vmem:[#allocation4 + $0x5e0] sm:$0xff] }
 0x372   :  { %2377 = vmatmul.mubr.f32.gmra.mrb[154].mxu0 %v2157_v54  ;;  %v2159_v2 = vmax.f32 %v4559_v15, 0.0  ;;  %v4459_v54 = vpack.c.bf16 %v382_v0, %v381_v41 }
 0x373   :  { %v2160_v47 = vmax.f32 %v4560_v27, 0.0  ;;  %v2094_v7 = vpop.f32.mrb[126].mxu1  ;;  %v384_v27 = vld [vmem:[#allocation4 + $0x5f8] sm:$0xff] }
 0x374   :  { %v4561_v23 = vadd.f32 %v2094_v7, %v5725_v18  ;;  %v2096_v53 = vpop.f32.mrb[127].mxu1  ;;  %v370_v18 = vld [vmem:[#allocation4 + $0x4a8] sm:$0xff] }
 0x375   :  { %v4562_v25 = vadd.f32 %v2096_v53, %v5727_v61  ;;  %2381 = vmatprep.mubr.f32.mxu0 %v2160_v47  ;;  %v4435_v9 = vpack.c.bf16 %v370_v18, %v369_v13 }
 0x376   :  { %2382 = vmatmul.mubr.f32.gmra.mrb[156].mxu0 %v2159_v2  ;;  %v2161_v42 = vmax.f32 %v4561_v23, 0.0  ;;  %v4463_v23 = vpack.c.bf16 %v384_v27, %v383_v1 }
 0x377   :  { %v2162_v38 = vmax.f32 %v4562_v25, 0.0  ;;  %4436 = vmatprep.subr.bf16.mxu0 %v4435_v9 }
 0x379   :  { %2386 = vmatprep.mubr.f32.mxu0 %v2162_v38 }
 0x37a   :  { %2387 = vmatmul.mubr.f32.gmra.mrb[158].mxu0 %v2161_v42 }
 0x3d1   :  { %v2233_v17 = vpop.f32.mrb[96].mxu0 }
 0x3d2   :  { %v2234_v48 = vadd.f32 %v2233_v17, %v5795_v56  ;;  %v2235_v20 = vpop.f32.mrb[97].mxu0 }
 0x3d4   :  { %v2392_v36 = vmax.f32 %v2234_v48, 0.0 }
 0x3d5   :  { %v2238_v61 = vpop.f32.mrb[98].mxu0 }
 0x3d6   :  { %v2239_v37 = vadd.f32 %v2238_v61, %v5795_v56  ;;  %v2240_v16 = vpop.f32.mrb[99].mxu0  ;;  %3891 = vmatprep.mubr.f32.mxu0 %v2392_v36 }
 0x3d8   :  { %v2393_v5 = vmax.f32 %v2239_v37, 0.0 }
 0x3d9   :  { %v2243_v28 = vpop.f32.mrb[100].mxu0 }
 0x3da   :  { %v2244_v58 = vadd.f32 %v2243_v28, %v5795_v56  ;;  %v2245_v26 = vpop.f32.mrb[101].mxu0  ;;  %3892 = vmatmul.mubr.f32.vlgmr.msra.gmra.mrb[160].mxu0 %v2393_v5 }
 0x3db   :  { %4438 = vmatpush3.bf16.msra.mxu0 %v4435_v9 }
 0x3dc   :  { %v2394_v51 = vmax.f32 %v2244_v58, 0.0  ;;  %4440 = vmatprep.subr.bf16.mxu0 %v4439_v63 }
 0x3dd   :  { %v2248_v14 = vpop.f32.mrb[102].mxu0 }
 0x3de   :  { %v2249_v59 = vadd.f32 %v2248_v14, %v5795_v56  ;;  %v2250_v40 = vpop.f32.mrb[103].mxu0  ;;  %3894 = vmatprep.mubr.f32.mxu0 %v2394_v51 }
 0x3df   :  { %4442 = vmatpush3.bf16.msra.mxu0 %v4439_v63 }
 0x3e0   :  { %v2395_v31 = vmax.f32 %v2249_v59, 0.0  ;;  %4444 = vmatprep.subr.bf16.mxu0 %v4443_v60 }
 0x3e1   :  { %v2253_v57 = vpop.f32.mrb[104].mxu0 }
 0x3e2   :  { %v2254_v8 = vadd.f32 %v2253_v57, %v5795_v56  ;;  %v2255_v29 = vpop.f32.mrb[105].mxu0  ;;  %3895 = vmatmul.mubr.f32.gmra.mrb[162].mxu0 %v2395_v31 }
 0x3e3   :  { %4446 = vmatpush3.bf16.msra.mxu0 %v4443_v60 }
 0x3e4   :  { %v2396_v44 = vmax.f32 %v2254_v8, 0.0  ;;  %4448 = vmatprep.subr.bf16.mxu0 %v4447_v19 }
 0x3e5   :  { %v2258_v12 = vpop.f32.mrb[106].mxu0 }
 0x3e6   :  { %v2259_v39 = vadd.f32 %v2258_v12, %v5795_v56  ;;  %v2260_v50 = vpop.f32.mrb[107].mxu0  ;;  %3897 = vmatprep.mubr.f32.mxu0 %v2396_v44 }
 0x3e7   :  { %4450 = vmatpush3.bf16.msra.mxu0 %v4447_v19 }
 0x3e8   :  { %v2397_v52 = vmax.f32 %v2259_v39, 0.0  ;;  %4452 = vmatprep.subr.bf16.mxu0 %v4451_v46 }
 0x3e9   :  { %v2263_v10 = vpop.f32.mrb[108].mxu0 }
 0x3ea   :  { %v2264_v35 = vadd.f32 %v2263_v10, %v5795_v56  ;;  %v2265_v24 = vpop.f32.mrb[109].mxu0  ;;  %3898 = vmatmul.mubr.f32.gmra.mrb[164].mxu0 %v2397_v52 }
 0x3eb   :  { %4454 = vmatpush3.bf16.msra.mxu0 %v4451_v46 }
 0x3ec   :  { %v2398_v32 = vmax.f32 %v2264_v35, 0.0  ;;  %4456 = vmatprep.subr.bf16.mxu0 %v4455_v34 }
 0x3ed   :  { %v2268_v15 = vpop.f32.mrb[110].mxu0 }
 0x3ee   :  { %v2269_v47 = vadd.f32 %v2268_v15, %v5795_v56  ;;  %v2270_v7 = vpop.f32.mrb[111].mxu0  ;;  %3900 = vmatprep.mubr.f32.mxu0 %v2398_v32 }
 0x3ef   :  { %4458 = vmatpush3.bf16.msra.mxu0 %v4455_v34 }
 0x3f0   :  { %v2399_v2 = vmax.f32 %v2269_v47, 0.0  ;;  %4460 = vmatprep.subr.bf16.mxu0 %v4459_v54 }
 0x3f1   :  { %v2273_v53 = vpop.f32.mrb[112].mxu0 }
 0x3f2   :  { %v2274_v25 = vadd.f32 %v2273_v53, %v5795_v56  ;;  %v2275_v38 = vpop.f32.mrb[113].mxu0  ;;  %3901 = vmatmul.mubr.f32.gmra.mrb[166].mxu0 %v2399_v2 }
 0x3f3   :  { %4462 = vmatpush3.bf16.msra.mxu0 %v4459_v54 }
 0x3f4   :  { %v2400_v42 = vmax.f32 %v2274_v25, 0.0  ;;  %4464 = vmatprep.subr.bf16.mxu0 %v4463_v23 }
 0x3f5   :  { %v2278_v21 = vpop.f32.mrb[114].mxu0 }
 0x3f6   :  { %v2279_v17 = vadd.f32 %v2278_v21, %v5795_v56  ;;  %v2280_v48 = vpop.f32.mrb[115].mxu0  ;;  %3903 = vmatprep.mubr.f32.mxu0 %v2400_v42 }
 0x3f7   :  { %4466 = vmatpush3.bf16.msra.mxu0 %v4463_v23 }
 0x3f8   :  { %v2401_v20 = vmax.f32 %v2279_v17, 0.0 }
 0x3f9   :  { %v2283_v13 = vpop.f32.mrb[116].mxu0 }
 0x3fa   :  { %v2284_v18 = vadd.f32 %v2283_v13, %v5795_v56  ;;  %v2285_v9 = vpop.f32.mrb[117].mxu0  ;;  %3904 = vmatmul.mubr.f32.gmra.mrb[168].mxu0 %v2401_v20 }
 0x3fc   :  { %v2402_v36 = vmax.f32 %v2284_v18, 0.0 }
 0x3fd   :  { %v2288_v61 = vpop.f32.mrb[118].mxu0 }
 0x3fe   :  { %v2289_v22 = vadd.f32 %v2288_v61, %v5795_v56  ;;  %v2290_v43 = vpop.f32.mrb[119].mxu0  ;;  %3906 = vmatprep.mubr.f32.mxu0 %v2402_v36 }
 0x400   :  { %v2403_v37 = vmax.f32 %v2289_v22, 0.0 }
 0x401   :  { %v2293_v16 = vpop.f32.mrb[120].mxu0 }
 0x402   :  { %v2294_v5 = vadd.f32 %v2293_v16, %v5795_v56  ;;  %v2295_v63 = vpop.f32.mrb[121].mxu0  ;;  %3907 = vmatmul.mubr.f32.gmra.mrb[170].mxu0 %v2403_v37 }
 0x404   :  { %v2404_v28 = vmax.f32 %v2294_v5, 0.0 }
 0x405   :  { %v2298_v3 = vpop.f32.mrb[122].mxu0 }
 0x406   :  { %v2299_v4 = vadd.f32 %v2298_v3, %v5795_v56  ;;  %v2300_v58 = vpop.f32.mrb[123].mxu0  ;;  %3909 = vmatprep.mubr.f32.mxu0 %v2404_v28 }
 0x408   :  { %v2405_v26 = vmax.f32 %v2299_v4, 0.0 }
 0x409   :  { %v2303_v51 = vpop.f32.mrb[124].mxu0 }
 0x40a   :  { %v2304_v60 = vadd.f32 %v2303_v51, %v5795_v56  ;;  %v2305_v14 = vpop.f32.mrb[125].mxu0  ;;  %3910 = vmatmul.mubr.f32.gmra.mrb[172].mxu0 %v2405_v26 }
 0x40c   :  { %v2406_v33 = vmax.f32 %v2304_v60, 0.0 }
 0x40d   :  { %v2308_v6 = vpop.f32.mrb[126].mxu0 }
 0x40e   :  { %v2309_v59 = vadd.f32 %v2308_v6, %v5795_v56  ;;  %v2310_v40 = vpop.f32.mrb[127].mxu0  ;;  %3912 = vmatprep.mubr.f32.mxu0 %v2406_v33 }
 0x410   :  { %v2407_v31 = vmax.f32 %v2309_v59, 0.0 }
 0x411   :  { %v2313_v19 = vpop.f32.mrb[128].mxu0 }
 0x412   :  { %v2314_v57 = vadd.f32 %v2313_v19, %v5795_v56  ;;  %v2315_v55 = vpop.f32.mrb[129].mxu0  ;;  %3913 = vmatmul.mubr.f32.gmra.mrb[174].mxu0 %v2407_v31 }
 0x414   :  { %v2408_v45 = vmax.f32 %v2314_v57, 0.0 }
 0x415   :  { %v2318_v8 = vpop.f32.mrb[130].mxu0 }
 0x416   :  { %v2319_v29 = vadd.f32 %v2318_v8, %v5795_v56  ;;  %v2320_v44 = vpop.f32.mrb[131].mxu0  ;;  %3915 = vmatprep.mubr.f32.mxu0 %v2408_v45  ;;  %v2426_v45 = vsub.s32 3, %v5971_v62 }
 0x417   :  { %v386_v44 = vld [vmem:[#allocation4 + $0x628] sm:$0xff] }
 0x418   :  { %v2409_v46 = vmax.f32 %v2319_v29, 0.0  ;;  %v5831_v8 = vrot.slane %v5722_v11, %v2426_v45  ;;  %v385_v29 = vld [vmem:[#allocation4 + $0x610] sm:$0xff] }
 0x419   :  { %v2323_v12 = vpop.f32.mrb[132].mxu0 }
 0x41a   :  { %v2324_v49 = vadd.f32 %v2323_v12, %v5795_v56  ;;  %v2325_v30 = vpop.f32.mrb[133].mxu0  ;;  %3916 = vmatmul.mubr.f32.gmra.mrb[176].mxu0 %v2409_v46  ;;  %v4467_v12 = vpack.c.bf16 %v386_v44, %v385_v29 }
 0x41c   :  { %v2410_v39 = vmax.f32 %v2324_v49, 0.0  ;;  %4468 = vmatprep.subr.bf16.mxu0 %v4467_v12 }
 0x41d   :  { %v2328_v50 = vpop.f32.mrb[134].mxu0 }
 0x41e   :  { %v2329_v52 = vadd.f32 %v2328_v50, %v5795_v56  ;;  %v2330_v34 = vpop.f32.mrb[135].mxu0  ;;  %3918 = vmatprep.mubr.f32.mxu0 %v2410_v39  ;;  %v388_v50 = vld [vmem:[#allocation4 + $0x658] sm:$0xff] }
 0x420   :  { %v2411_v10 = vmax.f32 %v2329_v52, 0.0 }
 0x421   :  { %v2333_v41 = vpop.f32.mrb[136].mxu0 }
 0x422   :  { %v2334_v0 = vadd.f32 %v2333_v41, %v5795_v56  ;;  %v2335_v35 = vpop.f32.mrb[137].mxu0  ;;  %3919 = vmatmul.mubr.f32.gmra.mrb[178].mxu0 %v2411_v10  ;;  %v389_v41 = vld [vmem:[#allocation4 + $0x670] sm:$0xff] }
 0x424   :  { %v2412_v24 = vmax.f32 %v2334_v0, 0.0  ;;  %v390_v0 = vld [vmem:[#allocation4 + $0x688] sm:$0xff] }
 0x425   :  { %v2338_v32 = vpop.f32.mrb[138].mxu0 }
 0x426   :  { %v2339_v54 = vadd.f32 %v2338_v32, %v5795_v56  ;;  %v2340_v15 = vpop.f32.mrb[139].mxu0  ;;  %3921 = vmatprep.mubr.f32.mxu0 %v2412_v24  ;;  %v4475_v32 = vpack.c.bf16 %v390_v0, %v389_v41 }
 0x427   :  { %v391_v15 = vld [vmem:[#allocation4 + $0x6a0] sm:$0xff] }
 0x428   :  { %v2413_v1 = vmax.f32 %v2339_v54, 0.0 }
 0x429   :  { %v2343_v27 = vpop.f32.mrb[140].mxu0 }
 0x42a   :  { %v2344_v47 = vadd.f32 %v2343_v27, %v5795_v56  ;;  %v2345_v7 = vpop.f32.mrb[141].mxu0  ;;  %3922 = vmatmul.mubr.f32.gmra.mrb[180].mxu0 %v2413_v1  ;;  %v392_v1 = vld [vmem:[#allocation4 + $0x6b8] sm:$0xff] }
 0x42b   :  { %v4479_v7 = vpack.c.bf16 %v392_v1, %v391_v15 }
 0x42c   :  { %v2414_v2 = vmax.f32 %v2344_v47, 0.0 }
 0x42d   :  { %v2348_v23 = vpop.f32.mrb[142].mxu0 }
 0x42e   :  { %v2349_v53 = vadd.f32 %v2348_v23, %v5795_v56  ;;  %v2350_v25 = vpop.f32.mrb[143].mxu0  ;;  %3924 = vmatprep.mubr.f32.mxu0 %v2414_v2  ;;  %v393_v2 = vld [vmem:[#allocation4 + $0x6d0] sm:$0xff]  ;;  %v394_v23 = vld [vmem:[#allocation4 + $0x6e8] sm:$0xff] }
 0x430   :  { %v2415_v38 = vmax.f32 %v2349_v53, 0.0 }
 0x431   :  { %v2353_v42 = vpop.f32.mrb[144].mxu0 }
 0x432   :  { %v2354_v21 = vadd.f32 %v2353_v42, %v5795_v56  ;;  %v2355_v17 = vpop.f32.mrb[145].mxu0  ;;  %3925 = vmatmul.mubr.f32.gmra.mrb[182].mxu0 %v2415_v38  ;;  %v4483_v42 = vpack.c.bf16 %v394_v23, %v393_v2 }
 0x433   :  { %v395_v17 = vld [vmem:[#allocation4 + $0x700] sm:$0xff] }
 0x434   :  { %v2416_v48 = vmax.f32 %v2354_v21, 0.0 }
 0x435   :  { %v2358_v20 = vpop.f32.mrb[146].mxu0 }
 0x436   :  { %v2359_v13 = vadd.f32 %v2358_v20, %v5795_v56  ;;  %v2360_v18 = vpop.f32.mrb[147].mxu0  ;;  %3927 = vmatprep.mubr.f32.mxu0 %v2416_v48  ;;  %v396_v48 = vld [vmem:[#allocation4 + $0x718] sm:$0xff] }
 0x437   :  { %v4487_v18 = vpack.c.bf16 %v396_v48, %v395_v17 }
 0x438   :  { %v2417_v9 = vmax.f32 %v2359_v13, 0.0 }
 0x439   :  { %v2363_v36 = vpop.f32.mrb[148].mxu0 }
 0x43a   :  { %v2364_v61 = vadd.f32 %v2363_v36, %v5795_v56  ;;  %v2365_v22 = vpop.f32.mrb[149].mxu0  ;;  %3928 = vmatmul.mubr.f32.gmra.mrb[184].mxu0 %v2417_v9  ;;  %v397_v9 = vld [vmem:[#allocation4 + $0x730] sm:$0xff]  ;;  %v398_v36 = vld [vmem:[#allocation4 + $0x748] sm:$0xff] }
 0x43c   :  { %v2418_v43 = vmax.f32 %v2364_v61, 0.0 }
 0x43d   :  { %v2368_v37 = vpop.f32.mrb[150].mxu0 }
 0x43e   :  { %v2369_v16 = vadd.f32 %v2368_v37, %v5795_v56  ;;  %v2370_v5 = vpop.f32.mrb[151].mxu0  ;;  %3930 = vmatprep.mubr.f32.mxu0 %v2418_v43  ;;  %v4491_v37 = vpack.c.bf16 %v398_v36, %v397_v9 }
 0x43f   :  { %v399_v5 = vld [vmem:[#allocation4 + $0x760] sm:$0xff] }
 0x440   :  { %v2419_v63 = vmax.f32 %v2369_v16, 0.0 }
 0x441   :  { %v2373_v28 = vpop.f32.mrb[152].mxu0 }
 0x442   :  { %v2374_v3 = vadd.f32 %v2373_v28, %v5795_v56  ;;  %v2375_v4 = vpop.f32.mrb[153].mxu0  ;;  %3931 = vmatmul.mubr.f32.gmra.mrb[186].mxu0 %v2419_v63  ;;  %v400_v63 = vld [vmem:[#allocation4 + $0x778] sm:$0xff] }
 0x443   :  { %v4495_v4 = vpack.c.bf16 %v400_v63, %v399_v5 }
 0x444   :  { %v2420_v58 = vmax.f32 %v2374_v3, 0.0 }
 0x445   :  { %v2378_v26 = vpop.f32.mrb[154].mxu0 }
 0x446   :  { %v2379_v51 = vadd.f32 %v2378_v26, %v5795_v56  ;;  %v2380_v60 = vpop.f32.mrb[155].mxu0  ;;  %3933 = vmatprep.mubr.f32.mxu0 %v2420_v58 }
 0x448   :  { %v2421_v14 = vmax.f32 %v2379_v51, 0.0 }
 0x449   :  { %v2383_v33 = vpop.f32.mrb[156].mxu0 }
 0x44a   :  { %v2384_v6 = vadd.f32 %v2383_v33, %v5795_v56  ;;  %v2385_v59 = vpop.f32.mrb[157].mxu0  ;;  %3934 = vmatmul.mubr.f32.gmra.mrb[188].mxu0 %v2421_v14 }
 0x44c   :  { %v2422_v40 = vmax.f32 %v2384_v6, 0.0 }
 0x44d   :  { %v2388_v31 = vpop.f32.mrb[158].mxu0 }
 0x44e   :  { %v2389_v19 = vadd.f32 %v2388_v31, %v5795_v56  ;;  %v2390_v57 = vpop.f32.mrb[159].mxu0  ;;  %3936 = vmatprep.mubr.f32.mxu0 %v2422_v40  ;;  %v387_v56 = vld [vmem:[#allocation4 + $0x640] sm:$0xff] }
 0x44f   :  { %v4471_v10 = vpack.c.bf16 %v388_v50, %v387_v56 }
 0x450   :  { %v2423_v55 = vmax.f32 %v2389_v19, 0.0 }
 0x452   :  { %3937 = vmatmul.mubr.f32.gmra.mrb[190].mxu0 %v2423_v55 }
 0x4ad   :  { %v3893_v46 = vpop.f32.mrb[160].mxu0 }
 0x4ae   :  { %v2500_v49 = vadd.f32 %v3893_v46, %v5831_v8  ;;  %v2494_v30 = vpop.f32.mrb[161].mxu0 }
 0x4af   :  { %v2495_v39 = vadd.f32 %v2494_v30, %v5831_v8 }
 0x4b0   :  { %v2654_v34 = vmax.f32 %v2500_v49, 0.0 }
 0x4b1   :  { %v2653_v52 = vmax.f32 %v2495_v39, 0.0 }
 0x4b3   :  { %3971 = vmatprep.mubr.f32.mxu0 %v2653_v52 }
 0x4b4   :  { %3972 = vmatmul.mubr.f32.vlgmr.msra.gmra.mrb[192].mxu0 %v2654_v34 }
 0x4b5   :  { %v3896_v11 = vpop.f32.mrb[162].mxu0  ;;  %4470 = vmatpush3.bf16.msra.mxu0 %v4467_v12 }
 0x4b6   :  { %v2510_v35 = vadd.f32 %v3896_v11, %v5831_v8  ;;  %v2504_v24 = vpop.f32.mrb[163].mxu0  ;;  %4472 = vmatprep.subr.bf16.mxu0 %v4471_v10 }
 0x4b7   :  { %v2505_v54 = vadd.f32 %v2504_v24, %v5831_v8 }
 0x4b8   :  { %v2656_v47 = vmax.f32 %v2510_v35, 0.0 }
 0x4b9   :  { %v2655_v27 = vmax.f32 %v2505_v54, 0.0  ;;  %4474 = vmatpush3.bf16.msra.mxu0 %v4471_v10 }
 0x4ba   :  { %4476 = vmatprep.subr.bf16.mxu0 %v4475_v32 }
 0x4bb   :  { %3974 = vmatprep.mubr.f32.mxu0 %v2655_v27 }
 0x4bc   :  { %3975 = vmatmul.mubr.f32.gmra.mrb[194].mxu0 %v2656_v47 }
 0x4bd   :  { %v3899_v53 = vpop.f32.mrb[164].mxu0  ;;  %4478 = vmatpush3.bf16.msra.mxu0 %v4475_v32 }
 0x4be   :  { %v2520_v25 = vadd.f32 %v3899_v53, %v5831_v8  ;;  %v2514_v38 = vpop.f32.mrb[165].mxu0  ;;  %4480 = vmatprep.subr.bf16.mxu0 %v4479_v7 }
 0x4bf   :  { %v2515_v21 = vadd.f32 %v2514_v38, %v5831_v8 }
 0x4c0   :  { %v2658_v13 = vmax.f32 %v2520_v25, 0.0 }
 0x4c1   :  { %v2657_v20 = vmax.f32 %v2515_v21, 0.0  ;;  %4482 = vmatpush3.bf16.msra.mxu0 %v4479_v7 }
 0x4c2   :  { %4484 = vmatprep.subr.bf16.mxu0 %v4483_v42 }
 0x4c3   :  { %3977 = vmatprep.mubr.f32.mxu0 %v2657_v20 }
 0x4c4   :  { %3978 = vmatmul.mubr.f32.gmra.mrb[196].mxu0 %v2658_v13 }
 0x4c5   :  { %v3902_v61 = vpop.f32.mrb[166].mxu0  ;;  %4486 = vmatpush3.bf16.msra.mxu0 %v4483_v42 }
 0x4c6   :  { %v2530_v22 = vadd.f32 %v3902_v61, %v5831_v8  ;;  %v2524_v43 = vpop.f32.mrb[167].mxu0  ;;  %4488 = vmatprep.subr.bf16.mxu0 %v4487_v18 }
 0x4c7   :  { %v2525_v16 = vadd.f32 %v2524_v43, %v5831_v8 }
 0x4c8   :  { %v2660_v3 = vmax.f32 %v2530_v22, 0.0 }
 0x4c9   :  { %v2659_v28 = vmax.f32 %v2525_v16, 0.0  ;;  %4490 = vmatpush3.bf16.msra.mxu0 %v4487_v18 }
 0x4ca   :  { %4492 = vmatprep.subr.bf16.mxu0 %v4491_v37 }
 0x4cb   :  { %3980 = vmatprep.mubr.f32.mxu0 %v2659_v28 }
 0x4cc   :  { %3981 = vmatmul.mubr.f32.gmra.mrb[198].mxu0 %v2660_v3 }
 0x4cd   :  { %v3905_v58 = vpop.f32.mrb[168].mxu0  ;;  %4494 = vmatpush3.bf16.msra.mxu0 %v4491_v37 }
 0x4ce   :  { %v2540_v26 = vadd.f32 %v3905_v58, %v5831_v8  ;;  %v2534_v51 = vpop.f32.mrb[169].mxu0  ;;  %4496 = vmatprep.subr.bf16.mxu0 %v4495_v4 }
 0x4cf   :  { %v2535_v60 = vadd.f32 %v2534_v51, %v5831_v8 }
 0x4d0   :  { %v2662_v33 = vmax.f32 %v2540_v26, 0.0 }
 0x4d1   :  { %v2661_v14 = vmax.f32 %v2535_v60, 0.0  ;;  %4498 = vmatpush3.bf16.msra.mxu0 %v4495_v4 }
 0x4d3   :  { %3983 = vmatprep.mubr.f32.mxu0 %v2661_v14 }
 0x4d4   :  { %3984 = vmatmul.mubr.f32.gmra.mrb[200].mxu0 %v2662_v33 }
 0x4d5   :  { %v3908_v6 = vpop.f32.mrb[170].mxu0 }
 0x4d6   :  { %v2550_v59 = vadd.f32 %v3908_v6, %v5831_v8  ;;  %v2544_v40 = vpop.f32.mrb[171].mxu0 }
 0x4d7   :  { %v2545_v31 = vadd.f32 %v2544_v40, %v5831_v8 }
 0x4d8   :  { %v2664_v57 = vmax.f32 %v2550_v59, 0.0 }
 0x4d9   :  { %v2663_v19 = vmax.f32 %v2545_v31, 0.0 }
 0x4db   :  { %3986 = vmatprep.mubr.f32.mxu0 %v2663_v19  ;;  %v2687_v19 = vsub.s32 4, %v5971_v62 }
 0x4dc   :  { %3987 = vmatmul.mubr.f32.gmra.mrb[202].mxu0 %v2664_v57  ;;  %v5866_v57 = vld [vmem:[#allocation2 + $0x280] sm:$0xff] }
 0x4dd   :  { %v3911_v55 = vpop.f32.mrb[172].mxu0 }
 0x4de   :  { %v2560_v45 = vadd.f32 %v3911_v55, %v5831_v8  ;;  %v2554_v29 = vpop.f32.mrb[173].mxu0  ;;  %v5869_v55 = vrot.slane %v5866_v57, %v2687_v19 }
 0x4df   :  { %v2555_v44 = vadd.f32 %v2554_v29, %v5831_v8 }
 0x4e0   :  { %v2666_v12 = vmax.f32 %v2560_v45, 0.0 }
 0x4e1   :  { %v2665_v46 = vmax.f32 %v2555_v44, 0.0 }
 0x4e3   :  { %3989 = vmatprep.mubr.f32.mxu0 %v2665_v46 }
 0x4e4   :  { %3990 = vmatmul.mubr.f32.gmra.mrb[204].mxu0 %v2666_v12 }
 0x4e5   :  { %v3914_v49 = vpop.f32.mrb[174].mxu0 }
 0x4e6   :  { %v2570_v30 = vadd.f32 %v3914_v49, %v5831_v8  ;;  %v2564_v39 = vpop.f32.mrb[175].mxu0 }
 0x4e7   :  { %v2565_v56 = vadd.f32 %v2564_v39, %v5831_v8 }
 0x4e8   :  { %v2668_v52 = vmax.f32 %v2570_v30, 0.0 }
 0x4e9   :  { %v2667_v50 = vmax.f32 %v2565_v56, 0.0 }
 0x4eb   :  { %3992 = vmatprep.mubr.f32.mxu0 %v2667_v50 }
 0x4ec   :  { %3993 = vmatmul.mubr.f32.gmra.mrb[206].mxu0 %v2668_v52 }
 0x4ed   :  { %v3917_v34 = vpop.f32.mrb[176].mxu0 }
 0x4ee   :  { %v2580_v10 = vadd.f32 %v3917_v34, %v5831_v8  ;;  %v2574_v41 = vpop.f32.mrb[177].mxu0 }
 0x4ef   :  { %v2575_v0 = vadd.f32 %v2574_v41, %v5831_v8 }
 0x4f0   :  { %v2670_v35 = vmax.f32 %v2580_v10, 0.0 }
 0x4f1   :  { %v2669_v11 = vmax.f32 %v2575_v0, 0.0 }
 0x4f3   :  { %3995 = vmatprep.mubr.f32.mxu0 %v2669_v11 }
 0x4f4   :  { %3996 = vmatmul.mubr.f32.gmra.mrb[208].mxu0 %v2670_v35 }
 0x4f5   :  { %v3920_v24 = vpop.f32.mrb[178].mxu0 }
 0x4f6   :  { %v2590_v32 = vadd.f32 %v3920_v24, %v5831_v8  ;;  %v2584_v54 = vpop.f32.mrb[179].mxu0 }
 0x4f7   :  { %v2585_v15 = vadd.f32 %v2584_v54, %v5831_v8 }
 0x4f8   :  { %v2672_v27 = vmax.f32 %v2590_v32, 0.0 }
 0x4f9   :  { %v2671_v1 = vmax.f32 %v2585_v15, 0.0 }
 0x4fb   :  { %3998 = vmatprep.mubr.f32.mxu0 %v2671_v1 }
 0x4fc   :  { %3999 = vmatmul.mubr.f32.gmra.mrb[210].mxu0 %v2672_v27 }
 0x4fd   :  { %v3923_v47 = vpop.f32.mrb[180].mxu0 }
 0x4fe   :  { %v2600_v7 = vadd.f32 %v3923_v47, %v5831_v8  ;;  %v2594_v2 = vpop.f32.mrb[181].mxu0 }
 0x4ff   :  { %v2595_v23 = vadd.f32 %v2594_v2, %v5831_v8 }
 0x500   :  { %v2674_v25 = vmax.f32 %v2600_v7, 0.0 }
 0x501   :  { %v2673_v53 = vmax.f32 %v2595_v23, 0.0 }
 0x503   :  { %4001 = vmatprep.mubr.f32.mxu0 %v2673_v53 }
 0x504   :  { %4002 = vmatmul.mubr.f32.gmra.mrb[212].mxu0 %v2674_v25 }
 0x505   :  { %v3926_v38 = vpop.f32.mrb[182].mxu0 }
 0x506   :  { %v2610_v42 = vadd.f32 %v3926_v38, %v5831_v8  ;;  %v2604_v21 = vpop.f32.mrb[183].mxu0 }
 0x507   :  { %v2605_v17 = vadd.f32 %v2604_v21, %v5831_v8 }
 0x508   :  { %v2676_v20 = vmax.f32 %v2610_v42, 0.0 }
 0x509   :  { %v2675_v48 = vmax.f32 %v2605_v17, 0.0 }
 0x50b   :  { %4004 = vmatprep.mubr.f32.mxu0 %v2675_v48 }
 0x50c   :  { %4005 = vmatmul.mubr.f32.gmra.mrb[214].mxu0 %v2676_v20 }
 0x50d   :  { %v3929_v13 = vpop.f32.mrb[184].mxu0 }
 0x50e   :  { %v2620_v18 = vadd.f32 %v3929_v13, %v5831_v8  ;;  %v2614_v9 = vpop.f32.mrb[185].mxu0 }
 0x50f   :  { %v2615_v36 = vadd.f32 %v2614_v9, %v5831_v8 }
 0x510   :  { %v2678_v22 = vmax.f32 %v2620_v18, 0.0 }
 0x511   :  { %v2677_v61 = vmax.f32 %v2615_v36, 0.0 }
 0x513   :  { %4007 = vmatprep.mubr.f32.mxu0 %v2677_v61 }
 0x514   :  { %4008 = vmatmul.mubr.f32.gmra.mrb[216].mxu0 %v2678_v22 }
 0x515   :  { %v3932_v43 = vpop.f32.mrb[186].mxu0 }
 0x516   :  { %v2630_v37 = vadd.f32 %v3932_v43, %v5831_v8  ;;  %v2624_v16 = vpop.f32.mrb[187].mxu0 }
 0x517   :  { %v2625_v5 = vadd.f32 %v2624_v16, %v5831_v8 }
 0x518   :  { %v2680_v28 = vmax.f32 %v2630_v37, 0.0 }
 0x519   :  { %v2679_v63 = vmax.f32 %v2625_v5, 0.0 }
 0x51b   :  { %4010 = vmatprep.mubr.f32.mxu0 %v2679_v63 }
 0x51c   :  { %4011 = vmatmul.mubr.f32.gmra.mrb[218].mxu0 %v2680_v28 }
 0x51d   :  { %v3935_v3 = vpop.f32.mrb[188].mxu0 }
 0x51e   :  { %v2640_v4 = vadd.f32 %v3935_v3, %v5831_v8  ;;  %v2634_v58 = vpop.f32.mrb[189].mxu0 }
 0x51f   :  { %v2635_v26 = vadd.f32 %v2634_v58, %v5831_v8 }
 0x520   :  { %v2682_v60 = vmax.f32 %v2640_v4, 0.0 }
 0x521   :  { %v2681_v51 = vmax.f32 %v2635_v26, 0.0 }
 0x523   :  { %4013 = vmatprep.mubr.f32.mxu0 %v2681_v51 }
 0x524   :  { %4014 = vmatmul.mubr.f32.gmra.mrb[220].mxu0 %v2682_v60 }
 0x525   :  { %v3938_v14 = vpop.f32.mrb[190].mxu0 }
 0x526   :  { %v2650_v33 = vadd.f32 %v3938_v14, %v5831_v8  ;;  %v2644_v6 = vpop.f32.mrb[191].mxu0 }
 0x527   :  { %v2645_v59 = vadd.f32 %v2644_v6, %v5831_v8 }
 0x528   :  { %v2684_v31 = vmax.f32 %v2650_v33, 0.0 }
 0x529   :  { %v2683_v40 = vmax.f32 %v2645_v59, 0.0 }
 0x52b   :  { %4016 = vmatprep.mubr.f32.mxu0 %v2683_v40 }
 0x52c   :  { %4017 = vmatmul.mubr.f32.gmra.mrb[222].mxu0 %v2684_v31 }
 0x587   :  { %v3973_v45 = vpop.f32.mrb[192].mxu0 }
 0x588   :  { %v2761_v29 = vadd.f32 %v3973_v45, %v5869_v55  ;;  %v2755_v44 = vpop.f32.mrb[193].mxu0 }
 0x589   :  { %v2756_v46 = vadd.f32 %v2755_v44, %v5869_v55 }
 0x58a   :  { %v2915_v49 = vmax.f32 %v2761_v29, 0.0 }
 0x58b   :  { %v2914_v12 = vmax.f32 %v2756_v46, 0.0 }
 0x58d   :  { %4051 = vmatprep.mubr.f32.mxu0 %v2914_v12 }
 0x58e   :  { %4052 = vmatmul.mubr.f32.vlgmr.msra.gmra.mrb[224].mxu0 %v2915_v49 }
 0x58f   :  { %v3976_v8 = vpop.f32.mrb[194].mxu0 }
 0x590   :  { %v2771_v30 = vadd.f32 %v3976_v8, %v5869_v55  ;;  %v2765_v39 = vpop.f32.mrb[195].mxu0 }
 0x591   :  { %v2766_v56 = vadd.f32 %v2765_v39, %v5869_v55 }
 0x592   :  { %v2917_v52 = vmax.f32 %v2771_v30, 0.0 }
 0x593   :  { %v2916_v50 = vmax.f32 %v2766_v56, 0.0 }
 0x595   :  { %4054 = vmatprep.mubr.f32.mxu0 %v2916_v50 }
 0x596   :  { %4055 = vmatmul.mubr.f32.gmra.mrb[226].mxu0 %v2917_v52 }
 0x597   :  { %v3979_v34 = vpop.f32.mrb[196].mxu0 }
 0x598   :  { %v2781_v10 = vadd.f32 %v3979_v34, %v5869_v55  ;;  %v2775_v41 = vpop.f32.mrb[197].mxu0 }
 0x599   :  { %v2776_v0 = vadd.f32 %v2775_v41, %v5869_v55 }
 0x59a   :  { %v2919_v35 = vmax.f32 %v2781_v10, 0.0 }
 0x59b   :  { %v2918_v11 = vmax.f32 %v2776_v0, 0.0 }
 0x59d   :  { %4057 = vmatprep.mubr.f32.mxu0 %v2918_v11 }
 0x59e   :  { %4058 = vmatmul.mubr.f32.gmra.mrb[228].mxu0 %v2919_v35 }
 0x59f   :  { %v3982_v24 = vpop.f32.mrb[198].mxu0 }
 0x5a0   :  { %v2791_v32 = vadd.f32 %v3982_v24, %v5869_v55  ;;  %v2785_v54 = vpop.f32.mrb[199].mxu0 }
 0x5a1   :  { %v2786_v15 = vadd.f32 %v2785_v54, %v5869_v55 }
 0x5a2   :  { %v2921_v27 = vmax.f32 %v2791_v32, 0.0 }
 0x5a3   :  { %v2920_v1 = vmax.f32 %v2786_v15, 0.0 }
 0x5a5   :  { %4060 = vmatprep.mubr.f32.mxu0 %v2920_v1 }
 0x5a6   :  { %4061 = vmatmul.mubr.f32.gmra.mrb[230].mxu0 %v2921_v27 }
 0x5a7   :  { %v3985_v47 = vpop.f32.mrb[200].mxu0 }
 0x5a8   :  { %v2801_v7 = vadd.f32 %v3985_v47, %v5869_v55  ;;  %v2795_v2 = vpop.f32.mrb[201].mxu0 }
 0x5a9   :  { %v2796_v23 = vadd.f32 %v2795_v2, %v5869_v55 }
 0x5aa   :  { %v2923_v25 = vmax.f32 %v2801_v7, 0.0 }
 0x5ab   :  { %v2922_v53 = vmax.f32 %v2796_v23, 0.0 }
 0x5ad   :  { %4063 = vmatprep.mubr.f32.mxu0 %v2922_v53 }
 0x5ae   :  { %4064 = vmatmul.mubr.f32.gmra.mrb[232].mxu0 %v2923_v25 }
 0x5af   :  { %v3988_v38 = vpop.f32.mrb[202].mxu0 }
 0x5b0   :  { %v2811_v42 = vadd.f32 %v3988_v38, %v5869_v55  ;;  %v2805_v21 = vpop.f32.mrb[203].mxu0 }
 0x5b1   :  { %v2806_v17 = vadd.f32 %v2805_v21, %v5869_v55 }
 0x5b2   :  { %v2925_v20 = vmax.f32 %v2811_v42, 0.0 }
 0x5b3   :  { %v2924_v48 = vmax.f32 %v2806_v17, 0.0 }
 0x5b5   :  { %4066 = vmatprep.mubr.f32.mxu0 %v2924_v48 }
 0x5b6   :  { %4067 = vmatmul.mubr.f32.gmra.mrb[234].mxu0 %v2925_v20  ;;  %v2948_v20 = vsub.s32 5, %v5971_v62 }
 0x5b7   :  { %v3991_v13 = vpop.f32.mrb[204].mxu0 }
 0x5b8   :  { %v2821_v18 = vadd.f32 %v3991_v13, %v5869_v55  ;;  %v2815_v9 = vpop.f32.mrb[205].mxu0  ;;  %v3177_v13 = vadd.s32 8, %v5971_v62 }
 0x5b9   :  { %v2816_v36 = vadd.f32 %v2815_v9, %v5869_v55 }
 0x5ba   :  { %v2927_v22 = vmax.f32 %v2821_v18, 0.0  ;;  %v2949_v18 = vrot.slane %v5866_v57, %v2948_v20  ;;  %vm3243_vm0 = vcmp.lt.s32.totalorder %v3177_v13, 10 }
 0x5bb   :  { %v2926_v61 = vmax.f32 %v2816_v36, 0.0 }
 0x5bd   :  { %4069 = vmatprep.mubr.f32.mxu0 %v2926_v61 }
 0x5be   :  { %4070 = vmatmul.mubr.f32.gmra.mrb[236].mxu0 %v2927_v22 }
 0x5bf   :  { %v3994_v43 = vpop.f32.mrb[206].mxu0 }
 0x5c0   :  { %v2831_v37 = vadd.f32 %v3994_v43, %v5869_v55  ;;  %v2825_v16 = vpop.f32.mrb[207].mxu0 }
 0x5c1   :  { %v2826_v5 = vadd.f32 %v2825_v16, %v5869_v55 }
 0x5c2   :  { %v2929_v28 = vmax.f32 %v2831_v37, 0.0 }
 0x5c3   :  { %v2928_v63 = vmax.f32 %v2826_v5, 0.0 }
 0x5c5   :  { %4072 = vmatprep.mubr.f32.mxu0 %v2928_v63 }
 0x5c6   :  { %4073 = vmatmul.mubr.f32.gmra.mrb[238].mxu0 %v2929_v28 }
 0x5c7   :  { %v3997_v3 = vpop.f32.mrb[208].mxu0 }
 0x5c8   :  { %v2841_v4 = vadd.f32 %v3997_v3, %v5869_v55  ;;  %v2835_v58 = vpop.f32.mrb[209].mxu0 }
 0x5c9   :  { %v2836_v26 = vadd.f32 %v2835_v58, %v5869_v55 }
 0x5ca   :  { %v2931_v60 = vmax.f32 %v2841_v4, 0.0 }
 0x5cb   :  { %v2930_v51 = vmax.f32 %v2836_v26, 0.0 }
 0x5cd   :  { %4075 = vmatprep.mubr.f32.mxu0 %v2930_v51 }
 0x5ce   :  { %4076 = vmatmul.mubr.f32.gmra.mrb[240].mxu0 %v2931_v60 }
 0x5cf   :  { %v4000_v14 = vpop.f32.mrb[210].mxu0 }
 0x5d0   :  { %v2851_v33 = vadd.f32 %v4000_v14, %v5869_v55  ;;  %v2845_v6 = vpop.f32.mrb[211].mxu0 }
 0x5d1   :  { %v2846_v59 = vadd.f32 %v2845_v6, %v5869_v55 }
 0x5d2   :  { %v2933_v31 = vmax.f32 %v2851_v33, 0.0 }
 0x5d3   :  { %v2932_v40 = vmax.f32 %v2846_v59, 0.0 }
 0x5d5   :  { %4078 = vmatprep.mubr.f32.mxu0 %v2932_v40 }
 0x5d6   :  { %4079 = vmatmul.mubr.f32.gmra.mrb[242].mxu0 %v2933_v31 }
 0x5d7   :  { %v4003_v19 = vpop.f32.mrb[212].mxu0 }
 0x5d8   :  { %v2861_v45 = vadd.f32 %v4003_v19, %v5869_v55  ;;  %v2855_v29 = vpop.f32.mrb[213].mxu0 }
 0x5d9   :  { %v2856_v44 = vadd.f32 %v2855_v29, %v5869_v55 }
 0x5da   :  { %v2935_v12 = vmax.f32 %v2861_v45, 0.0 }
 0x5db   :  { %v2934_v46 = vmax.f32 %v2856_v44, 0.0 }
 0x5dd   :  { %4081 = vmatprep.mubr.f32.mxu0 %v2934_v46 }
 0x5de   :  { %4082 = vmatmul.mubr.f32.gmra.mrb[244].mxu0 %v2935_v12 }
 0x5df   :  { %v4006_v49 = vpop.f32.mrb[214].mxu0 }
 0x5e0   :  { %v2871_v8 = vadd.f32 %v4006_v49, %v5869_v55  ;;  %v2865_v30 = vpop.f32.mrb[215].mxu0 }
 0x5e1   :  { %v2866_v39 = vadd.f32 %v2865_v30, %v5869_v55 }
 0x5e2   :  { %v2937_v50 = vmax.f32 %v2871_v8, 0.0 }
 0x5e3   :  { %v2936_v56 = vmax.f32 %v2866_v39, 0.0 }
 0x5e5   :  { %4084 = vmatprep.mubr.f32.mxu0 %v2936_v56 }
 0x5e6   :  { %4085 = vmatmul.mubr.f32.gmra.mrb[246].mxu0 %v2937_v50 }
 0x5e7   :  { %v4009_v52 = vpop.f32.mrb[216].mxu0 }
 0x5e8   :  { %v2881_v34 = vadd.f32 %v4009_v52, %v5869_v55  ;;  %v2875_v10 = vpop.f32.mrb[217].mxu0 }
 0x5e9   :  { %v2876_v41 = vadd.f32 %v2875_v10, %v5869_v55 }
 0x5ea   :  { %v2939_v11 = vmax.f32 %v2881_v34, 0.0 }
 0x5eb   :  { %v2938_v0 = vmax.f32 %v2876_v41, 0.0 }
 0x5ed   :  { %4087 = vmatprep.mubr.f32.mxu0 %v2938_v0 }
 0x5ee   :  { %4088 = vmatmul.mubr.f32.gmra.mrb[248].mxu0 %v2939_v11 }
 0x5ef   :  { %v4012_v35 = vpop.f32.mrb[218].mxu0 }
 0x5f0   :  { %v2891_v24 = vadd.f32 %v4012_v35, %v5869_v55  ;;  %v2885_v32 = vpop.f32.mrb[219].mxu0 }
 0x5f1   :  { %v2886_v54 = vadd.f32 %v2885_v32, %v5869_v55 }
 0x5f2   :  { %v2941_v1 = vmax.f32 %v2891_v24, 0.0 }
 0x5f3   :  { %v2940_v15 = vmax.f32 %v2886_v54, 0.0 }
 0x5f5   :  { %4090 = vmatprep.mubr.f32.mxu0 %v2940_v15 }
 0x5f6   :  { %4091 = vmatmul.mubr.f32.gmra.mrb[250].mxu0 %v2941_v1 }
 0x5f7   :  { %v4015_v27 = vpop.f32.mrb[220].mxu0 }
 0x5f8   :  { %v2901_v47 = vadd.f32 %v4015_v27, %v5869_v55  ;;  %v2895_v7 = vpop.f32.mrb[221].mxu0 }
 0x5f9   :  { %v2896_v2 = vadd.f32 %v2895_v7, %v5869_v55 }
 0x5fa   :  { %v2943_v53 = vmax.f32 %v2901_v47, 0.0 }
 0x5fb   :  { %v2942_v23 = vmax.f32 %v2896_v2, 0.0 }
 0x5fd   :  { %4093 = vmatprep.mubr.f32.mxu0 %v2942_v23 }
 0x5fe   :  { %4094 = vmatmul.mubr.f32.gmra.mrb[252].mxu0 %v2943_v53 }
 0x5ff   :  { %v4018_v25 = vpop.f32.mrb[222].mxu0 }
 0x600   :  { %v2911_v38 = vadd.f32 %v4018_v25, %v5869_v55  ;;  %v2905_v42 = vpop.f32.mrb[223].mxu0 }
 0x601   :  { %v2906_v21 = vadd.f32 %v2905_v42, %v5869_v55 }
 0x602   :  { %v2945_v48 = vmax.f32 %v2911_v38, 0.0 }
 0x603   :  { %v2944_v17 = vmax.f32 %v2906_v21, 0.0 }
 0x605   :  { %4096 = vmatprep.mubr.f32.mxu0 %v2944_v17 }
 0x606   :  { %4097 = vmatmul.mubr.f32.gmra.mrb[254].mxu0 %v2945_v48 }
 0x661   :  { %v4053_v9 = vpop.f32.mrb[224].mxu0 }
 0x662   :  { %v3022_v36 = vadd.f32 %v4053_v9, %v2949_v18  ;;  %v3016_v61 = vpop.f32.mrb[225].mxu0 }
 0x663   :  { %v3017_v22 = vadd.f32 %v3016_v61, %v2949_v18 }
 0x664   :  { %v3339_v43 = vsel %vm3243_vm0, %v3022_v36, -1e+30 }
 0x665   :  { %3371 = vst [vmem:[%s5924_s3 + $0x8] sm:$0xff] %v3339_v43  ;;  %v3403_v55 = vmax.f32 %v3339_v43, -1e+30  ;;  %3370 = vst [vmem:[%s5924_s3] sm:$0xff] %v3017_v22  ;;  %v3402_v37 = vmax.f32 %v3017_v22, -1e+30 }
 0x667   :  { %v3407_v16 = vmax.f32 %v3403_v55, -1e+30  ;;  %v3406_v62 = vmax.f32 %v3402_v37, -1e+30 }
 0x669   :  { %v3411_v5 = vmax.f32 %v3407_v16, -1e+30  ;;  %v3410_v57 = vmax.f32 %v3406_v62, -1e+30  ;;  %v4056_v63 = vpop.f32.mrb[226].mxu0 }
 0x66a   :  { %v3026_v28 = vpop.f32.mrb[227].mxu0 }
 0x66b   :  { %v3415_v3 = vmax.f32 %v3411_v5, -1e+30  ;;  %v3414_v4 = vmax.f32 %v3410_v57, -1e+30 }
 0x66d   :  { %v3419_v58 = vmax.f32 %v3415_v3, -1e+30  ;;  %v3418_v26 = vmax.f32 %v3414_v4, -1e+30 }
 0x66f   :  { %v3423_v51 = vmax.f32 %v3419_v58, -1e+30  ;;  %v3422_v60 = vmax.f32 %v3418_v26, -1e+30 }
 0x671   :  { %v3427_v14 = vmax.f32 %v3423_v51, -1e+30  ;;  %v3426_v33 = vmax.f32 %v3422_v60, -1e+30  ;;  %v4059_v6 = vpop.f32.mrb[228].mxu0 }
 0x672   :  { %v3036_v59 = vpop.f32.mrb[229].mxu0 }
 0x673   :  { %v3430_v40 = vmax.f32 %v3426_v33, %v3427_v14 }
 0x675   :  { %v3432_v31 = vmax.f32 %v3430_v40, -1e+30 }
 0x677   :  { %v3433_v19 = vrot.slane %v3432_v31, 4 }
 0x679   :  { %v3434_v45 = vmax.f32 %v3432_v31, %v3433_v19  ;;  %v4062_v29 = vpop.f32.mrb[230].mxu0 }
 0x67a   :  { %v3046_v44 = vpop.f32.mrb[231].mxu0 }
 0x67b   :  { %v3435_v46 = vrot.slane %v3434_v45, 2 }
 0x67d   :  { %v3436_v12 = vmax.f32 %v3434_v45, %v3435_v46 }
 0x67f   :  { %v3437_v49 = vrot.slane %v3436_v12, 1 }
 0x681   :  { %v5912_v8 = vmax.f32 %v3436_v12, %v3437_v49  ;;  %v4065_v30 = vpop.f32.mrb[232].mxu0 }
 0x682   :  { %v3056_v39 = vpop.f32.mrb[233].mxu0 }
 0x683   :  { %v3439_v56 = vsub.f32 %v3017_v22, %v5912_v8  ;;  %v3440_v50 = vsub.f32 %v3339_v43, %v5912_v8  ;;  %v3441_v52 = vsub.f32 -1e+30, %v5912_v8 }
 0x685   :  { %v3471_v34 = vmul.f32 1.442695, %v3439_v56  ;;  %v3473_v10 = vmul.f32 1.442695, %v3440_v50  ;;  %v3475_v41 = vmul.f32 1.442695, %v3441_v52 }
 0x687   :  { %4700 = vpow2.f32 %v3471_v34 }
 0x688   :  { %4702 = vpow2.f32 %v3473_v10 }
 0x689   :  { %v4068_v0 = vpop.f32.mrb[234].mxu0  ;;  %4704 = vpow2.f32 %v3475_v41 }
 0x68a   :  { %v3066_v11 = vpop.f32.mrb[235].mxu0 }
 0x691   :  { %v4701_v35 = vpop.eup %4700  ;;  %v4071_v24 = vpop.f32.mrb[236].mxu0 }
 0x692   :  { %v4703_v32 = vpop.eup %4702  ;;  %v3076_v54 = vpop.f32.mrb[237].mxu0 }
 0x693   :  { %v3535_v15 = vadd.f32 %v4703_v32, %v4701_v35  ;;  %v4705_v1 = vpop.eup %4704 }
 0x695   :  { %v3536_v27 = vadd.f32 %v4705_v1, %v3535_v15 }
 0x697   :  { %v3537_v47 = vadd.f32 %v4705_v1, %v3536_v27 }
 0x699   :  { %v3538_v7 = vadd.f32 %v4705_v1, %v3537_v47  ;;  %v4074_v2 = vpop.f32.mrb[238].mxu0 }
 0x69a   :  { %v3086_v23 = vpop.f32.mrb[239].mxu0 }
 0x69b   :  { %v3539_v53 = vadd.f32 %v4705_v1, %v3538_v7 }
 0x69d   :  { %v3540_v25 = vadd.f32 %v4705_v1, %v3539_v53 }
 0x69f   :  { %v3541_v38 = vadd.f32 %v4705_v1, %v3540_v25 }
 0x6a1   :  { %v3542_v42 = vadd.f32 %v4705_v1, %v3541_v38  ;;  %v4077_v21 = vpop.f32.mrb[240].mxu0 }
 0x6a2   :  { %v3096_v17 = vpop.f32.mrb[241].mxu0 }
 0x6a3   :  { %v3543_v48 = vadd.f32 %v4705_v1, %v3542_v42 }
 0x6a5   :  { %v3544_v20 = vadd.f32 %v4705_v1, %v3543_v48 }
 0x6a7   :  { %v3545_v13 = vadd.f32 %v4705_v1, %v3544_v20 }
 0x6a9   :  { %v3546_v18 = vadd.f32 %v4705_v1, %v3545_v13  ;;  %v4080_v9 = vpop.f32.mrb[242].mxu0 }
 0x6aa   :  { %v3106_v36 = vpop.f32.mrb[243].mxu0 }
 0x6ab   :  { %v3547_v61 = vadd.f32 %v4705_v1, %v3546_v18 }
 0x6ad   :  { %v3548_v22 = vadd.f32 %v4705_v1, %v3547_v61 }
 0x6af   :  { %v3549_v43 = vadd.f32 %v4705_v1, %v3548_v22 }
 0x6b1   :  { %v3550_v55 = vadd.f32 %v4705_v1, %v3549_v43  ;;  %v4083_v37 = vpop.f32.mrb[244].mxu0 }
 0x6b2   :  { %v3116_v16 = vpop.f32.mrb[245].mxu0 }
 0x6b3   :  { %v3551_v62 = vadd.f32 %v4705_v1, %v3550_v55 }
 0x6b5   :  { %v3552_v5 = vadd.f32 %v4705_v1, %v3551_v62 }
 0x6b7   :  { %v3553_v57 = vadd.f32 %v4705_v1, %v3552_v5 }
 0x6b9   :  { %v3554_v63 = vadd.f32 %v4705_v1, %v3553_v57  ;;  %v4086_v28 = vpop.f32.mrb[246].mxu0 }
 0x6ba   :  { %v3126_v3 = vpop.f32.mrb[247].mxu0 }
 0x6bb   :  { %v3555_v4 = vadd.f32 %v4705_v1, %v3554_v63 }
 0x6bd   :  { %v3556_v58 = vadd.f32 %v4705_v1, %v3555_v4 }
 0x6bf   :  { %v3557_v26 = vadd.f32 %v4705_v1, %v3556_v58 }
 0x6c1   :  { %v3558_v51 = vadd.f32 %v4705_v1, %v3557_v26  ;;  %v4089_v60 = vpop.f32.mrb[248].mxu0 }
 0x6c2   :  { %v3136_v14 = vpop.f32.mrb[249].mxu0 }
 0x6c3   :  { %v3559_v33 = vadd.f32 %v4705_v1, %v3558_v51 }
 0x6c5   :  { %v3560_v6 = vadd.f32 %v4705_v1, %v3559_v33 }
 0x6c7   :  { %v3561_v59 = vadd.f32 %v4705_v1, %v3560_v6 }
 0x6c9   :  { %v3562_v40 = vadd.f32 %v4705_v1, %v3561_v59  ;;  %v4092_v31 = vpop.f32.mrb[250].mxu0 }
 0x6ca   :  { %v3146_v19 = vpop.f32.mrb[251].mxu0 }
 0x6cb   :  { %v3563_v45 = vadd.f32 %v4705_v1, %v3562_v40 }
 0x6cd   :  { %v3564_v29 = vadd.f32 %v4705_v1, %v3563_v45 }
 0x6cf   :  { %v3565_v44 = vadd.f32 %v4705_v1, %v3564_v29 }
 0x6d1   :  { %v3566_v46 = vrot.slane %v3565_v44, 4  ;;  %v4095_v12 = vpop.f32.mrb[252].mxu0 }
 0x6d2   :  { %v3156_v49 = vpop.f32.mrb[253].mxu0 }
 0x6d3   :  { %v3567_v30 = vadd.f32 %v3566_v46, %v3565_v44 }
 0x6d5   :  { %v3568_v39 = vrot.slane %v3567_v30, 2 }
 0x6d7   :  { %v3569_v56 = vadd.f32 %v3568_v39, %v3567_v30 }
 0x6d9   :  { %v3570_v50 = vrot.slane %v3569_v56, 1  ;;  %v4098_v52 = vpop.f32.mrb[254].mxu0 }
 0x6da   :  { %v3166_v34 = vpop.f32.mrb[255].mxu0 }
 0x6db   :  { %v3571_v10 = vadd.f32 %v3570_v50, %v3569_v56 }
 0x6dd   :  { %v3573_v41 = vsel %vm3572_vm1, %v5912_v8, %v3571_v10 }
 0x6de   :  { %v3575_v0 = vsel %vm3574_vm2, %v3573_v41, 0.0 }
 0x6df   :  { %3576 = vst [vmem:[%s5925_s4] sm:$0xff] %v3575_v0 }
 0x6e0   :  { %3585 = vsyncpa [#allocation3], 1 }
 0x6e1   :  { %3586 = vsyncpa [#allocation5], 1 }

</bundles_post_ra>
